<compile_context>
chip_gen: v5e
topology: v5e:2x2
jax: 0.10.0
libtpu: 0.0.40
codegen_flags: <defaults>
</compile_context>

<pallas_src>
import functools

import jax
import jax.numpy as jnp
from jax import lax
from jax.experimental import pallas as pl
from jax.experimental.pallas import tpu as pltpu

EPS = 1e-5
LANE = 128


def _device_tuning():
    """(vmem_limit_bytes, default_row_tile) per TPU generation."""
    try:
        kind = jax.devices()[0].device_kind.lower()
    except Exception:  # defensive: fall back to conservative settings
        kind = ""
    if ("v5" in kind) or ("v6" in kind):
        # 128 MiB physical VMEM parts: large tiles reach the HBM roofline.
        return 96 * 1024 * 1024, 1024
    # v7x (64 MiB per TensorCore) and unknown parts: stay conservative.
    return 48 * 1024 * 1024, 512


# --------------------------------------------------------------------------
# Kernels
# --------------------------------------------------------------------------
def _matmul_bias_stats(a_bf16, w_ref, b_ref, h_ref, st_ref):
    """h = a @ w + b (bf16 MXU, f32 acc); store h (bf16) and per-tile sum/sumsq."""
    h = jnp.dot(a_bf16, w_ref[...], preferred_element_type=jnp.float32) + b_ref[...]
    h_ref[...] = h.astype(h_ref.dtype)
    s = jnp.sum(h, axis=0, keepdims=True)
    ss = jnp.sum(h * h, axis=0, keepdims=True)
    st_ref[...] = jnp.concatenate([s, ss], axis=0)[None]


def _conv1x1_stats_kernel(x_ref, w_ref, b_ref, h_ref, st_ref):
    # pass 1: conv1 (pure channel matmul) + partial BN stats. x is bf16 already.
    _matmul_bias_stats(x_ref[...], w_ref, b_ref, h_ref, st_ref)


def _bn_relu_conv1x1_stats_kernel(x_ref, s_ref, t_ref, w_ref, b_ref, h_ref, st_ref):
    # pass 3: folded bn (scale/shift) + relu, then 1x1 conv + stats.
    a = jnp.maximum(x_ref[...].astype(jnp.float32) * s_ref[...] + t_ref[...], 0.0)
    _matmul_bias_stats(a.astype(jnp.bfloat16), w_ref, b_ref, h_ref, st_ref)


def _shift_flat(x, s):
    """out[r] = x[r + s] along the leading (flattened-row) axis, zero filled."""
    if s == 0:
        return x
    n = x.shape[0]
    z = jnp.zeros((abs(s),) + x.shape[1:], x.dtype)
    if s > 0:
        return jnp.concatenate([x[s:], z], axis=0)
    return jnp.concatenate([z, x[: n + s]], axis=0)


def _bn_relu_conv3x3_stats_kernel(h1_ref, s_ref, t_ref, w_ref, b_ref, h2_ref, st_ref):
    # pass 2: bn1+relu, then 3x3 conv as 9 accumulated K=C matmuls (no im2col
    # patches tensor).  Each tap is a zero-filled flat row shift of the bf16
    # activation; column-border wraparound is masked with a per-row select
    # (row-border rows are covered by the zero fill + the column mask).
    _, H, W, C = h1_ref.shape
    HW = H * W
    a = jnp.maximum(h1_ref[...].astype(jnp.float32) * s_ref[...] + t_ref[...], 0.0)
    a = a.reshape(HW, C).astype(jnp.bfloat16)

    # flat-row column index (for masking the W-border of shifted taps)
    j_idx = lax.broadcasted_iota(jnp.int32, (HW, 1), 0) % W

    acc = jnp.broadcast_to(b_ref[...], (HW, C)).astype(jnp.float32)
    tap_i = 0
    for dh in (-1, 0, 1):
        for dw in (-1, 0, 1):
            tap = _shift_flat(a, dh * W + dw)
            if dw != 0:
                valid = (j_idx + dw >= 0) & (j_idx + dw < W)
                tap = jnp.where(valid, tap, jnp.bfloat16(0))
            # TODO(synk): pltpu.roll (XLU) + mask would avoid the slice+concat
            # copy per tap; kept as static slices for unambiguous semantics.
            acc = acc + jnp.dot(tap, w_ref[tap_i],
                                preferred_element_type=jnp.float32)
            tap_i += 1

    h2_ref[...] = acc.reshape(1, H, W, C).astype(h2_ref.dtype)
    s = jnp.sum(acc, axis=0, keepdims=True)
    ss = jnp.sum(acc * acc, axis=0, keepdims=True)
    st_ref[...] = jnp.concatenate([s, ss], axis=0)[None]


def _bn3_add_relu_kernel(h_ref, idn_ref, s_ref, t_ref, o_ref):
    # pass 4: bn3 + residual add (bf16 identity, upcast to f32) + relu.
    y = (h_ref[...].astype(jnp.float32) * s_ref[...] + t_ref[...]
         + idn_ref[...].astype(jnp.float32))
    o_ref[...] = jnp.maximum(y, 0.0).astype(o_ref.dtype)


# --------------------------------------------------------------------------
# Host-side helpers
# --------------------------------------------------------------------------
def _round_up(n, m):
    return (n + m - 1) // m * m


def _pick_row_tile(m, target):
    """Largest multiple-of-8 divisor of m <= target; else the smallest one
    above target (bounded); only degenerate to m as a last resort."""
    if m <= target:
        return m
    divs = [d for d in range(8, min(m, 8 * target) + 1, 8) if m % d == 0]
    below = [d for d in divs if d <= target]
    if below:
        return max(below)
    if divs:
        return min(divs)
    # TODO(synk): pad M to a tile multiple and mask the pad rows out of the BN
    # statistics instead of falling back to one giant tile.
    return m


def _bn_fold(stats, gamma, beta, count):
    """Reduce per-tile (sum, sumsq) partials -> folded BN scale/shift (f32).

    Variance uses E[x^2] - E[x]^2 from f32 partial sums (clamped >= 0); for
    very large N*H*W a centered / Welford-style reduction would be preferable.
    """
    s = jnp.sum(stats[:, 0, :], axis=0)
    ss = jnp.sum(stats[:, 1, :], axis=0)
    mean = s / count
    var = jnp.maximum(ss / count - mean * mean, 0.0)     # biased, like BatchNorm2d
    scale = gamma.reshape(-1).astype(jnp.float32) * lax.rsqrt(var + EPS)
    shift = beta.reshape(-1).astype(jnp.float32) - mean * scale
    return scale[None, :], shift[None, :]


@functools.partial(jax.jit, static_argnames=("tm", "vmem_limit"))
def _block_impl(x_nchw, params, *, tm, vmem_limit):
    N, Cin, H, W = x_nchw.shape
    C = params["w1"].shape[1]
    Cout = params["w3"].shape[1]
    assert Cin == Cout, "identity_downsample=None requires in_ch == out_ch*4"

    Cp = _round_up(max(C, LANE), LANE)       # bottleneck width, lane-padded
    Cip = _round_up(max(Cin, LANE), LANE)    # in/out channels, lane-padded
    M = N * H * W
    tm = _pick_row_tile(M, tm)
    tm4 = _pick_row_tile(M, 4 * tm)          # pass 4 is weight-free: larger tiles
    nt, nt4 = M // tm, M // tm4
    count = jnp.float32(M)

    cp = pltpu.CompilerParams(dimension_semantics=("parallel",),
                              vmem_limit_bytes=vmem_limit)

    # ---- staging: NCHW -> lane-padded NHWC rows, bf16 (halves HBM traffic) ----
    x_nhwc = jnp.transpose(x_nchw, (0, 2, 3, 1))
    x2d = jnp.pad(x_nhwc, ((0, 0), (0, 0), (0, 0), (0, Cip - Cin)))
    x2d = x2d.reshape(M, Cip).astype(jnp.bfloat16)

    def padw(w, r, c):
        return jnp.pad(w, ((0, r - w.shape[0]), (0, c - w.shape[1]))).astype(jnp.bfloat16)

    def padv(v, c):
        return jnp.pad(v.astype(jnp.float32), ((0, 0), (0, c - v.shape[1])))

    w1 = padw(params["w1"], Cip, Cp)
    w3 = padw(params["w3"], Cp, Cip)
    w2 = jnp.pad(params["w2"], ((0, 0), (0, Cp - C), (0, Cp - C))).astype(jnp.bfloat16)

    b1, g1, be1 = padv(params["b1"], Cp), padv(params["g1"], Cp), padv(params["be1"], Cp)
    b2, g2, be2 = padv(params["b2"], Cp), padv(params["g2"], Cp), padv(params["be2"], Cp)
    b3, g3, be3 = padv(params["b3"], Cip), padv(params["g3"], Cip), padv(params["be3"], Cip)

    def rows(t, c):
        return pl.BlockSpec((t, c), lambda i: (i, 0))

    vec_c = pl.BlockSpec((1, Cp), lambda i: (0, 0))
    vec_i = pl.BlockSpec((1, Cip), lambda i: (0, 0))
    st_c = pl.BlockSpec((1, 2, Cp), lambda i: (i, 0, 0))
    st_i = pl.BlockSpec((1, 2, Cip), lambda i: (i, 0, 0))

    # ---- pass 1: conv1 (1x1) + partial BN stats of h1 ----
    h1, st1 = pl.pallas_call(
        _conv1x1_stats_kernel,
        grid=(nt,),
        in_specs=[rows(tm, Cip),
                  pl.BlockSpec((Cip, Cp), lambda i: (0, 0)),
                  vec_c],
        out_specs=[rows(tm, Cp), st_c],
        out_shape=[jax.ShapeDtypeStruct((M, Cp), jnp.bfloat16),
                   jax.ShapeDtypeStruct((nt, 2, Cp), jnp.float32)],
        compiler_params=cp,
    )(x2d, w1, b1)
    s1, t1 = _bn_fold(st1, g1, be1, count)

    # ---- pass 2: bn1+relu -> conv2 (3x3, 9 accumulated dots) + stats of h2 ----
    # TODO(synk): tile over H with a 1-row halo and single-buffer the constant
    # weight blocks (pl.Buffered(1)) to further bound VMEM / balance v7x cores.
    h2, st2 = pl.pallas_call(
        _bn_relu_conv3x3_stats_kernel,
        grid=(N,),
        in_specs=[pl.BlockSpec((1, H, W, Cp), lambda n: (n, 0, 0, 0)),
                  pl.BlockSpec((1, Cp), lambda n: (0, 0)),
                  pl.BlockSpec((1, Cp), lambda n: (0, 0)),
                  pl.BlockSpec((9, Cp, Cp), lambda n: (0, 0, 0)),
                  pl.BlockSpec((1, Cp), lambda n: (0, 0))],
        out_specs=[pl.BlockSpec((1, H, W, Cp), lambda n: (n, 0, 0, 0)),
                   pl.BlockSpec((1, 2, Cp), lambda n: (n, 0, 0))],
        out_shape=[jax.ShapeDtypeStruct((N, H, W, Cp), jnp.bfloat16),
                   jax.ShapeDtypeStruct((N, 2, Cp), jnp.float32)],
        compiler_params=cp,
    )(h1.reshape(N, H, W, Cp), s1, t1, w2, b2)
    s2, t2 = _bn_fold(st2, g2, be2, count)

    # ---- pass 3: bn2+relu -> conv3 (1x1) + stats of h3 ----
    h3, st3 = pl.pallas_call(
        _bn_relu_conv1x1_stats_kernel,
        grid=(nt,),
        in_specs=[rows(tm, Cp), vec_c, vec_c,
                  pl.BlockSpec((Cp, Cip), lambda i: (0, 0)),
                  vec_i],
        out_specs=[rows(tm, Cip), st_i],
        out_shape=[jax.ShapeDtypeStruct((M, Cip), jnp.bfloat16),
                   jax.ShapeDtypeStruct((nt, 2, Cip), jnp.float32)],
        compiler_params=cp,
    )(h2.reshape(M, Cp), s2, t2, w3, b3)
    s3, t3 = _bn_fold(st3, g3, be3, count)

    # ---- pass 4: bn3 + residual add + relu ----
    out2d = pl.pallas_call(
        _bn3_add_relu_kernel,
        grid=(nt4,),
        in_specs=[rows(tm4, Cip), rows(tm4, Cip), vec_i, vec_i],
        out_specs=rows(tm4, Cip),
        out_shape=jax.ShapeDtypeStruct((M, Cip), x_nchw.dtype),
        compiler_params=cp,
    )(h3, x2d, s3, t3)

    out = out2d.reshape(N, H, W, Cip)[..., :Cin]
    # TODO(synk): when chaining blocks, keep the whole stage in bf16 padded
    # NHWC to skip this per-block f32 NCHW writeback / HBM-level transpose.
    return jnp.transpose(out, (0, 3, 1, 2))


def bottleneck_block(x_nchw, params, *, tm=None):
    """PyTorch-style NCHW in/out; kernels run in lane-padded, bf16 NHWC."""
    vmem_limit, tm_default = _device_tuning()
    return _block_impl(x_nchw, params, tm=int(tm if tm is not None else tm_default),
                       vmem_limit=int(vmem_limit))


# --------------------------------------------------------------------------
# Pure-JAX reference (same math) for a correctness cross-check
# --------------------------------------------------------------------------
def bottleneck_ref(x_nchw, p):
    x = jnp.transpose(x_nchw, (0, 2, 3, 1))

    def bn(h, g, b, relu=True):
        m = jnp.mean(h, axis=(0, 1, 2), keepdims=True)
        v = jnp.mean((h - m) ** 2, axis=(0, 1, 2), keepdims=True)
        y = (h - m) * lax.rsqrt(v + EPS) * g + b
        return jnp.maximum(y, 0.0) if relu else y

    h = jnp.einsum("nhwc,cd->nhwd", x, p["w1"]) + p["b1"]
    h = bn(h, p["g1"], p["be1"])
    C = p["w1"].shape[1]
    w2 = p["w2"].reshape(3, 3, C, C)  # HWIO
    h = lax.conv_general_dilated(h, w2, (1, 1), "SAME",
                                 dimension_numbers=("NHWC", "HWIO", "NHWC")) + p["b2"]
    h = bn(h, p["g2"], p["be2"])
    h = jnp.einsum("nhwc,cd->nhwd", h, p["w3"]) + p["b3"]
    h = bn(h, p["g3"], p["be3"], relu=False)
    out = jnp.maximum(h + x, 0.0)
    return jnp.transpose(out, (0, 3, 1, 2))


if __name__ == "__main__":
    key = jax.random.PRNGKey(0)
    N, out_ch, H, W = 2, 4, 16, 16
    expansion = 4
    Cin = out_ch * expansion  # 16; identity_downsample=None => in == out*4

    keys = jax.random.split(key, 13)

    def nrm(k, shape, scale=0.1):
        return (scale * jax.random.normal(k, shape)).astype(jnp.float32)

    params = {
        # conv weights stored as (Cin, Cout) for 1x1; (9, Cin, Cout) for 3x3
        "w1": nrm(keys[0], (Cin, out_ch)),
        "b1": nrm(keys[1], (1, out_ch)),
        "g1": 1.0 + nrm(keys[2], (1, out_ch)),
        "be1": nrm(keys[3], (1, out_ch)),
        "w2": nrm(keys[4], (9, out_ch, out_ch)),
        "b2": nrm(keys[5], (1, out_ch)),
        "g2": 1.0 + nrm(keys[6], (1, out_ch)),
        "be2": nrm(keys[7], (1, out_ch)),
        "w3": nrm(keys[8], (out_ch, Cin)),
        "b3": nrm(keys[9], (1, Cin)),
        "g3": 1.0 + nrm(keys[10], (1, Cin)),
        "be3": nrm(keys[11], (1, Cin)),
    }
    x = nrm(keys[12], (N, Cin, H, W), scale=1.0)  # NCHW like PyTorch

    # tm=128 -> 4 row-tiles per 1x1 pass, exercising the multi-tile BN reduction.
    out = jax.block_until_ready(bottleneck_block(x, params, tm=128))
    ref = jax.block_until_ready(bottleneck_ref(x, params))
    assert out.shape == (N, Cin, H, W)
    assert bool(jnp.allclose(out, ref, rtol=5e-2, atol=5e-2))
    print("KERNEL_OK")
</pallas_src>

<mosaic_0001>
module attributes {stable_mosaic.version = 11 : i64} {
  func.func @_conv1x1_stats_kernel(%arg0: i32, %arg1: memref<128x128xbf16, #tpu.memory_space<vmem>>, %arg2: memref<128x128xbf16, #tpu.memory_space<vmem>>, %arg3: memref<1x128xf32, #tpu.memory_space<vmem>>, %arg4: memref<128x128xbf16, #tpu.memory_space<vmem>>, %arg5: memref<1x2x128xf32, #tpu.memory_space<vmem>>) attributes {dimension_semantics = [#tpu.dimension_semantics<parallel>], iteration_bounds = array<i64: 4>, scalar_prefetch = 0 : i64, scratch_operands = 0 : i64, tpu.core_type = #tpu.core_type<tc>, window_params = [{transform_indices = @transform_0, window_bounds = array<i64: 128, 128>}, {pipeline_mode = #tpu.pipeline_mode<synchronous>, transform_indices = @transform_1, window_bounds = array<i64: 128, 128>}, {pipeline_mode = #tpu.pipeline_mode<synchronous>, transform_indices = @transform_2, window_bounds = array<i64: 1, 128>}, {transform_indices = @transform_3, window_bounds = array<i64: 128, 128>}, {transform_indices = @transform_4, window_bounds = array<i64: 1, 2, 128>}]} {
    %c0 = arith.constant 0 : index
    %c0_0 = arith.constant 0 : index
    %0 = vector.load %arg1[%c0, %c0_0] : memref<128x128xbf16, #tpu.memory_space<vmem>>, vector<128x128xbf16>
    %c0_1 = arith.constant 0 : index
    %c0_2 = arith.constant 0 : index
    %1 = vector.load %arg2[%c0_1, %c0_2] : memref<128x128xbf16, #tpu.memory_space<vmem>>, vector<128x128xbf16>
    %cst = arith.constant dense<0.000000e+00> : vector<128x128xf32>
    %2 = tpu.matmul %0, %1, %cst {dimension_numbers = #tpu.dot_dimension_numbers<[1], [0], [0], [1], [0, 0, 1, 1], [], []>} : vector<128x128xbf16>, vector<128x128xbf16>, vector<128x128xf32> -> vector<128x128xf32>
    %c0_3 = arith.constant 0 : index
    %c0_4 = arith.constant 0 : index
    %3 = vector.load %arg3[%c0_3, %c0_4] : memref<1x128xf32, #tpu.memory_space<vmem>>, vector<1x128xf32>
    %4 = vector.broadcast %3 : vector<1x128xf32> to vector<128x128xf32>
    %5 = arith.addf %2, %4 : vector<128x128xf32>
    %6 = arith.truncf %5 : vector<128x128xf32> to vector<128x128xbf16>
    %c0_5 = arith.constant 0 : index
    %c0_6 = arith.constant 0 : index
    %7 = vector.load %arg4[%c0_5, %c0_6] : memref<128x128xbf16, #tpu.memory_space<vmem>>, vector<128x128xbf16>
    tpu.vector_store %arg4[%c0_5, %c0_6], %6 {strides = array<i32>} : memref<128x128xbf16, #tpu.memory_space<vmem>>, vector<128x128xbf16>,
    %cst_7 = arith.constant dense<0.000000e+00> : vector<128xf32>
    %8 = vector.multi_reduction <add>, %5, %cst_7 [0] : vector<128x128xf32> to vector<128xf32>
    %9 = vector.shape_cast %8 : vector<128xf32> to vector<1x128xf32>
    %10 = arith.mulf %5, %5 : vector<128x128xf32>
    %cst_8 = arith.constant dense<0.000000e+00> : vector<128xf32>
    %11 = vector.multi_reduction <add>, %10, %cst_8 [0] : vector<128x128xf32> to vector<128xf32>
    %12 = vector.shape_cast %11 : vector<128xf32> to vector<1x128xf32>
    %13 = tpu.concatenate %9, %12 in 0 : vector<1x128xf32>, vector<1x128xf32> -> vector<2x128xf32>
    %14 = vector.shape_cast %13 : vector<2x128xf32> to vector<1x2x128xf32>
    %c0_9 = arith.constant 0 : index
    %c0_10 = arith.constant 0 : index
    %c0_11 = arith.constant 0 : index
    %15 = vector.load %arg5[%c0_9, %c0_10, %c0_11] : memref<1x2x128xf32, #tpu.memory_space<vmem>>, vector<1x2x128xf32>
    tpu.vector_store %arg5[%c0_9, %c0_10, %c0_11], %14 {strides = array<i32>} : memref<1x2x128xf32, #tpu.memory_space<vmem>>, vector<1x2x128xf32>,
    return
  }
  func.func @transform_0(%arg0: i32) -> (i32, i32) {
    %c0_i32 = arith.constant 0 : i32
    %c0_i32_0 = arith.constant 0 : i32
    return %arg0, %c0_i32 : i32, i32
  }
  func.func @transform_1(%arg0: i32) -> (i32, i32) {
    %c0_i32 = arith.constant 0 : i32
    %c0_i32_0 = arith.constant 0 : i32
    %c0_i32_1 = arith.constant 0 : i32
    return %c0_i32, %c0_i32_0 : i32, i32
  }
  func.func @transform_2(%arg0: i32) -> (i32, i32) {
    %c0_i32 = arith.constant 0 : i32
    %c0_i32_0 = arith.constant 0 : i32
    %c0_i32_1 = arith.constant 0 : i32
    return %c0_i32, %c0_i32_0 : i32, i32
  }
  func.func @transform_3(%arg0: i32) -> (i32, i32) {
    %c0_i32 = arith.constant 0 : i32
    %c0_i32_0 = arith.constant 0 : i32
    return %arg0, %c0_i32 : i32, i32
  }
  func.func @transform_4(%arg0: i32) -> (i32, i32, i32) {
    %c0_i32 = arith.constant 0 : i32
    %c0_i32_0 = arith.constant 0 : i32
    %c0_i32_1 = arith.constant 0 : i32
    return %arg0, %c0_i32, %c0_i32_0 : i32, i32, i32
  }
}

module attributes {stable_mosaic.version = 11 : i64} {
  func.func @_bn_relu_conv3x3_stats_kernel(%arg0: i32, %arg1: memref<1x16x16x128xbf16, #tpu.memory_space<vmem>>, %arg2: memref<1x128xf32, #tpu.memory_space<vmem>>, %arg3: memref<1x128xf32, #tpu.memory_space<vmem>>, %arg4: memref<9x128x128xbf16, #tpu.memory_space<vmem>>, %arg5: memref<1x128xf32, #tpu.memory_space<vmem>>, %arg6: memref<1x16x16x128xbf16, #tpu.memory_space<vmem>>, %arg7: memref<1x2x128xf32, #tpu.memory_space<vmem>>) attributes {dimension_semantics = [#tpu.dimension_semantics<parallel>], iteration_bounds = array<i64: 2>, scalar_prefetch = 0 : i64, scratch_operands = 0 : i64, tpu.core_type = #tpu.core_type<tc>, window_params = [{transform_indices = @transform_0, window_bounds = array<i64: 1, 16, 16, 128>}, {pipeline_mode = #tpu.pipeline_mode<synchronous>, transform_indices = @transform_1, window_bounds = array<i64: 1, 128>}, {pipeline_mode = #tpu.pipeline_mode<synchronous>, transform_indices = @transform_2, window_bounds = array<i64: 1, 128>}, {pipeline_mode = #tpu.pipeline_mode<synchronous>, transform_indices = @transform_3, window_bounds = array<i64: 9, 128, 128>}, {pipeline_mode = #tpu.pipeline_mode<synchronous>, transform_indices = @transform_4, window_bounds = array<i64: 1, 128>}, {transform_indices = @transform_5, window_bounds = array<i64: 1, 16, 16, 128>}, {transform_indices = @transform_6, window_bounds = array<i64: 1, 2, 128>}]} {
    %c0 = arith.constant 0 : index
    %c0_0 = arith.constant 0 : index
    %c0_1 = arith.constant 0 : index
    %c0_2 = arith.constant 0 : index
    %0 = vector.load %arg1[%c0, %c0_0, %c0_1, %c0_2] : memref<1x16x16x128xbf16, #tpu.memory_space<vmem>>, vector<1x16x16x128xbf16>
    %1 = arith.extf %0 : vector<1x16x16x128xbf16> to vector<1x16x16x128xf32>
    %c0_3 = arith.constant 0 : index
    %c0_4 = arith.constant 0 : index
    %2 = vector.load %arg2[%c0_3, %c0_4] : memref<1x128xf32, #tpu.memory_space<vmem>>, vector<1x128xf32>
    %3 = vector.shape_cast %2 : vector<1x128xf32> to vector<1x1x1x128xf32>
    %4 = vector.broadcast %3 : vector<1x1x1x128xf32> to vector<1x16x16x128xf32>
    %5 = arith.mulf %1, %4 : vector<1x16x16x128xf32>
    %c0_5 = arith.constant 0 : index
    %c0_6 = arith.constant 0 : index
    %6 = vector.load %arg3[%c0_5, %c0_6] : memref<1x128xf32, #tpu.memory_space<vmem>>, vector<1x128xf32>
    %7 = vector.shape_cast %6 : vector<1x128xf32> to vector<1x1x1x128xf32>
    %8 = vector.broadcast %7 : vector<1x1x1x128xf32> to vector<1x16x16x128xf32>
    %9 = arith.addf %5, %8 : vector<1x16x16x128xf32>
    %cst = arith.constant 0.000000e+00 : f32
    %10 = vector.broadcast %cst : f32 to vector<1x16x16x128xf32>
    %11 = arith.maximumf %9, %10 : vector<1x16x16x128xf32>
    %12 = vector.shape_cast %11 : vector<1x16x16x128xf32> to vector<256x128xf32>
    %13 = arith.truncf %12 : vector<256x128xf32> to vector<256x128xbf16>
    %14 = tpu.iota {dimensions = array<i32: 0>} : vector<256x1xi32>
    %c16_i32 = arith.constant 16 : i32
    %c0_i32 = arith.constant 0 : i32
    %15 = arith.cmpi eq, %c16_i32, %c0_i32 : i32
    %c1_i32 = arith.constant 1 : i32
    %16 = arith.select %15, %c1_i32, %c16_i32 : i32
    %17 = vector.broadcast %16 : i32 to vector<256x1xi32>
    %18 = arith.remsi %14, %17 : vector<256x1xi32>
    %c0_i32_7 = arith.constant 0 : i32
    %19 = vector.broadcast %c0_i32_7 : i32 to vector<256x1xi32>
    %20 = arith.cmpi ne, %18, %19 : vector<256x1xi32>
    %c0_i32_8 = arith.constant 0 : i32
    %21 = vector.broadcast %c0_i32_8 : i32 to vector<256x1xi32>
    %22 = arith.cmpi slt, %18, %21 : vector<256x1xi32>
    %c0_i32_9 = arith.constant 0 : i32
    %23 = arith.cmpi slt, %16, %c0_i32_9 : i32
    %24 = vector.broadcast %23 : i1 to vector<256x1xi1>
    %25 = vector.broadcast %24 : vector<256x1xi1> to vector<256x1xi1>
    %26 = arith.xori %22, %25 : vector<256x1xi1>
    %27 = arith.andi %26, %20 : vector<256x1xi1>
    %28 = vector.broadcast %16 : i32 to vector<256x1xi32>
    %29 = arith.addi %18, %28 : vector<256x1xi32>
    %30 = arith.select %27, %29, %18 : vector<256x1xi1>, vector<256x1xi32>
    %c0_10 = arith.constant 0 : index
    %c0_11 = arith.constant 0 : index
    %31 = vector.load %arg5[%c0_10, %c0_11] : memref<1x128xf32, #tpu.memory_space<vmem>>, vector<1x128xf32>
    %32 = vector.shape_cast %31 : vector<1x128xf32> to vector<1x128xf32>
    %33 = vector.broadcast %32 : vector<1x128xf32> to vector<256x128xf32>
    %cst_12 = arith.constant 0.000000e+00 : bf16
    %34 = vector.broadcast %cst_12 : bf16 to vector<17x128xbf16>
    %35 = vector.extract_strided_slice %13 {offsets = [0, 0], sizes = [239, 128], strides = [1, 1]} : vector<256x128xbf16> to vector<239x128xbf16>
    %36 = tpu.concatenate %34, %35 in 0 : vector<17x128xbf16>, vector<239x128xbf16> -> vector<256x128xbf16>
    %c-1_i32 = arith.constant -1 : i32
    %37 = vector.broadcast %c-1_i32 : i32 to vector<256x1xi32>
    %38 = arith.addi %30, %37 : vector<256x1xi32>
    %c0_i32_13 = arith.constant 0 : i32
    %39 = vector.broadcast %c0_i32_13 : i32 to vector<256x1xi32>
    %40 = arith.cmpi sge, %38, %39 : vector<256x1xi32>
    %c-1_i32_14 = arith.constant -1 : i32
    %41 = vector.broadcast %c-1_i32_14 : i32 to vector<256x1xi32>
    %42 = arith.addi %30, %41 : vector<256x1xi32>
    %c16_i32_15 = arith.constant 16 : i32
    %43 = vector.broadcast %c16_i32_15 : i32 to vector<256x1xi32>
    %44 = arith.cmpi slt, %42, %43 : vector<256x1xi32>
    %45 = arith.andi %40, %44 : vector<256x1xi1>
    %cst_16 = arith.constant 0.000000e+00 : bf16
    %46 = vector.shape_cast %45 : vector<256x1xi1> to vector<256x1xi1>
    %47 = vector.broadcast %46 : vector<256x1xi1> to vector<256x128xi1>
    %48 = vector.broadcast %cst_16 : bf16 to vector<256x128xbf16>
    %49 = arith.select %47, %36, %48 : vector<256x128xi1>, vector<256x128xbf16>
    %c0_17 = arith.constant 0 : index
    %c0_18 = arith.constant 0 : index
    %c0_19 = arith.constant 0 : index
    %50 = vector.load %arg4[%c0_17, %c0_18, %c0_19] : memref<9x128x128xbf16, #tpu.memory_space<vmem>>, vector<1x128x128xbf16>
    %51 = vector.shape_cast %50 : vector<1x128x128xbf16> to vector<128x128xbf16>
    %cst_20 = arith.constant dense<0.000000e+00> : vector<256x128xf32>
    %52 = tpu.matmul %49, %51, %cst_20 {dimension_numbers = #tpu.dot_dimension_numbers<[1], [0], [0], [1], [0, 0, 1, 1], [], []>} : vector<256x128xbf16>, vector<128x128xbf16>, vector<256x128xf32> -> vector<256x128xf32>
    %53 = arith.addf %33, %52 : vector<256x128xf32>
    %cst_21 = arith.constant 0.000000e+00 : bf16
    %54 = vector.broadcast %cst_21 : bf16 to vector<16x128xbf16>
    %55 = vector.extract_strided_slice %13 {offsets = [0, 0], sizes = [240, 128], strides = [1, 1]} : vector<256x128xbf16> to vector<240x128xbf16>
    %56 = tpu.concatenate %54, %55 in 0 : vector<16x128xbf16>, vector<240x128xbf16> -> vector<256x128xbf16>
    %c1 = arith.constant 1 : index
    %c0_22 = arith.constant 0 : index
    %c0_23 = arith.constant 0 : index
    %57 = vector.load %arg4[%c1, %c0_22, %c0_23] : memref<9x128x128xbf16, #tpu.memory_space<vmem>>, vector<1x128x128xbf16>
    %58 = vector.shape_cast %57 : vector<1x128x128xbf16> to vector<128x128xbf16>
    %cst_24 = arith.constant dense<0.000000e+00> : vector<256x128xf32>
    %59 = tpu.matmul %56, %58, %cst_24 {dimension_numbers = #tpu.dot_dimension_numbers<[1], [0], [0], [1], [0, 0, 1, 1], [], []>} : vector<256x128xbf16>, vector<128x128xbf16>, vector<256x128xf32> -> vector<256x128xf32>
    %60 = arith.addf %53, %59 : vector<256x128xf32>
    %cst_25 = arith.constant 0.000000e+00 : bf16
    %61 = vector.broadcast %cst_25 : bf16 to vector<15x128xbf16>
    %62 = vector.extract_strided_slice %13 {offsets = [0, 0], sizes = [241, 128], strides = [1, 1]} : vector<256x128xbf16> to vector<241x128xbf16>
    %63 = tpu.concatenate %61, %62 in 0 : vector<15x128xbf16>, vector<241x128xbf16> -> vector<256x128xbf16>
    %c1_i32_26 = arith.constant 1 : i32
    %64 = vector.broadcast %c1_i32_26 : i32 to vector<256x1xi32>
    %65 = arith.addi %30, %64 : vector<256x1xi32>
    %c0_i32_27 = arith.constant 0 : i32
    %66 = vector.broadcast %c0_i32_27 : i32 to vector<256x1xi32>
    %67 = arith.cmpi sge, %65, %66 : vector<256x1xi32>
    %c1_i32_28 = arith.constant 1 : i32
    %68 = vector.broadcast %c1_i32_28 : i32 to vector<256x1xi32>
    %69 = arith.addi %30, %68 : vector<256x1xi32>
    %c16_i32_29 = arith.constant 16 : i32
    %70 = vector.broadcast %c16_i32_29 : i32 to vector<256x1xi32>
    %71 = arith.cmpi slt, %69, %70 : vector<256x1xi32>
    %72 = arith.andi %67, %71 : vector<256x1xi1>
    %cst_30 = arith.constant 0.000000e+00 : bf16
    %73 = vector.shape_cast %72 : vector<256x1xi1> to vector<256x1xi1>
    %74 = vector.broadcast %73 : vector<256x1xi1> to vector<256x128xi1>
    %75 = vector.broadcast %cst_30 : bf16 to vector<256x128xbf16>
    %76 = arith.select %74, %63, %75 : vector<256x128xi1>, vector<256x128xbf16>
    %c2 = arith.constant 2 : index
    %c0_31 = arith.constant 0 : index
    %c0_32 = arith.constant 0 : index
    %77 = vector.load %arg4[%c2, %c0_31, %c0_32] : memref<9x128x128xbf16, #tpu.memory_space<vmem>>, vector<1x128x128xbf16>
    %78 = vector.shape_cast %77 : vector<1x128x128xbf16> to vector<128x128xbf16>
    %cst_33 = arith.constant dense<0.000000e+00> : vector<256x128xf32>
    %79 = tpu.matmul %76, %78, %cst_33 {dimension_numbers = #tpu.dot_dimension_numbers<[1], [0], [0], [1], [0, 0, 1, 1], [], []>} : vector<256x128xbf16>, vector<128x128xbf16>, vector<256x128xf32> -> vector<256x128xf32>
    %80 = arith.addf %60, %79 : vector<256x128xf32>
    %cst_34 = arith.constant 0.000000e+00 : bf16
    %81 = vector.broadcast %cst_34 : bf16 to vector<1x128xbf16>
    %82 = vector.extract_strided_slice %13 {offsets = [0, 0], sizes = [255, 128], strides = [1, 1]} : vector<256x128xbf16> to vector<255x128xbf16>
    %83 = tpu.concatenate %81, %82 in 0 : vector<1x128xbf16>, vector<255x128xbf16> -> vector<256x128xbf16>
    %c-1_i32_35 = arith.constant -1 : i32
    %84 = vector.broadcast %c-1_i32_35 : i32 to vector<256x1xi32>
    %85 = arith.addi %30, %84 : vector<256x1xi32>
    %c0_i32_36 = arith.constant 0 : i32
    %86 = vector.broadcast %c0_i32_36 : i32 to vector<256x1xi32>
    %87 = arith.cmpi sge, %85, %86 : vector<256x1xi32>
    %c-1_i32_37 = arith.constant -1 : i32
    %88 = vector.broadcast %c-1_i32_37 : i32 to vector<256x1xi32>
    %89 = arith.addi %30, %88 : vector<256x1xi32>
    %c16_i32_38 = arith.constant 16 : i32
    %90 = vector.broadcast %c16_i32_38 : i32 to vector<256x1xi32>
    %91 = arith.cmpi slt, %89, %90 : vector<256x1xi32>
    %92 = arith.andi %87, %91 : vector<256x1xi1>
    %cst_39 = arith.constant 0.000000e+00 : bf16
    %93 = vector.shape_cast %92 : vector<256x1xi1> to vector<256x1xi1>
    %94 = vector.broadcast %93 : vector<256x1xi1> to vector<256x128xi1>
    %95 = vector.broadcast %cst_39 : bf16 to vector<256x128xbf16>
    %96 = arith.select %94, %83, %95 : vector<256x128xi1>, vector<256x128xbf16>
    %c3 = arith.constant 3 : index
    %c0_40 = arith.constant 0 : index
    %c0_41 = arith.constant 0 : index
    %97 = vector.load %arg4[%c3, %c0_40, %c0_41] : memref<9x128x128xbf16, #tpu.memory_space<vmem>>, vector<1x128x128xbf16>
    %98 = vector.shape_cast %97 : vector<1x128x128xbf16> to vector<128x128xbf16>
    %cst_42 = arith.constant dense<0.000000e+00> : vector<256x128xf32>
    %99 = tpu.matmul %96, %98, %cst_42 {dimension_numbers = #tpu.dot_dimension_numbers<[1], [0], [0], [1], [0, 0, 1, 1], [], []>} : vector<256x128xbf16>, vector<128x128xbf16>, vector<256x128xf32> -> vector<256x128xf32>
    %100 = arith.addf %80, %99 : vector<256x128xf32>
    %c4 = arith.constant 4 : index
    %c0_43 = arith.constant 0 : index
    %c0_44 = arith.constant 0 : index
    %101 = vector.load %arg4[%c4, %c0_43, %c0_44] : memref<9x128x128xbf16, #tpu.memory_space<vmem>>, vector<1x128x128xbf16>
    %102 = vector.shape_cast %101 : vector<1x128x128xbf16> to vector<128x128xbf16>
    %cst_45 = arith.constant dense<0.000000e+00> : vector<256x128xf32>
    %103 = tpu.matmul %13, %102, %cst_45 {dimension_numbers = #tpu.dot_dimension_numbers<[1], [0], [0], [1], [0, 0, 1, 1], [], []>} : vector<256x128xbf16>, vector<128x128xbf16>, vector<256x128xf32> -> vector<256x128xf32>
    %104 = arith.addf %100, %103 : vector<256x128xf32>
    %cst_46 = arith.constant 0.000000e+00 : bf16
    %105 = vector.broadcast %cst_46 : bf16 to vector<1x128xbf16>
    %106 = vector.extract_strided_slice %13 {offsets = [1, 0], sizes = [255, 128], strides = [1, 1]} : vector<256x128xbf16> to vector<255x128xbf16>
    %107 = tpu.concatenate %106, %105 in 0 : vector<255x128xbf16>, vector<1x128xbf16> -> vector<256x128xbf16>
    %c1_i32_47 = arith.constant 1 : i32
    %108 = vector.broadcast %c1_i32_47 : i32 to vector<256x1xi32>
    %109 = arith.addi %30, %108 : vector<256x1xi32>
    %c0_i32_48 = arith.constant 0 : i32
    %110 = vector.broadcast %c0_i32_48 : i32 to vector<256x1xi32>
    %111 = arith.cmpi sge, %109, %110 : vector<256x1xi32>
    %c1_i32_49 = arith.constant 1 : i32
    %112 = vector.broadcast %c1_i32_49 : i32 to vector<256x1xi32>
    %113 = arith.addi %30, %112 : vector<256x1xi32>
    %c16_i32_50 = arith.constant 16 : i32
    %114 = vector.broadcast %c16_i32_50 : i32 to vector<256x1xi32>
    %115 = arith.cmpi slt, %113, %114 : vector<256x1xi32>
    %116 = arith.andi %111, %115 : vector<256x1xi1>
    %cst_51 = arith.constant 0.000000e+00 : bf16
    %117 = vector.shape_cast %116 : vector<256x1xi1> to vector<256x1xi1>
    %118 = vector.broadcast %117 : vector<256x1xi1> to vector<256x128xi1>
    %119 = vector.broadcast %cst_51 : bf16 to vector<256x128xbf16>
    %120 = arith.select %118, %107, %119 : vector<256x128xi1>, vector<256x128xbf16>
    %c5 = arith.constant 5 : index
    %c0_52 = arith.constant 0 : index
    %c0_53 = arith.constant 0 : index
    %121 = vector.load %arg4[%c5, %c0_52, %c0_53] : memref<9x128x128xbf16, #tpu.memory_space<vmem>>, vector<1x128x128xbf16>
    %122 = vector.shape_cast %121 : vector<1x128x128xbf16> to vector<128x128xbf16>
    %cst_54 = arith.constant dense<0.000000e+00> : vector<256x128xf32>
    %123 = tpu.matmul %120, %122, %cst_54 {dimension_numbers = #tpu.dot_dimension_numbers<[1], [0], [0], [1], [0, 0, 1, 1], [], []>} : vector<256x128xbf16>, vector<128x128xbf16>, vector<256x128xf32> -> vector<256x128xf32>
    %124 = arith.addf %104, %123 : vector<256x128xf32>
    %cst_55 = arith.constant 0.000000e+00 : bf16
    %125 = vector.broadcast %cst_55 : bf16 to vector<15x128xbf16>
    %126 = vector.extract_strided_slice %13 {offsets = [15, 0], sizes = [241, 128], strides = [1, 1]} : vector<256x128xbf16> to vector<241x128xbf16>
    %127 = tpu.concatenate %126, %125 in 0 : vector<241x128xbf16>, vector<15x128xbf16> -> vector<256x128xbf16>
    %c-1_i32_56 = arith.constant -1 : i32
    %128 = vector.broadcast %c-1_i32_56 : i32 to vector<256x1xi32>
    %129 = arith.addi %30, %128 : vector<256x1xi32>
    %c0_i32_57 = arith.constant 0 : i32
    %130 = vector.broadcast %c0_i32_57 : i32 to vector<256x1xi32>
    %131 = arith.cmpi sge, %129, %130 : vector<256x1xi32>
    %c-1_i32_58 = arith.constant -1 : i32
    %132 = vector.broadcast %c-1_i32_58 : i32 to vector<256x1xi32>
    %133 = arith.addi %30, %132 : vector<256x1xi32>
    %c16_i32_59 = arith.constant 16 : i32
    %134 = vector.broadcast %c16_i32_59 : i32 to vector<256x1xi32>
    %135 = arith.cmpi slt, %133, %134 : vector<256x1xi32>
    %136 = arith.andi %131, %135 : vector<256x1xi1>
    %cst_60 = arith.constant 0.000000e+00 : bf16
    %137 = vector.shape_cast %136 : vector<256x1xi1> to vector<256x1xi1>
    %138 = vector.broadcast %137 : vector<256x1xi1> to vector<256x128xi1>
    %139 = vector.broadcast %cst_60 : bf16 to vector<256x128xbf16>
    %140 = arith.select %138, %127, %139 : vector<256x128xi1>, vector<256x128xbf16>
    %c6 = arith.constant 6 : index
    %c0_61 = arith.constant 0 : index
    %c0_62 = arith.constant 0 : index
    %141 = vector.load %arg4[%c6, %c0_61, %c0_62] : memref<9x128x128xbf16, #tpu.memory_space<vmem>>, vector<1x128x128xbf16>
    %142 = vector.shape_cast %141 : vector<1x128x128xbf16> to vector<128x128xbf16>
    %cst_63 = arith.constant dense<0.000000e+00> : vector<256x128xf32>
    %143 = tpu.matmul %140, %142, %cst_63 {dimension_numbers = #tpu.dot_dimension_numbers<[1], [0], [0], [1], [0, 0, 1, 1], [], []>} : vector<256x128xbf16>, vector<128x128xbf16>, vector<256x128xf32> -> vector<256x128xf32>
    %144 = arith.addf %124, %143 : vector<256x128xf32>
    %cst_64 = arith.constant 0.000000e+00 : bf16
    %145 = vector.broadcast %cst_64 : bf16 to vector<16x128xbf16>
    %146 = vector.extract_strided_slice %13 {offsets = [16, 0], sizes = [240, 128], strides = [1, 1]} : vector<256x128xbf16> to vector<240x128xbf16>
    %147 = tpu.concatenate %146, %145 in 0 : vector<240x128xbf16>, vector<16x128xbf16> -> vector<256x128xbf16>
    %c7 = arith.constant 7 : index
    %c0_65 = arith.constant 0 : index
    %c0_66 = arith.constant 0 : index
    %148 = vector.load %arg4[%c7, %c0_65, %c0_66] : memref<9x128x128xbf16, #tpu.memory_space<vmem>>, vector<1x128x128xbf16>
    %149 = vector.shape_cast %148 : vector<1x128x128xbf16> to vector<128x128xbf16>
    %cst_67 = arith.constant dense<0.000000e+00> : vector<256x128xf32>
    %150 = tpu.matmul %147, %149, %cst_67 {dimension_numbers = #tpu.dot_dimension_numbers<[1], [0], [0], [1], [0, 0, 1, 1], [], []>} : vector<256x128xbf16>, vector<128x128xbf16>, vector<256x128xf32> -> vector<256x128xf32>
    %151 = arith.addf %144, %150 : vector<256x128xf32>
    %cst_68 = arith.constant 0.000000e+00 : bf16
    %152 = vector.broadcast %cst_68 : bf16 to vector<17x128xbf16>
    %153 = vector.extract_strided_slice %13 {offsets = [17, 0], sizes = [239, 128], strides = [1, 1]} : vector<256x128xbf16> to vector<239x128xbf16>
    %154 = tpu.concatenate %153, %152 in 0 : vector<239x128xbf16>, vector<17x128xbf16> -> vector<256x128xbf16>
    %c1_i32_69 = arith.constant 1 : i32
    %155 = vector.broadcast %c1_i32_69 : i32 to vector<256x1xi32>
    %156 = arith.addi %30, %155 : vector<256x1xi32>
    %c0_i32_70 = arith.constant 0 : i32
    %157 = vector.broadcast %c0_i32_70 : i32 to vector<256x1xi32>
    %158 = arith.cmpi sge, %156, %157 : vector<256x1xi32>
    %c1_i32_71 = arith.constant 1 : i32
    %159 = vector.broadcast %c1_i32_71 : i32 to vector<256x1xi32>
    %160 = arith.addi %30, %159 : vector<256x1xi32>
    %c16_i32_72 = arith.constant 16 : i32
    %161 = vector.broadcast %c16_i32_72 : i32 to vector<256x1xi32>
    %162 = arith.cmpi slt, %160, %161 : vector<256x1xi32>
    %163 = arith.andi %158, %162 : vector<256x1xi1>
    %cst_73 = arith.constant 0.000000e+00 : bf16
    %164 = vector.shape_cast %163 : vector<256x1xi1> to vector<256x1xi1>
    %165 = vector.broadcast %164 : vector<256x1xi1> to vector<256x128xi1>
    %166 = vector.broadcast %cst_73 : bf16 to vector<256x128xbf16>
    %167 = arith.select %165, %154, %166 : vector<256x128xi1>, vector<256x128xbf16>
    %c8 = arith.constant 8 : index
    %c0_74 = arith.constant 0 : index
    %c0_75 = arith.constant 0 : index
    %168 = vector.load %arg4[%c8, %c0_74, %c0_75] : memref<9x128x128xbf16, #tpu.memory_space<vmem>>, vector<1x128x128xbf16>
    %169 = vector.shape_cast %168 : vector<1x128x128xbf16> to vector<128x128xbf16>
    %cst_76 = arith.constant dense<0.000000e+00> : vector<256x128xf32>
    %170 = tpu.matmul %167, %169, %cst_76 {dimension_numbers = #tpu.dot_dimension_numbers<[1], [0], [0], [1], [0, 0, 1, 1], [], []>} : vector<256x128xbf16>, vector<128x128xbf16>, vector<256x128xf32> -> vector<256x128xf32>
    %171 = arith.addf %151, %170 : vector<256x128xf32>
    %172 = vector.shape_cast %171 : vector<256x128xf32> to vector<1x16x16x128xf32>
    %173 = arith.truncf %172 : vector<1x16x16x128xf32> to vector<1x16x16x128xbf16>
    %c0_77 = arith.constant 0 : index
    %c0_78 = arith.constant 0 : index
    %c0_79 = arith.constant 0 : index
    %c0_80 = arith.constant 0 : index
    %174 = vector.load %arg6[%c0_77, %c0_78, %c0_79, %c0_80] : memref<1x16x16x128xbf16, #tpu.memory_space<vmem>>, vector<1x16x16x128xbf16>
    tpu.vector_store %arg6[%c0_77, %c0_78, %c0_79, %c0_80], %173 {strides = array<i32>} : memref<1x16x16x128xbf16, #tpu.memory_space<vmem>>, vector<1x16x16x128xbf16>,
    %cst_81 = arith.constant dense<0.000000e+00> : vector<128xf32>
    %175 = vector.multi_reduction <add>, %171, %cst_81 [0] : vector<256x128xf32> to vector<128xf32>
    %176 = vector.shape_cast %175 : vector<128xf32> to vector<1x128xf32>
    %177 = arith.mulf %171, %171 : vector<256x128xf32>
    %cst_82 = arith.constant dense<0.000000e+00> : vector<128xf32>
    %178 = vector.multi_reduction <add>, %177, %cst_82 [0] : vector<256x128xf32> to vector<128xf32>
    %179 = vector.shape_cast %178 : vector<128xf32> to vector<1x128xf32>
    %180 = tpu.concatenate %176, %179 in 0 : vector<1x128xf32>, vector<1x128xf32> -> vector<2x128xf32>
    %181 = vector.shape_cast %180 : vector<2x128xf32> to vector<1x2x128xf32>
    %c0_83 = arith.constant 0 : index
    %c0_84 = arith.constant 0 : index
    %c0_85 = arith.constant 0 : index
    %182 = vector.load %arg7[%c0_83, %c0_84, %c0_85] : memref<1x2x128xf32, #tpu.memory_space<vmem>>, vector<1x2x128xf32>
    tpu.vector_store %arg7[%c0_83, %c0_84, %c0_85], %181 {strides = array<i32>} : memref<1x2x128xf32, #tpu.memory_space<vmem>>, vector<1x2x128xf32>,
    return
  }
  func.func @transform_0(%arg0: i32) -> (i32, i32, i32, i32) {
    %c0_i32 = arith.constant 0 : i32
    %c0_i32_0 = arith.constant 0 : i32
    %c0_i32_1 = arith.constant 0 : i32
    %c0_i32_2 = arith.constant 0 : i32
    return %arg0, %c0_i32, %c0_i32_0, %c0_i32_1 : i32, i32, i32, i32
  }
  func.func @transform_1(%arg0: i32) -> (i32, i32) {
    %c0_i32 = arith.constant 0 : i32
    %c0_i32_0 = arith.constant 0 : i32
    %c0_i32_1 = arith.constant 0 : i32
    return %c0_i32, %c0_i32_0 : i32, i32
  }
  func.func @transform_2(%arg0: i32) -> (i32, i32) {
    %c0_i32 = arith.constant 0 : i32
    %c0_i32_0 = arith.constant 0 : i32
    %c0_i32_1 = arith.constant 0 : i32
    return %c0_i32, %c0_i32_0 : i32, i32
  }
  func.func @transform_3(%arg0: i32) -> (i32, i32, i32) {
    %c0_i32 = arith.constant 0 : i32
    %c0_i32_0 = arith.constant 0 : i32
    %c0_i32_1 = arith.constant 0 : i32
    %c0_i32_2 = arith.constant 0 : i32
    return %c0_i32, %c0_i32_0, %c0_i32_1 : i32, i32, i32
  }
  func.func @transform_4(%arg0: i32) -> (i32, i32) {
    %c0_i32 = arith.constant 0 : i32
    %c0_i32_0 = arith.constant 0 : i32
    %c0_i32_1 = arith.constant 0 : i32
    return %c0_i32, %c0_i32_0 : i32, i32
  }
  func.func @transform_5(%arg0: i32) -> (i32, i32, i32, i32) {
    %c0_i32 = arith.constant 0 : i32
    %c0_i32_0 = arith.constant 0 : i32
    %c0_i32_1 = arith.constant 0 : i32
    %c0_i32_2 = arith.constant 0 : i32
    return %arg0, %c0_i32, %c0_i32_0, %c0_i32_1 : i32, i32, i32, i32
  }
  func.func @transform_6(%arg0: i32) -> (i32, i32, i32) {
    %c0_i32 = arith.constant 0 : i32
    %c0_i32_0 = arith.constant 0 : i32
    %c0_i32_1 = arith.constant 0 : i32
    return %arg0, %c0_i32, %c0_i32_0 : i32, i32, i32
  }
}

module attributes {stable_mosaic.version = 11 : i64} {
  func.func @_bn_relu_conv1x1_stats_kernel(%arg0: i32, %arg1: memref<128x128xbf16, #tpu.memory_space<vmem>>, %arg2: memref<1x128xf32, #tpu.memory_space<vmem>>, %arg3: memref<1x128xf32, #tpu.memory_space<vmem>>, %arg4: memref<128x128xbf16, #tpu.memory_space<vmem>>, %arg5: memref<1x128xf32, #tpu.memory_space<vmem>>, %arg6: memref<128x128xbf16, #tpu.memory_space<vmem>>, %arg7: memref<1x2x128xf32, #tpu.memory_space<vmem>>) attributes {dimension_semantics = [#tpu.dimension_semantics<parallel>], iteration_bounds = array<i64: 4>, scalar_prefetch = 0 : i64, scratch_operands = 0 : i64, tpu.core_type = #tpu.core_type<tc>, window_params = [{transform_indices = @transform_0, window_bounds = array<i64: 128, 128>}, {pipeline_mode = #tpu.pipeline_mode<synchronous>, transform_indices = @transform_1, window_bounds = array<i64: 1, 128>}, {pipeline_mode = #tpu.pipeline_mode<synchronous>, transform_indices = @transform_2, window_bounds = array<i64: 1, 128>}, {pipeline_mode = #tpu.pipeline_mode<synchronous>, transform_indices = @transform_3, window_bounds = array<i64: 128, 128>}, {pipeline_mode = #tpu.pipeline_mode<synchronous>, transform_indices = @transform_4, window_bounds = array<i64: 1, 128>}, {transform_indices = @transform_5, window_bounds = array<i64: 128, 128>}, {transform_indices = @transform_6, window_bounds = array<i64: 1, 2, 128>}]} {
    %c0 = arith.constant 0 : index
    %c0_0 = arith.constant 0 : index
    %0 = vector.load %arg1[%c0, %c0_0] : memref<128x128xbf16, #tpu.memory_space<vmem>>, vector<128x128xbf16>
    %1 = arith.extf %0 : vector<128x128xbf16> to vector<128x128xf32>
    %c0_1 = arith.constant 0 : index
    %c0_2 = arith.constant 0 : index
    %2 = vector.load %arg2[%c0_1, %c0_2] : memref<1x128xf32, #tpu.memory_space<vmem>>, vector<1x128xf32>
    %3 = vector.broadcast %2 : vector<1x128xf32> to vector<128x128xf32>
    %4 = arith.mulf %1, %3 : vector<128x128xf32>
    %c0_3 = arith.constant 0 : index
    %c0_4 = arith.constant 0 : index
    %5 = vector.load %arg3[%c0_3, %c0_4] : memref<1x128xf32, #tpu.memory_space<vmem>>, vector<1x128xf32>
    %6 = vector.broadcast %5 : vector<1x128xf32> to vector<128x128xf32>
    %7 = arith.addf %4, %6 : vector<128x128xf32>
    %cst = arith.constant 0.000000e+00 : f32
    %8 = vector.broadcast %cst : f32 to vector<128x128xf32>
    %9 = arith.maximumf %7, %8 : vector<128x128xf32>
    %10 = arith.truncf %9 : vector<128x128xf32> to vector<128x128xbf16>
    %c0_5 = arith.constant 0 : index
    %c0_6 = arith.constant 0 : index
    %11 = vector.load %arg4[%c0_5, %c0_6] : memref<128x128xbf16, #tpu.memory_space<vmem>>, vector<128x128xbf16>
    %cst_7 = arith.constant dense<0.000000e+00> : vector<128x128xf32>
    %12 = tpu.matmul %10, %11, %cst_7 {dimension_numbers = #tpu.dot_dimension_numbers<[1], [0], [0], [1], [0, 0, 1, 1], [], []>} : vector<128x128xbf16>, vector<128x128xbf16>, vector<128x128xf32> -> vector<128x128xf32>
    %c0_8 = arith.constant 0 : index
    %c0_9 = arith.constant 0 : index
    %13 = vector.load %arg5[%c0_8, %c0_9] : memref<1x128xf32, #tpu.memory_space<vmem>>, vector<1x128xf32>
    %14 = vector.broadcast %13 : vector<1x128xf32> to vector<128x128xf32>
    %15 = arith.addf %12, %14 : vector<128x128xf32>
    %16 = arith.truncf %15 : vector<128x128xf32> to vector<128x128xbf16>
    %c0_10 = arith.constant 0 : index
    %c0_11 = arith.constant 0 : index
    %17 = vector.load %arg6[%c0_10, %c0_11] : memref<128x128xbf16, #tpu.memory_space<vmem>>, vector<128x128xbf16>
    tpu.vector_store %arg6[%c0_10, %c0_11], %16 {strides = array<i32>} : memref<128x128xbf16, #tpu.memory_space<vmem>>, vector<128x128xbf16>,
    %cst_12 = arith.constant dense<0.000000e+00> : vector<128xf32>
    %18 = vector.multi_reduction <add>, %15, %cst_12 [0] : vector<128x128xf32> to vector<128xf32>
    %19 = vector.shape_cast %18 : vector<128xf32> to vector<1x128xf32>
    %20 = arith.mulf %15, %15 : vector<128x128xf32>
    %cst_13 = arith.constant dense<0.000000e+00> : vector<128xf32>
    %21 = vector.multi_reduction <add>, %20, %cst_13 [0] : vector<128x128xf32> to vector<128xf32>
    %22 = vector.shape_cast %21 : vector<128xf32> to vector<1x128xf32>
    %23 = tpu.concatenate %19, %22 in 0 : vector<1x128xf32>, vector<1x128xf32> -> vector<2x128xf32>
    %24 = vector.shape_cast %23 : vector<2x128xf32> to vector<1x2x128xf32>
    %c0_14 = arith.constant 0 : index
    %c0_15 = arith.constant 0 : index
    %c0_16 = arith.constant 0 : index
    %25 = vector.load %arg7[%c0_14, %c0_15, %c0_16] : memref<1x2x128xf32, #tpu.memory_space<vmem>>, vector<1x2x128xf32>
    tpu.vector_store %arg7[%c0_14, %c0_15, %c0_16], %24 {strides = array<i32>} : memref<1x2x128xf32, #tpu.memory_space<vmem>>, vector<1x2x128xf32>,
    return
  }
  func.func @transform_0(%arg0: i32) -> (i32, i32) {
    %c0_i32 = arith.constant 0 : i32
    %c0_i32_0 = arith.constant 0 : i32
    return %arg0, %c0_i32 : i32, i32
  }
  func.func @transform_1(%arg0: i32) -> (i32, i32) {
    %c0_i32 = arith.constant 0 : i32
    %c0_i32_0 = arith.constant 0 : i32
    %c0_i32_1 = arith.constant 0 : i32
    return %c0_i32, %c0_i32_0 : i32, i32
  }
  func.func @transform_2(%arg0: i32) -> (i32, i32) {
    %c0_i32 = arith.constant 0 : i32
    %c0_i32_0 = arith.constant 0 : i32
    %c0_i32_1 = arith.constant 0 : i32
    return %c0_i32, %c0_i32_0 : i32, i32
  }
  func.func @transform_3(%arg0: i32) -> (i32, i32) {
    %c0_i32 = arith.constant 0 : i32
    %c0_i32_0 = arith.constant 0 : i32
    %c0_i32_1 = arith.constant 0 : i32
    return %c0_i32, %c0_i32_0 : i32, i32
  }
  func.func @transform_4(%arg0: i32) -> (i32, i32) {
    %c0_i32 = arith.constant 0 : i32
    %c0_i32_0 = arith.constant 0 : i32
    %c0_i32_1 = arith.constant 0 : i32
    return %c0_i32, %c0_i32_0 : i32, i32
  }
  func.func @transform_5(%arg0: i32) -> (i32, i32) {
    %c0_i32 = arith.constant 0 : i32
    %c0_i32_0 = arith.constant 0 : i32
    return %arg0, %c0_i32 : i32, i32
  }
  func.func @transform_6(%arg0: i32) -> (i32, i32, i32) {
    %c0_i32 = arith.constant 0 : i32
    %c0_i32_0 = arith.constant 0 : i32
    %c0_i32_1 = arith.constant 0 : i32
    return %arg0, %c0_i32, %c0_i32_0 : i32, i32, i32
  }
}

module attributes {stable_mosaic.version = 11 : i64} {
  func.func @_bn3_add_relu_kernel(%arg0: i32, %arg1: memref<512x128xbf16, #tpu.memory_space<vmem>>, %arg2: memref<512x128xbf16, #tpu.memory_space<vmem>>, %arg3: memref<1x128xf32, #tpu.memory_space<vmem>>, %arg4: memref<1x128xf32, #tpu.memory_space<vmem>>, %arg5: memref<512x128xf32, #tpu.memory_space<vmem>>) attributes {dimension_semantics = [#tpu.dimension_semantics<parallel>], iteration_bounds = array<i64: 1>, scalar_prefetch = 0 : i64, scratch_operands = 0 : i64, tpu.core_type = #tpu.core_type<tc>, window_params = [{transform_indices = @transform_0, window_bounds = array<i64: 512, 128>}, {transform_indices = @transform_1, window_bounds = array<i64: 512, 128>}, {pipeline_mode = #tpu.pipeline_mode<synchronous>, transform_indices = @transform_2, window_bounds = array<i64: 1, 128>}, {pipeline_mode = #tpu.pipeline_mode<synchronous>, transform_indices = @transform_3, window_bounds = array<i64: 1, 128>}, {transform_indices = @transform_4, window_bounds = array<i64: 512, 128>}]} {
    %c0 = arith.constant 0 : index
    %c0_0 = arith.constant 0 : index
    %0 = vector.load %arg1[%c0, %c0_0] : memref<512x128xbf16, #tpu.memory_space<vmem>>, vector<512x128xbf16>
    %1 = arith.extf %0 : vector<512x128xbf16> to vector<512x128xf32>
    %c0_1 = arith.constant 0 : index
    %c0_2 = arith.constant 0 : index
    %2 = vector.load %arg3[%c0_1, %c0_2] : memref<1x128xf32, #tpu.memory_space<vmem>>, vector<1x128xf32>
    %3 = vector.broadcast %2 : vector<1x128xf32> to vector<512x128xf32>
    %4 = arith.mulf %1, %3 : vector<512x128xf32>
    %c0_3 = arith.constant 0 : index
    %c0_4 = arith.constant 0 : index
    %5 = vector.load %arg4[%c0_3, %c0_4] : memref<1x128xf32, #tpu.memory_space<vmem>>, vector<1x128xf32>
    %6 = vector.broadcast %5 : vector<1x128xf32> to vector<512x128xf32>
    %7 = arith.addf %4, %6 : vector<512x128xf32>
    %c0_5 = arith.constant 0 : index
    %c0_6 = arith.constant 0 : index
    %8 = vector.load %arg2[%c0_5, %c0_6] : memref<512x128xbf16, #tpu.memory_space<vmem>>, vector<512x128xbf16>
    %9 = arith.extf %8 : vector<512x128xbf16> to vector<512x128xf32>
    %10 = arith.addf %7, %9 : vector<512x128xf32>
    %cst = arith.constant 0.000000e+00 : f32
    %11 = vector.broadcast %cst : f32 to vector<512x128xf32>
    %12 = arith.maximumf %10, %11 : vector<512x128xf32>
    %c0_7 = arith.constant 0 : index
    %c0_8 = arith.constant 0 : index
    %13 = vector.load %arg5[%c0_7, %c0_8] : memref<512x128xf32, #tpu.memory_space<vmem>>, vector<512x128xf32>
    tpu.vector_store %arg5[%c0_7, %c0_8], %12 {strides = array<i32>} : memref<512x128xf32, #tpu.memory_space<vmem>>, vector<512x128xf32>,
    return
  }
  func.func @transform_0(%arg0: i32) -> (i32, i32) {
    %c0_i32 = arith.constant 0 : i32
    %c0_i32_0 = arith.constant 0 : i32
    return %arg0, %c0_i32 : i32, i32
  }
  func.func @transform_1(%arg0: i32) -> (i32, i32) {
    %c0_i32 = arith.constant 0 : i32
    %c0_i32_0 = arith.constant 0 : i32
    return %arg0, %c0_i32 : i32, i32
  }
  func.func @transform_2(%arg0: i32) -> (i32, i32) {
    %c0_i32 = arith.constant 0 : i32
    %c0_i32_0 = arith.constant 0 : i32
    %c0_i32_1 = arith.constant 0 : i32
    return %c0_i32, %c0_i32_0 : i32, i32
  }
  func.func @transform_3(%arg0: i32) -> (i32, i32) {
    %c0_i32 = arith.constant 0 : i32
    %c0_i32_0 = arith.constant 0 : i32
    %c0_i32_1 = arith.constant 0 : i32
    return %c0_i32, %c0_i32_0 : i32, i32
  }
  func.func @transform_4(%arg0: i32) -> (i32, i32) {
    %c0_i32 = arith.constant 0 : i32
    %c0_i32_0 = arith.constant 0 : i32
    return %arg0, %c0_i32 : i32, i32
  }
}

</mosaic_0001>

<bundles_post_ra>
// kernel: _block_impl.4
= control target key start
LH: loop header
LB: loop body
LE: loop exit
PB: predicated region body
PF: predicated region fallthrough
CT: control target
= control target key end

     0   :  { %s778_s15 = smov 0   ;;  %s859_s0 = inlined_call_operand.vmem [shape: bf16[512,128], index: 0, kind: input, shape index: {}]   ;;  %s860_s1 = inlined_call_operand.vmem [shape: bf16[128,128], index: 1, kind: input, shape index: {}]   ;;  %s861_s2 = inlined_call_operand.vmem [shape: f32[1,128], index: 2, kind: input, shape index: {}]   ;;  %s862_s3 = inlined_call_operand.vmem [shape: bf16[512,128], index: 3, kind: output, shape index: {0}]   ;;  %s863_s4 = inlined_call_operand.vmem [shape: f32[4,2,128], index: 4, kind: output, shape index: {1}]  }
   0x1 LB: > { %s784_s16 = sadd.s32 4294967295, %s751_s15   ;;  %p577_p0 = scmp.ge.s32.totalorder %s751_s15, 1  ;;  %s751_s15 = sphi %s778_s15, %s15_s15  }
   0x2   : > { %p166_p1 = scmp.lt.s32.totalorder %s751_s15, 5 }
   0x4   : > { %p167_p2 = pnand %p577_p0, %p166_p1 }
   0x5   : > { %s578_s25 = sshll.u32 (!%p167_p2), %s784_s16, 4  ;;  %p208_p4 = scmp.lt.s32.totalorder (!%p167_p2), %s784_s16, 3 }
   0x6   : > { %170 = sbr.rel (%p167_p2) target bundleno = 237 (0xed), region = 32  ;;  %p197_p3 = scmp.lt.s32.totalorder (!%p167_p2), %s578_s25, 63 }
   0xb   : > { %v664_v0 = vld [vmem:[%s860_s1 + $0x38] sm:$0xff]  ;;  %v663_v1 = vld [vmem:[%s860_s1 + $0x30] sm:$0xff]  ;;  %v662_v2 = vld [vmem:[%s860_s1 + $0x28] sm:$0xff]  ;;  %s865_s25 = smov (!%p197_p3, %s578_s25), 63  ;;  %s867_s16 = smov (!%p208_p4, %s784_s16), 3  ;;  %vm483_vm0 = vcmask 1040384  }
   0xc   : > { %344 = vmatpush.bf16.msra.mxu0 %v664_v0  ;;  %712 = vmatpush.bf16.msra.mxu1 %v664_v0  ;;  %v661_v3 = vld [vmem:[%s860_s1 + $0x20] sm:$0xff]  ;;  %v660_v4 = vld [vmem:[%s860_s1 + $0x18] sm:$0xff]  ;;  %v659_v5 = vld [vmem:[%s860_s1 + $0x10] sm:$0xff]  ;;  %s579_s6 = sshll.u32 %s865_s25, 2  ;;  %s582_s19 = sshll.u32 %s867_s16, 1 }
   0xd   : > { %713 = vmatpush.bf16.msra.mxu2 %v664_v0  ;;  %714 = vmatpush.bf16.msra.mxu3 %v664_v0  ;;  %v658_v6 = vld [vmem:[%s860_s1 + $0x8] sm:$0xff]  ;;  %v657_v7 = vld [vmem:[%s860_s1] sm:$0xff]  ;;  %s200_s11 = scalar_lea.vmem %s859_s0, %s579_s6  ;;  %s829_s18 = scalar_lea.vmem %s862_s3, %s579_s6 }
   0xe   : > { %v649_v8 = vld [vmem:[%s200_s11] sm:$0xff]  ;;  %v651_v9 = vld [vmem:[%s200_s11 + $0x10] sm:$0xff]  ;;  %v650_v12 = vld [vmem:[%s200_s11 + $0x8] sm:$0xff]  ;;  %s211_s22 = scalar_lea.vmem %s863_s4, %s582_s19 }
   0xf   : > { %v653_v10 = vld [vmem:[%s200_s11 + $0x20] sm:$0xff]  ;;  %v655_v11 = vld [vmem:[%s200_s11 + $0x30] sm:$0xff]  ;;  %v652_v13 = vld [vmem:[%s200_s11 + $0x18] sm:$0xff] }
  0x10   : > { %345 = vmatpush.bf16.msra.mxu0 %v663_v1  ;;  %715 = vmatpush.bf16.msra.mxu1 %v663_v1  ;;  %v654_v14 = vld [vmem:[%s200_s11 + $0x28] sm:$0xff]  ;;  %v656_v15 = vld [vmem:[%s200_s11 + $0x38] sm:$0xff]  ;;  %v744_v18 = vld [vmem:[%s861_s2] ss:$0 sm:$0xff] }
  0x11   : > { %716 = vmatpush.bf16.msra.mxu2 %v663_v1  ;;  %717 = vmatpush.bf16.msra.mxu3 %v663_v1 }
  0x14   : > { %346 = vmatpush.bf16.msra.mxu0 %v662_v2  ;;  %718 = vmatpush.bf16.msra.mxu1 %v662_v2 }
  0x15   : > { %719 = vmatpush.bf16.msra.mxu2 %v662_v2  ;;  %720 = vmatpush.bf16.msra.mxu3 %v662_v2 }
  0x18   : > { %347 = vmatpush.bf16.msra.mxu0 %v661_v3  ;;  %721 = vmatpush.bf16.msra.mxu1 %v661_v3 }
  0x19   : > { %722 = vmatpush.bf16.msra.mxu2 %v661_v3  ;;  %723 = vmatpush.bf16.msra.mxu3 %v661_v3 }
  0x1c   : > { %348 = vmatpush.bf16.msra.mxu0 %v660_v4  ;;  %724 = vmatpush.bf16.msra.mxu1 %v660_v4 }
  0x1d   : > { %725 = vmatpush.bf16.msra.mxu2 %v660_v4  ;;  %726 = vmatpush.bf16.msra.mxu3 %v660_v4 }
  0x20   : > { %349 = vmatpush.bf16.msra.mxu0 %v659_v5  ;;  %727 = vmatpush.bf16.msra.mxu1 %v659_v5 }
  0x21   : > { %728 = vmatpush.bf16.msra.mxu2 %v659_v5  ;;  %729 = vmatpush.bf16.msra.mxu3 %v659_v5 }
  0x24   : > { %350 = vmatpush.bf16.msra.mxu0 %v658_v6  ;;  %730 = vmatpush.bf16.msra.mxu1 %v658_v6 }
  0x25   : > { %731 = vmatpush.bf16.msra.mxu2 %v658_v6  ;;  %732 = vmatpush.bf16.msra.mxu3 %v658_v6 }
  0x28   : > { %351 = vmatpush.bf16.msra.mxu0 %v657_v7  ;;  %733 = vmatpush.bf16.msra.mxu1 %v657_v7 }
  0x29   : > { %734 = vmatpush.bf16.msra.mxu2 %v657_v7  ;;  %735 = vmatpush.bf16.msra.mxu3 %v657_v7 }
  0x2b   : > { %352 = vmatmul.bf16.vlgmr.msra.gmra.mxu0 %v649_v8  ;;  %362 = vmatmul.bf16.vlgmr.msra.gmra.mxu1 %v651_v9 }
  0x2c   : > { %372 = vmatmul.bf16.vlgmr.msra.gmra.mxu2 %v653_v10  ;;  %382 = vmatmul.bf16.vlgmr.msra.gmra.mxu3 %v655_v11 }
  0x3b   : > { %357 = vmatmul.bf16.gmra.mxu0 %v650_v12  ;;  %367 = vmatmul.bf16.gmra.mxu1 %v652_v13 }
  0x3c   : > { %377 = vmatmul.bf16.gmra.mxu2 %v654_v14  ;;  %387 = vmatmul.bf16.gmra.mxu3 %v656_v15 }
  0xa8   : > { %v353_v16 = vpop.f32.mrf.mxu0  ;;  %v363_v17 = vpop.f32.mrf.mxu1 }
  0xa9   : > { %v364_v19 = vadd.f32 %v744_v18, %v363_v17  ;;  %v354_v24 = vadd.f32 %v744_v18, %v353_v16 }
  0xab   : > { %v446_v41 = vmul.f32 %v354_v24, %v354_v24  ;;  %v450_v58 = vmul.f32 %v364_v19, %v364_v19 }
  0xaf   : > { %v373_v20 = vpop.f32.mrf.mxu2  ;;  %v383_v21 = vpop.f32.mrf.mxu3 }
  0xb0   : > { %v355_v22 = vpop.f32.mrf.mxu0  ;;  %v365_v23 = vpop.f32.mrf.mxu1  ;;  %v374_v29 = vadd.f32 %v744_v18, %v373_v20  ;;  %v833_v30 = vadd.f32 %v744_v18, %v383_v21 }
  0xb1   : > { %v356_v25 = vadd.f32 %v744_v18, %v355_v22  ;;  %v366_v26 = vadd.f32 %v744_v18, %v365_v23 }
  0xb2   : > { %v454_v14 = vmul.f32 %v374_v29, %v374_v29 }
  0xb3   : > { %v668_v27 = vpack.c.bf16 %v356_v25, %v354_v24  ;;  %v678_v28 = vpack.c.bf16 %v366_v26, %v364_v19  ;;  %v447_v40 = vmul.f32 %v356_v25, %v356_v25  ;;  %v425_v43 = vadd.f32 %v356_v25, %v354_v24 }
  0xb4   : > { %v451_v63 = vmul.f32 %v366_v26, %v366_v26 }
  0xb5   : > { %669 = vst [vmem:[%s829_s18] sm:$0xff] %v668_v27   ;;  %v462_v47 = vadd.f32 %v447_v40, %v446_v41 }
  0xb6   : > { %706 = vst [vmem:[%s829_s18 + $0x10] sm:$0xff] %v678_v28  }
  0xb7   : > { %v375_v31 = vpop.f32.mrf.mxu2  ;;  %v385_v32 = vpop.f32.mrf.mxu3 }
  0xb8   : > { %v358_v33 = vpop.f32.mrf.mxu0  ;;  %v368_v34 = vpop.f32.mrf.mxu1  ;;  %v376_v35 = vadd.f32 %v744_v18, %v375_v31  ;;  %v835_v36 = vadd.f32 %v744_v18, %v385_v32 }
  0xb9   : > { %v359_v37 = vadd.f32 %v744_v18, %v358_v33  ;;  %v369_v44 = vadd.f32 %v744_v18, %v368_v34 }
  0xba   : > { %v688_v38 = vpack.c.bf16 %v376_v35, %v374_v29  ;;  %v698_v39 = vpack.c.bf16 %v835_v36, %v833_v30  ;;  %v455_v17 = vmul.f32 %v376_v35, %v376_v35 }
  0xbb   : > { %v448_v42 = vmul.f32 %v359_v37, %v359_v37  ;;  %v426_v50 = vadd.f32 %v425_v43, %v359_v37  ;;  %v452_v6 = vmul.f32 %v369_v44, %v369_v44 }
  0xbc   : > { %708 = vst [vmem:[%s829_s18 + $0x20] sm:$0xff] %v688_v38  }
  0xbd   : > { %710 = vst [vmem:[%s829_s18 + $0x30] sm:$0xff] %v698_v39   ;;  %v463_v53 = vadd.f32 %v462_v47, %v448_v42 }
  0xbf   : > { %v378_v45 = vpop.f32.mrf.mxu2  ;;  %v388_v46 = vpop.f32.mrf.mxu3 }
  0xc0   : > { %v360_v48 = vpop.f32.mrf.mxu0  ;;  %v370_v49 = vpop.f32.mrf.mxu1  ;;  %v379_v61 = vadd.f32 %v744_v18, %v378_v45  ;;  %v389_v62 = vadd.f32 %v744_v18, %v388_v46 }
  0xc1   : > { %v361_v51 = vadd.f32 %v744_v18, %v360_v48  ;;  %v371_v52 = vadd.f32 %v744_v18, %v370_v49 }
  0xc2   : > { %v456_v22 = vmul.f32 %v379_v61, %v379_v61  ;;  %v460_v34 = vmul.f32 %v389_v62, %v389_v62 }
  0xc3   : > { %v673_v54 = vpack.c.bf16 %v361_v51, %v359_v37  ;;  %v427_v55 = vadd.f32 %v426_v50, %v361_v51  ;;  %v449_v56 = vmul.f32 %v361_v51, %v361_v51  ;;  %v683_v57 = vpack.c.bf16 %v371_v52, %v369_v44 }
  0xc4   : > { %v453_v12 = vmul.f32 %v371_v52, %v371_v52 }
  0xc5   : > { %705 = vst [vmem:[%s829_s18 + $0x8] sm:$0xff] %v673_v54   ;;  %v428_v59 = vadd.f32 %v427_v55, %v364_v19  ;;  %v464_v60 = vadd.f32 %v463_v53, %v449_v56 }
  0xc6   : > { %707 = vst [vmem:[%s829_s18 + $0x18] sm:$0xff] %v683_v57  }
  0xc7   : > { %v465_v0 = vadd.f32 %v464_v60, %v450_v58  ;;  %v429_v1 = vadd.f32 %v428_v59, %v366_v26  ;;  %v380_v2 = vpop.f32.mrf.mxu2  ;;  %v390_v3 = vpop.f32.mrf.mxu3  ;;  %v458_v26 = vmul.f32 %v833_v30, %v833_v30 }
  0xc8   : > { %v381_v4 = vadd.f32 %v744_v18, %v380_v2  ;;  %v391_v5 = vadd.f32 %v744_v18, %v390_v3 }
  0xc9   : > { %v430_v7 = vadd.f32 %v429_v1, %v369_v44  ;;  %v466_v8 = vadd.f32 %v465_v0, %v451_v63 }
  0xca   : > { %v693_v9 = vpack.c.bf16 %v381_v4, %v379_v61  ;;  %v703_v10 = vpack.c.bf16 %v391_v5, %v389_v62  ;;  %v457_v25 = vmul.f32 %v381_v4, %v381_v4  ;;  %v461_v39 = vmul.f32 %v391_v5, %v391_v5 }
  0xcb   : > { %v431_v11 = vadd.f32 %v430_v7, %v371_v52  ;;  %v467_v13 = vadd.f32 %v466_v8, %v452_v6 }
  0xcc   : > { %709 = vst [vmem:[%s829_s18 + $0x28] sm:$0xff] %v693_v9  }
  0xcd   : > { %v432_v15 = vadd.f32 %v431_v11, %v374_v29  ;;  %v468_v16 = vadd.f32 %v467_v13, %v453_v12  ;;  %711 = vst [vmem:[%s829_s18 + $0x38] sm:$0xff] %v703_v10   ;;  %v459_v29 = vmul.f32 %v835_v36, %v835_v36 }
  0xcf   : > { %v469_v19 = vadd.f32 %v468_v16, %v454_v14  ;;  %v433_v20 = vadd.f32 %v432_v15, %v376_v35 }
  0xd1   : > { %v434_v21 = vadd.f32 %v433_v20, %v379_v61  ;;  %v470_v23 = vadd.f32 %v469_v19, %v455_v17 }
  0xd3   : > { %v471_v18 = vadd.f32 %v470_v23, %v456_v22  ;;  %v435_v24 = vadd.f32 %v434_v21, %v381_v4 }
  0xd5   : > { %v436_v27 = vadd.f32 %v435_v24, %v833_v30  ;;  %v472_v28 = vadd.f32 %v471_v18, %v457_v25 }
  0xd7   : > { %v473_v31 = vadd.f32 %v472_v28, %v458_v26  ;;  %v437_v32 = vadd.f32 %v436_v27, %v835_v36 }
  0xd9   : > { %v438_v33 = vadd.f32 %v437_v32, %v389_v62  ;;  %v474_v35 = vadd.f32 %v473_v31, %v459_v29 }
  0xdb   : > { %v475_v37 = vadd.f32 %v474_v35, %v460_v34  ;;  %v439_v38 = vadd.f32 %v438_v33, %v391_v5 }
  0xdd   : > { %v440_v40 = vrot.slane %v439_v38, 4  ;;  %v476_v41 = vadd.f32 %v475_v37, %v461_v39 }
  0xdf   : > { %v441_v42 = vadd.f32 %v440_v40, %v439_v38  ;;  %v477_v43 = vrot.slane %v476_v41, 4 }
  0xe1   : > { %v442_v30 = vrot.slane %v441_v42, 2  ;;  %v478_v44 = vadd.f32 %v477_v43, %v476_v41 }
  0xe3   : > { %v443_v45 = vadd.f32 %v442_v30, %v441_v42  ;;  %v479_v46 = vrot.slane %v478_v44, 2 }
  0xe5   : > { %v444_v47 = vrot.slane %v443_v45, 1  ;;  %v480_v48 = vadd.f32 %v479_v46, %v478_v44 }
  0xe7   : > { %v481_v36 = vrot.slane %v480_v48, 1  ;;  %v445_v49 = vadd.f32 %v444_v47, %v443_v45 }
  0xe9   : > { %v482_v50 = vadd.f32 %v481_v36, %v480_v48 }
  0xeb   : > { %v484_v51 = vsel %vm483_vm0, %v445_v49, %v482_v50 }
  0xec   : > { %485 = vst [vmem:[%s211_s22] sm:$0x3] %v484_v51 }
  0xed PF: > { %s15_s15 = sadd.s32 1, %s751_s15  }
  0xee   : > { %p12_p5 = scmp.ge.s32.totalorder %s15_s15, 6  }
  0xf0   :  { %14 = sbr.rel (!%p12_p5) target bundleno = 1 (0x1), region = 74 }

// kernel: _block_impl.6
= control target key start
LH: loop header
LB: loop body
LE: loop exit
PB: predicated region body
PF: predicated region fallthrough
CT: control target
= control target key end

     0   :  { %s875_s21 = smov 0   ;;  %s1008_s0 = inlined_call_operand.vmem [shape: bf16[512,128], index: 0, kind: input, shape index: {}]   ;;  %s1009_s1 = inlined_call_operand.vmem [shape: f32[1,128], index: 1, kind: input, shape index: {}]   ;;  %s1010_s2 = inlined_call_operand.vmem [shape: f32[1,128], index: 2, kind: input, shape index: {}]   ;;  %s1011_s3 = inlined_call_operand.vmem [shape: bf16[128,128], index: 3, kind: input, shape index: {}]   ;;  %s1012_s4 = inlined_call_operand.vmem [shape: f32[1,128], index: 4, kind: input, shape index: {}]   ;;  %s1013_s5 = inlined_call_operand.vmem [shape: bf16[512,128], index: 5, kind: output, shape index: {0}]   ;;  %s1014_s6 = inlined_call_operand.vmem [shape: f32[4,2,128], index: 6, kind: output, shape index: {1}]  }
   0x1 LB: > { %s881_s22 = sadd.s32 4294967295, %s838_s21   ;;  %p663_p0 = scmp.ge.s32.totalorder %s838_s21, 1  ;;  %s838_s21 = sphi %s875_s21, %s17_s21  }
   0x2   : > { %p216_p1 = scmp.lt.s32.totalorder %s838_s21, 5 }
   0x4   : > { %p217_p2 = pnand %p663_p0, %p216_p1 }
   0x5   : > { %s664_s25 = sshll.u32 (!%p217_p2), %s881_s22, 4  ;;  %p262_p4 = scmp.lt.s32.totalorder (!%p217_p2), %s881_s22, 3 }
   0x6   : > { %220 = sbr.rel (%p217_p2) target bundleno = 237 (0xed), region = 40  ;;  %p251_p3 = scmp.lt.s32.totalorder (!%p217_p2), %s664_s25, 63 }
   0xb   : > { %v710_v0 = vld [vmem:[%s1011_s3 + $0x38] sm:$0xff]  ;;  %v709_v1 = vld [vmem:[%s1011_s3 + $0x30] sm:$0xff]  ;;  %s1016_s25 = smov (!%p251_p3, %s664_s25), 63  ;;  %v708_v2 = vld [vmem:[%s1011_s3 + $0x28] sm:$0xff]  ;;  %s1018_s22 = smov (!%p262_p4, %s881_s22), 3  ;;  %vm569_vm0 = vcmask 1040384  }
   0xc   : > { %430 = vmatpush.bf16.msra.mxu0 %v710_v0  ;;  %797 = vmatpush.bf16.msra.mxu1 %v710_v0  ;;  %s665_s28 = sshll.u32 %s1016_s25, 2  ;;  %v707_v5 = vld [vmem:[%s1011_s3 + $0x20] sm:$0xff]  ;;  %v706_v15 = vld [vmem:[%s1011_s3 + $0x18] sm:$0xff]  ;;  %v705_v25 = vld [vmem:[%s1011_s3 + $0x10] sm:$0xff]  ;;  %s668_s25 = sshll.u32 %s1018_s22, 1 }
   0xd   : > { %798 = vmatpush.bf16.msra.mxu2 %v710_v0  ;;  %799 = vmatpush.bf16.msra.mxu3 %v710_v0  ;;  %s903_s9 = scalar_lea.vmem %s1008_s0, %s665_s28  ;;  %v915_v10 = vld [vmem:[%s1009_s1] ss:$0 sm:$0xff]  ;;  %v704_v34 = vld [vmem:[%s1011_s3 + $0x8] sm:$0xff]  ;;  %s978_s8 = scalar_lea.vmem %s1013_s5, %s665_s28 }
   0xe   : > { %v712_v3 = vld [vmem:[%s903_s9] sm:$0xff]   ;;  %v784_v4 = vld [vmem:[%s903_s9 + $0x10] sm:$0xff]   ;;  %v783_v43 = vld [vmem:[%s903_s9 + $0x8] sm:$0xff]   ;;  %s265_s10 = scalar_lea.vmem %s1014_s6, %s668_s25 }
   0xf   : > { %v786_v6 = vld [vmem:[%s903_s9 + $0x20] sm:$0xff]   ;;  %v788_v7 = vld [vmem:[%s903_s9 + $0x30] sm:$0xff]   ;;  %v713_v8 = vunpack.c.l.bf16 %v712_v3  ;;  %v714_v9 = vunpack.c.h.bf16 %v712_v3  ;;  %v721_v11 = vunpack.c.l.bf16 %v784_v4  ;;  %v722_v12 = vunpack.c.h.bf16 %v784_v4  ;;  %v785_v47 = vld [vmem:[%s903_s9 + $0x18] sm:$0xff]  }
  0x10   : > { %431 = vmatpush.bf16.msra.mxu0 %v709_v1  ;;  %800 = vmatpush.bf16.msra.mxu1 %v709_v1  ;;  %v729_v13 = vunpack.c.l.bf16 %v786_v6  ;;  %v730_v14 = vunpack.c.h.bf16 %v786_v6  ;;  %v737_v16 = vunpack.c.l.bf16 %v788_v7  ;;  %v738_v17 = vunpack.c.h.bf16 %v788_v7  ;;  %v925_v20 = vld [vmem:[%s1010_s2] ss:$0 sm:$0xff]  ;;  %v787_v48 = vld [vmem:[%s903_s9 + $0x28] sm:$0xff]   ;;  %v789_v49 = vld [vmem:[%s903_s9 + $0x38] sm:$0xff]  }
  0x11   : > { %801 = vmatpush.bf16.msra.mxu2 %v709_v1  ;;  %802 = vmatpush.bf16.msra.mxu3 %v709_v1  ;;  %v302_v18 = vmul.f32 %v915_v10, %v713_v8  ;;  %v303_v19 = vmul.f32 %v915_v10, %v714_v9  ;;  %v306_v21 = vmul.f32 %v915_v10, %v721_v11  ;;  %v703_v44 = vld [vmem:[%s1011_s3] sm:$0xff]  ;;  %v717_v52 = vunpack.c.l.bf16 %v783_v43 }
  0x12   : > { %v307_v22 = vmul.f32 %v915_v10, %v722_v12  ;;  %v310_v23 = vmul.f32 %v915_v10, %v729_v13  ;;  %v311_v24 = vmul.f32 %v915_v10, %v730_v14  ;;  %v314_v26 = vmul.f32 %v915_v10, %v737_v16 }
  0x13   : > { %v315_v27 = vmul.f32 %v915_v10, %v738_v17  ;;  %v322_v28 = vadd.f32 %v925_v20, %v302_v18  ;;  %v323_v29 = vadd.f32 %v925_v20, %v303_v19  ;;  %v326_v30 = vadd.f32 %v925_v20, %v306_v21 }
  0x14   : > { %432 = vmatpush.bf16.msra.mxu0 %v708_v2  ;;  %803 = vmatpush.bf16.msra.mxu1 %v708_v2  ;;  %v327_v31 = vadd.f32 %v925_v20, %v307_v22  ;;  %v330_v32 = vadd.f32 %v925_v20, %v310_v23  ;;  %v331_v33 = vadd.f32 %v925_v20, %v311_v24  ;;  %v718_v53 = vunpack.c.h.bf16 %v783_v43 }
  0x15   : > { %804 = vmatpush.bf16.msra.mxu2 %v708_v2  ;;  %805 = vmatpush.bf16.msra.mxu3 %v708_v2  ;;  %v334_v35 = vadd.f32 %v925_v20, %v314_v26  ;;  %v335_v36 = vadd.f32 %v925_v20, %v315_v27  ;;  %v338_v37 = vmax.f32 %v322_v28, 0.0  ;;  %v339_v38 = vmax.f32 %v323_v29, 0.0 }
  0x16   : > { %v342_v39 = vmax.f32 %v326_v30, 0.0  ;;  %v343_v40 = vmax.f32 %v327_v31, 0.0  ;;  %v346_v41 = vmax.f32 %v330_v32, 0.0  ;;  %v347_v42 = vmax.f32 %v331_v33, 0.0 }
  0x17   : > { %v350_v45 = vmax.f32 %v334_v35, 0.0  ;;  %v351_v46 = vmax.f32 %v335_v36, 0.0  ;;  %v354_v50 = vpack.c.bf16 %v339_v38, %v338_v37  ;;  %v725_v55 = vunpack.c.l.bf16 %v785_v47 }
  0x18   : > { %433 = vmatpush.bf16.msra.mxu0 %v707_v5  ;;  %806 = vmatpush.bf16.msra.mxu1 %v707_v5  ;;  %v356_v51 = vpack.c.bf16 %v343_v40, %v342_v39  ;;  %v358_v54 = vpack.c.bf16 %v347_v42, %v346_v41  ;;  %v726_v56 = vunpack.c.h.bf16 %v785_v47  ;;  %v733_v57 = vunpack.c.l.bf16 %v787_v48 }
  0x19   : > { %807 = vmatpush.bf16.msra.mxu2 %v707_v5  ;;  %808 = vmatpush.bf16.msra.mxu3 %v707_v5  ;;  %v360_v58 = vpack.c.bf16 %v351_v46, %v350_v45  ;;  %v734_v59 = vunpack.c.h.bf16 %v787_v48  ;;  %v741_v60 = vunpack.c.l.bf16 %v789_v49  ;;  %v742_v61 = vunpack.c.h.bf16 %v789_v49 }
  0x1a   : > { %v304_v62 = vmul.f32 %v915_v10, %v717_v52  ;;  %v305_v63 = vmul.f32 %v915_v10, %v718_v53  ;;  %v308_v0 = vmul.f32 %v915_v10, %v725_v55  ;;  %v309_v1 = vmul.f32 %v915_v10, %v726_v56 }
  0x1b   : > { %v312_v2 = vmul.f32 %v915_v10, %v733_v57  ;;  %v313_v3 = vmul.f32 %v915_v10, %v734_v59  ;;  %v316_v4 = vmul.f32 %v915_v10, %v741_v60  ;;  %v317_v5 = vmul.f32 %v915_v10, %v742_v61 }
  0x1c   : > { %434 = vmatpush.bf16.msra.mxu0 %v706_v15  ;;  %809 = vmatpush.bf16.msra.mxu1 %v706_v15  ;;  %v324_v6 = vadd.f32 %v925_v20, %v304_v62  ;;  %v325_v7 = vadd.f32 %v925_v20, %v305_v63  ;;  %v328_v8 = vadd.f32 %v925_v20, %v308_v0 }
  0x1d   : > { %810 = vmatpush.bf16.msra.mxu2 %v706_v15  ;;  %811 = vmatpush.bf16.msra.mxu3 %v706_v15  ;;  %v329_v9 = vadd.f32 %v925_v20, %v309_v1  ;;  %v332_v11 = vadd.f32 %v925_v20, %v312_v2  ;;  %v333_v12 = vadd.f32 %v925_v20, %v313_v3 }
  0x1e   : > { %v336_v13 = vadd.f32 %v925_v20, %v316_v4  ;;  %v337_v14 = vadd.f32 %v925_v20, %v317_v5  ;;  %v340_v15 = vmax.f32 %v324_v6, 0.0  ;;  %v341_v16 = vmax.f32 %v325_v7, 0.0  ;;  %v831_v20 = vld [vmem:[%s1012_s4] ss:$0 sm:$0xff] }
  0x1f   : > { %v344_v17 = vmax.f32 %v328_v8, 0.0  ;;  %v345_v10 = vmax.f32 %v329_v9, 0.0  ;;  %v348_v18 = vmax.f32 %v332_v11, 0.0  ;;  %v349_v19 = vmax.f32 %v333_v12, 0.0 }
  0x20   : > { %435 = vmatpush.bf16.msra.mxu0 %v705_v25  ;;  %812 = vmatpush.bf16.msra.mxu1 %v705_v25  ;;  %v352_v21 = vmax.f32 %v336_v13, 0.0  ;;  %v353_v22 = vmax.f32 %v337_v14, 0.0  ;;  %v355_v23 = vpack.c.bf16 %v341_v16, %v340_v15 }
  0x21   : > { %813 = vmatpush.bf16.msra.mxu2 %v705_v25  ;;  %814 = vmatpush.bf16.msra.mxu3 %v705_v25  ;;  %v357_v24 = vpack.c.bf16 %v345_v10, %v344_v17  ;;  %v359_v25 = vpack.c.bf16 %v349_v19, %v348_v18 }
  0x22   : > { %v361_v26 = vpack.c.bf16 %v353_v22, %v352_v21 }
  0x24   : > { %436 = vmatpush.bf16.msra.mxu0 %v704_v34  ;;  %815 = vmatpush.bf16.msra.mxu1 %v704_v34 }
  0x25   : > { %816 = vmatpush.bf16.msra.mxu2 %v704_v34  ;;  %817 = vmatpush.bf16.msra.mxu3 %v704_v34 }
  0x28   : > { %437 = vmatpush.bf16.msra.mxu0 %v703_v44  ;;  %818 = vmatpush.bf16.msra.mxu1 %v703_v44 }
  0x29   : > { %819 = vmatpush.bf16.msra.mxu2 %v703_v44  ;;  %820 = vmatpush.bf16.msra.mxu3 %v703_v44 }
  0x2b   : > { %438 = vmatmul.bf16.vlgmr.msra.gmra.mxu0 %v354_v50  ;;  %448 = vmatmul.bf16.vlgmr.msra.gmra.mxu1 %v356_v51 }
  0x2c   : > { %458 = vmatmul.bf16.vlgmr.msra.gmra.mxu2 %v358_v54  ;;  %468 = vmatmul.bf16.vlgmr.msra.gmra.mxu3 %v360_v58 }
  0x3b   : > { %443 = vmatmul.bf16.gmra.mxu0 %v355_v23  ;;  %453 = vmatmul.bf16.gmra.mxu1 %v357_v24 }
  0x3c   : > { %463 = vmatmul.bf16.gmra.mxu2 %v359_v25  ;;  %473 = vmatmul.bf16.gmra.mxu3 %v361_v26 }
  0xa8   : > { %v439_v27 = vpop.f32.mrf.mxu0  ;;  %v449_v28 = vpop.f32.mrf.mxu1 }
  0xa9   : > { %v450_v29 = vadd.f32 %v831_v20, %v449_v28  ;;  %v440_v34 = vadd.f32 %v831_v20, %v439_v27 }
  0xab   : > { %v532_v51 = vmul.f32 %v440_v34, %v440_v34  ;;  %v536_v4 = vmul.f32 %v450_v29, %v450_v29 }
  0xaf   : > { %v459_v30 = vpop.f32.mrf.mxu2  ;;  %v469_v31 = vpop.f32.mrf.mxu3 }
  0xb0   : > { %v441_v32 = vpop.f32.mrf.mxu0  ;;  %v451_v33 = vpop.f32.mrf.mxu1  ;;  %v460_v39 = vadd.f32 %v831_v20, %v459_v30  ;;  %v982_v40 = vadd.f32 %v831_v20, %v469_v31 }
  0xb1   : > { %v442_v35 = vadd.f32 %v831_v20, %v441_v32  ;;  %v452_v36 = vadd.f32 %v831_v20, %v451_v33 }
  0xb2   : > { %v540_v25 = vmul.f32 %v460_v39, %v460_v39 }
  0xb3   : > { %v746_v37 = vpack.c.bf16 %v442_v35, %v440_v34  ;;  %v756_v38 = vpack.c.bf16 %v452_v36, %v450_v29  ;;  %v533_v50 = vmul.f32 %v442_v35, %v442_v35  ;;  %v511_v53 = vadd.f32 %v442_v35, %v440_v34 }
  0xb4   : > { %v537_v9 = vmul.f32 %v452_v36, %v452_v36 }
  0xb5   : > { %747 = vst [vmem:[%s978_s8] sm:$0xff] %v746_v37   ;;  %v548_v57 = vadd.f32 %v533_v50, %v532_v51 }
  0xb6   : > { %791 = vst [vmem:[%s978_s8 + $0x10] sm:$0xff] %v756_v38  }
  0xb7   : > { %v461_v41 = vpop.f32.mrf.mxu2  ;;  %v471_v42 = vpop.f32.mrf.mxu3 }
  0xb8   : > { %v444_v43 = vpop.f32.mrf.mxu0  ;;  %v454_v44 = vpop.f32.mrf.mxu1  ;;  %v462_v45 = vadd.f32 %v831_v20, %v461_v41  ;;  %v984_v46 = vadd.f32 %v831_v20, %v471_v42 }
  0xb9   : > { %v445_v47 = vadd.f32 %v831_v20, %v444_v43  ;;  %v455_v54 = vadd.f32 %v831_v20, %v454_v44 }
  0xba   : > { %v766_v48 = vpack.c.bf16 %v462_v45, %v460_v39  ;;  %v776_v49 = vpack.c.bf16 %v984_v46, %v982_v40  ;;  %v541_v28 = vmul.f32 %v462_v45, %v462_v45 }
  0xbb   : > { %v534_v52 = vmul.f32 %v445_v47, %v445_v47  ;;  %v512_v60 = vadd.f32 %v511_v53, %v445_v47  ;;  %v538_v17 = vmul.f32 %v455_v54, %v455_v54 }
  0xbc   : > { %793 = vst [vmem:[%s978_s8 + $0x20] sm:$0xff] %v766_v48  }
  0xbd   : > { %795 = vst [vmem:[%s978_s8 + $0x30] sm:$0xff] %v776_v49   ;;  %v549_v63 = vadd.f32 %v548_v57, %v534_v52 }
  0xbf   : > { %v464_v55 = vpop.f32.mrf.mxu2  ;;  %v474_v56 = vpop.f32.mrf.mxu3 }
  0xc0   : > { %v446_v58 = vpop.f32.mrf.mxu0  ;;  %v456_v59 = vpop.f32.mrf.mxu1  ;;  %v465_v7 = vadd.f32 %v831_v20, %v464_v55  ;;  %v475_v8 = vadd.f32 %v831_v20, %v474_v56 }
  0xc1   : > { %v447_v61 = vadd.f32 %v831_v20, %v446_v58  ;;  %v457_v62 = vadd.f32 %v831_v20, %v456_v59 }
  0xc2   : > { %v542_v32 = vmul.f32 %v465_v7, %v465_v7  ;;  %v546_v44 = vmul.f32 %v475_v8, %v475_v8 }
  0xc3   : > { %v751_v0 = vpack.c.bf16 %v447_v61, %v445_v47  ;;  %v513_v1 = vadd.f32 %v512_v60, %v447_v61  ;;  %v535_v2 = vmul.f32 %v447_v61, %v447_v61  ;;  %v761_v3 = vpack.c.bf16 %v457_v62, %v455_v54 }
  0xc4   : > { %v539_v23 = vmul.f32 %v457_v62, %v457_v62 }
  0xc5   : > { %790 = vst [vmem:[%s978_s8 + $0x8] sm:$0xff] %v751_v0   ;;  %v514_v5 = vadd.f32 %v513_v1, %v450_v29  ;;  %v550_v6 = vadd.f32 %v549_v63, %v535_v2 }
  0xc6   : > { %792 = vst [vmem:[%s978_s8 + $0x18] sm:$0xff] %v761_v3  }
  0xc7   : > { %v551_v11 = vadd.f32 %v550_v6, %v536_v4  ;;  %v515_v12 = vadd.f32 %v514_v5, %v452_v36  ;;  %v466_v13 = vpop.f32.mrf.mxu2  ;;  %v476_v14 = vpop.f32.mrf.mxu3  ;;  %v544_v36 = vmul.f32 %v982_v40, %v982_v40 }
  0xc8   : > { %v467_v15 = vadd.f32 %v831_v20, %v466_v13  ;;  %v477_v16 = vadd.f32 %v831_v20, %v476_v14 }
  0xc9   : > { %v516_v10 = vadd.f32 %v515_v12, %v455_v54  ;;  %v552_v18 = vadd.f32 %v551_v11, %v537_v9 }
  0xca   : > { %v771_v19 = vpack.c.bf16 %v467_v15, %v465_v7  ;;  %v781_v21 = vpack.c.bf16 %v477_v16, %v475_v8  ;;  %v543_v35 = vmul.f32 %v467_v15, %v467_v15  ;;  %v547_v49 = vmul.f32 %v477_v16, %v477_v16 }
  0xcb   : > { %v517_v22 = vadd.f32 %v516_v10, %v457_v62  ;;  %v553_v24 = vadd.f32 %v552_v18, %v538_v17 }
  0xcc   : > { %794 = vst [vmem:[%s978_s8 + $0x28] sm:$0xff] %v771_v19  }
  0xcd   : > { %v518_v26 = vadd.f32 %v517_v22, %v460_v39  ;;  %v554_v27 = vadd.f32 %v553_v24, %v539_v23  ;;  %796 = vst [vmem:[%s978_s8 + $0x38] sm:$0xff] %v781_v21   ;;  %v545_v39 = vmul.f32 %v984_v46, %v984_v46 }
  0xcf   : > { %v555_v29 = vadd.f32 %v554_v27, %v540_v25  ;;  %v519_v30 = vadd.f32 %v518_v26, %v462_v45 }
  0xd1   : > { %v520_v31 = vadd.f32 %v519_v30, %v465_v7  ;;  %v556_v33 = vadd.f32 %v555_v29, %v541_v28 }
  0xd3   : > { %v557_v20 = vadd.f32 %v556_v33, %v542_v32  ;;  %v521_v34 = vadd.f32 %v520_v31, %v467_v15 }
  0xd5   : > { %v522_v37 = vadd.f32 %v521_v34, %v982_v40  ;;  %v558_v38 = vadd.f32 %v557_v20, %v543_v35 }
  0xd7   : > { %v559_v41 = vadd.f32 %v558_v38, %v544_v36  ;;  %v523_v42 = vadd.f32 %v522_v37, %v984_v46 }
  0xd9   : > { %v524_v43 = vadd.f32 %v523_v42, %v475_v8  ;;  %v560_v45 = vadd.f32 %v559_v41, %v545_v39 }
  0xdb   : > { %v561_v47 = vadd.f32 %v560_v45, %v546_v44  ;;  %v525_v48 = vadd.f32 %v524_v43, %v477_v16 }
  0xdd   : > { %v526_v50 = vrot.slane %v525_v48, 4  ;;  %v562_v51 = vadd.f32 %v561_v47, %v547_v49 }
  0xdf   : > { %v527_v52 = vadd.f32 %v526_v50, %v525_v48  ;;  %v563_v53 = vrot.slane %v562_v51, 4 }
  0xe1   : > { %v528_v40 = vrot.slane %v527_v52, 2  ;;  %v564_v54 = vadd.f32 %v563_v53, %v562_v51 }
  0xe3   : > { %v529_v55 = vadd.f32 %v528_v40, %v527_v52  ;;  %v565_v56 = vrot.slane %v564_v54, 2 }
  0xe5   : > { %v530_v57 = vrot.slane %v529_v55, 1  ;;  %v566_v58 = vadd.f32 %v565_v56, %v564_v54 }
  0xe7   : > { %v567_v46 = vrot.slane %v566_v58, 1  ;;  %v531_v59 = vadd.f32 %v530_v57, %v529_v55 }
  0xe9   : > { %v568_v60 = vadd.f32 %v567_v46, %v566_v58 }
  0xeb   : > { %v570_v61 = vsel %vm569_vm0, %v531_v59, %v568_v60 }
  0xec   : > { %571 = vst [vmem:[%s265_s10] sm:$0x3] %v570_v61 }
  0xed PF: > { %s17_s21 = sadd.s32 1, %s838_s21  }
  0xee   : > { %p14_p5 = scmp.ge.s32.totalorder %s17_s21, 6  }
  0xf0   :  { %16 = sbr.rel (!%p14_p5) target bundleno = 1 (0x1), region = 82 }

// kernel: _block_impl.7
= control target key start
LH: loop header
LB: loop body
LE: loop exit
PB: predicated region body
PF: predicated region fallthrough
CT: control target
= control target key end

     0   :  { %s1472_s0 = inlined_call_operand.vmem [shape: bf16[512,128], index: 0, kind: input, shape index: {}]   ;;  %s1473_s1 = inlined_call_operand.vmem [shape: bf16[512,128], index: 1, kind: input, shape index: {}]   ;;  %s1474_s2 = inlined_call_operand.vmem [shape: f32[1,128], index: 2, kind: input, shape index: {}]   ;;  %s1475_s3 = inlined_call_operand.vmem [shape: f32[1,128], index: 3, kind: input, shape index: {}]   ;;  %s1476_s4 = inlined_call_operand.vmem [shape: f32[512,128], index: 4, kind: output, shape index: {}]  }
   0x1   :  { %v606_v0 = vld [vmem:[%s1472_s0] sm:$0xff]   ;;  %v861_v8 = vld [vmem:[%s1472_s0 + $0x8] sm:$0xff]   ;;  %v862_v10 = vld [vmem:[%s1472_s0 + $0x10] sm:$0xff]  }
   0x2   :  { %v956_v1 = vld [vmem:[%s1474_s2] ss:$0 sm:$0xff]  ;;  %v607_v2 = vunpack.c.l.bf16 %v606_v0  ;;  %v608_v5 = vunpack.c.h.bf16 %v606_v0  ;;  %v892_v9 = vld [vmem:[%s1473_s1 + $0x8] sm:$0xff]   ;;  %v611_v13 = vunpack.c.l.bf16 %v861_v8  ;;  %v893_v15 = vld [vmem:[%s1473_s1 + $0x10] sm:$0xff]   ;;  %v612_v17 = vunpack.c.h.bf16 %v861_v8 }
   0x3   :  { %v961_v3 = vld [vmem:[%s1475_s3] ss:$0 sm:$0xff]  ;;  %v739_v14 = vunpack.c.l.bf16 %v892_v9  ;;  %v863_v16 = vld [vmem:[%s1472_s0 + $0x18] sm:$0xff]   ;;  %v740_v18 = vunpack.c.h.bf16 %v892_v9  ;;  %v615_v19 = vunpack.c.l.bf16 %v862_v10  ;;  %v743_v20 = vunpack.c.l.bf16 %v893_v15  ;;  %v865_v52 = vld [vmem:[%s1472_s0 + $0x28] sm:$0xff]  }
   0x4   :  { %v734_v4 = vld [vmem:[%s1473_s1] sm:$0xff]   ;;  %v149_v11 = vmul.f32 %v956_v1, %v607_v2  ;;  %v150_v12 = vmul.f32 %v956_v1, %v608_v5  ;;  %v151_v23 = vmul.f32 %v956_v1, %v611_v13  ;;  %v616_v24 = vunpack.c.h.bf16 %v862_v10  ;;  %v894_v25 = vld [vmem:[%s1473_s1 + $0x18] sm:$0xff]   ;;  %v896_v57 = vld [vmem:[%s1473_s1 + $0x28] sm:$0xff]  }
   0x5   :  { %v735_v6 = vunpack.c.l.bf16 %v734_v4  ;;  %v736_v7 = vunpack.c.h.bf16 %v734_v4  ;;  %v152_v26 = vmul.f32 %v956_v1, %v612_v17  ;;  %v153_v27 = vmul.f32 %v956_v1, %v615_v19  ;;  %v864_v38 = vld [vmem:[%s1472_s0 + $0x20] sm:$0xff]   ;;  %v866_v62 = vld [vmem:[%s1472_s0 + $0x30] sm:$0xff]  }
   0x6   :  { %v217_v21 = vadd.f32 %v961_v3, %v149_v11  ;;  %v218_v22 = vadd.f32 %v961_v3, %v150_v12  ;;  %v744_v28 = vunpack.c.h.bf16 %v893_v15  ;;  %v619_v29 = vunpack.c.l.bf16 %v863_v16  ;;  %v895_v47 = vld [vmem:[%s1473_s1 + $0x20] sm:$0xff]   ;;  %v897_v5 = vld [vmem:[%s1473_s1 + $0x30] sm:$0xff]  }
   0x7   :  { %v219_v32 = vadd.f32 %v961_v3, %v151_v23  ;;  %v154_v33 = vmul.f32 %v956_v1, %v616_v24  ;;  %v220_v34 = vadd.f32 %v961_v3, %v152_v26  ;;  %v221_v35 = vadd.f32 %v961_v3, %v153_v27  ;;  %v898_v23 = vld [vmem:[%s1473_s1 + $0x38] sm:$0xff]  }
   0x8   :  { %v409_v30 = vadd.f32 %v735_v6, %v217_v21  ;;  %v410_v31 = vadd.f32 %v736_v7, %v218_v22  ;;  %v155_v36 = vmul.f32 %v956_v1, %v619_v29  ;;  %v747_v37 = vunpack.c.l.bf16 %v894_v25 }
   0x9   :  { %v411_v41 = vadd.f32 %v739_v14, %v219_v32  ;;  %v222_v42 = vadd.f32 %v961_v3, %v154_v33  ;;  %v412_v43 = vadd.f32 %v740_v18, %v220_v34  ;;  %v413_v44 = vadd.f32 %v743_v20, %v221_v35  ;;  %v867_v18 = vld [vmem:[%s1472_s0 + $0x38] sm:$0xff]   ;;  %v868_v32 = vld [vmem:[%s1472_s0 + $0x40] sm:$0xff]  }
   0xa   :  { %v473_v39 = vmax.f32 %v409_v30, 0.0  ;;  %v474_v40 = vmax.f32 %v410_v31, 0.0  ;;  %v223_v45 = vadd.f32 %v961_v3, %v155_v36  ;;  %v620_v46 = vunpack.c.h.bf16 %v863_v16 }
   0xb   :  { %v475_v48 = vmax.f32 %v411_v41, 0.0  ;;  %v414_v49 = vadd.f32 %v744_v28, %v222_v42  ;;  %v748_v50 = vunpack.c.h.bf16 %v894_v25  ;;  %v623_v51 = vunpack.c.l.bf16 %v864_v38 }
   0xc   :  { %537 = vst [vmem:[%s1476_s4] sm:$0xff] %v473_v39  ;;  %v476_v53 = vmax.f32 %v412_v43, 0.0  ;;  %v477_v54 = vmax.f32 %v413_v44, 0.0  ;;  %v415_v55 = vadd.f32 %v747_v37, %v223_v45  ;;  %v156_v56 = vmul.f32 %v956_v1, %v620_v46  ;;  %v899_v37 = vld [vmem:[%s1473_s1 + $0x40] sm:$0xff]   ;;  %v869_v46 = vld [vmem:[%s1472_s0 + $0x48] sm:$0xff]  }
   0xd   :  { %538 = vst [vmem:[%s1476_s4 + $0x8] sm:$0xff] %v474_v40  ;;  %v478_v58 = vmax.f32 %v414_v49, 0.0  ;;  %v157_v59 = vmul.f32 %v956_v1, %v623_v51  ;;  %v751_v60 = vunpack.c.l.bf16 %v895_v47  ;;  %v624_v61 = vunpack.c.h.bf16 %v864_v38 }
   0xe   :  { %539 = vst [vmem:[%s1476_s4 + $0x10] sm:$0xff] %v475_v48  ;;  %v479_v63 = vmax.f32 %v415_v55, 0.0  ;;  %v224_v0 = vadd.f32 %v961_v3, %v156_v56  ;;  %v752_v2 = vunpack.c.h.bf16 %v895_v47  ;;  %v627_v4 = vunpack.c.l.bf16 %v865_v52  ;;  %v900_v47 = vld [vmem:[%s1473_s1 + $0x48] sm:$0xff]   ;;  %v870_v56 = vld [vmem:[%s1472_s0 + $0x50] sm:$0xff]  }
   0xf   :  { %540 = vst [vmem:[%s1476_s4 + $0x18] sm:$0xff] %v476_v53  ;;  %v225_v6 = vadd.f32 %v961_v3, %v157_v59  ;;  %v158_v7 = vmul.f32 %v956_v1, %v624_v61  ;;  %v755_v8 = vunpack.c.l.bf16 %v896_v57  ;;  %v628_v9 = vunpack.c.h.bf16 %v865_v52 }
  0x10   :  { %541 = vst [vmem:[%s1476_s4 + $0x20] sm:$0xff] %v477_v54  ;;  %v416_v10 = vadd.f32 %v748_v50, %v224_v0  ;;  %v159_v11 = vmul.f32 %v956_v1, %v627_v4  ;;  %v756_v12 = vunpack.c.h.bf16 %v896_v57  ;;  %v631_v13 = vunpack.c.l.bf16 %v866_v62 }
  0x11   :  { %542 = vst [vmem:[%s1476_s4 + $0x28] sm:$0xff] %v478_v58  ;;  %v417_v14 = vadd.f32 %v751_v60, %v225_v6  ;;  %v226_v15 = vadd.f32 %v961_v3, %v158_v7  ;;  %v160_v16 = vmul.f32 %v956_v1, %v628_v9  ;;  %v759_v17 = vunpack.c.l.bf16 %v897_v5 }
  0x12   :  { %543 = vst [vmem:[%s1476_s4 + $0x30] sm:$0xff] %v479_v63  ;;  %v480_v19 = vmax.f32 %v416_v10, 0.0  ;;  %v227_v20 = vadd.f32 %v961_v3, %v159_v11  ;;  %v161_v21 = vmul.f32 %v956_v1, %v631_v13  ;;  %v632_v22 = vunpack.c.h.bf16 %v866_v62 }
  0x13   :  { %v481_v24 = vmax.f32 %v417_v14, 0.0  ;;  %v418_v25 = vadd.f32 %v752_v2, %v226_v15  ;;  %v228_v26 = vadd.f32 %v961_v3, %v160_v16  ;;  %v760_v27 = vunpack.c.h.bf16 %v897_v5  ;;  %v901_v2 = vld [vmem:[%s1473_s1 + $0x50] sm:$0xff]  }
  0x14   :  { %544 = vst [vmem:[%s1476_s4 + $0x38] sm:$0xff] %v480_v19  ;;  %v419_v28 = vadd.f32 %v755_v8, %v227_v20  ;;  %v229_v29 = vadd.f32 %v961_v3, %v161_v21  ;;  %v162_v30 = vmul.f32 %v956_v1, %v632_v22  ;;  %v635_v31 = vunpack.c.l.bf16 %v867_v18 }
  0x15   :  { %545 = vst [vmem:[%s1476_s4 + $0x40] sm:$0xff] %v481_v24  ;;  %v482_v33 = vmax.f32 %v418_v25, 0.0  ;;  %v420_v34 = vadd.f32 %v756_v12, %v228_v26  ;;  %v763_v35 = vunpack.c.l.bf16 %v898_v23  ;;  %v636_v36 = vunpack.c.h.bf16 %v867_v18  ;;  %v871_v12 = vld [vmem:[%s1472_s0 + $0x58] sm:$0xff]   ;;  %v872_v26 = vld [vmem:[%s1472_s0 + $0x60] sm:$0xff]  }
  0x16   :  { %v483_v38 = vmax.f32 %v419_v28, 0.0  ;;  %v421_v39 = vadd.f32 %v759_v17, %v229_v29  ;;  %v230_v40 = vadd.f32 %v961_v3, %v162_v30  ;;  %v163_v41 = vmul.f32 %v956_v1, %v635_v31  ;;  %v902_v17 = vld [vmem:[%s1473_s1 + $0x58] sm:$0xff]   ;;  %v903_v31 = vld [vmem:[%s1473_s1 + $0x60] sm:$0xff]  }
  0x17   :  { %546 = vst [vmem:[%s1476_s4 + $0x48] sm:$0xff] %v482_v33  ;;  %v484_v42 = vmax.f32 %v420_v34, 0.0  ;;  %v164_v43 = vmul.f32 %v956_v1, %v636_v36  ;;  %v764_v44 = vunpack.c.h.bf16 %v898_v23  ;;  %v639_v45 = vunpack.c.l.bf16 %v868_v32 }
  0x18   :  { %547 = vst [vmem:[%s1476_s4 + $0x50] sm:$0xff] %v483_v38  ;;  %v485_v48 = vmax.f32 %v421_v39, 0.0  ;;  %v422_v49 = vadd.f32 %v760_v27, %v230_v40  ;;  %v231_v50 = vadd.f32 %v961_v3, %v163_v41  ;;  %v767_v51 = vunpack.c.l.bf16 %v899_v37  ;;  %v873_v40 = vld [vmem:[%s1472_s0 + $0x68] sm:$0xff]  }
  0x19   :  { %548 = vst [vmem:[%s1476_s4 + $0x58] sm:$0xff] %v484_v42  ;;  %v232_v52 = vadd.f32 %v961_v3, %v164_v43  ;;  %v165_v53 = vmul.f32 %v956_v1, %v639_v45  ;;  %v640_v54 = vunpack.c.h.bf16 %v868_v32  ;;  %v768_v55 = vunpack.c.h.bf16 %v899_v37  ;;  %v904_v41 = vld [vmem:[%s1473_s1 + $0x68] sm:$0xff]  }
  0x1a   :  { %549 = vst [vmem:[%s1476_s4 + $0x60] sm:$0xff] %v485_v48  ;;  %v486_v57 = vmax.f32 %v422_v49, 0.0  ;;  %v423_v58 = vadd.f32 %v763_v35, %v231_v50  ;;  %v643_v59 = vunpack.c.l.bf16 %v869_v46  ;;  %v771_v60 = vunpack.c.l.bf16 %v900_v47  ;;  %v874_v50 = vld [vmem:[%s1472_s0 + $0x70] sm:$0xff]  }
  0x1b   :  { %v424_v61 = vadd.f32 %v764_v44, %v232_v52  ;;  %v233_v62 = vadd.f32 %v961_v3, %v165_v53  ;;  %v166_v63 = vmul.f32 %v956_v1, %v640_v54  ;;  %v644_v0 = vunpack.c.h.bf16 %v869_v46 }
  0x1c   :  { %550 = vst [vmem:[%s1476_s4 + $0x68] sm:$0xff] %v486_v57  ;;  %v487_v4 = vmax.f32 %v423_v58, 0.0  ;;  %v167_v5 = vmul.f32 %v956_v1, %v643_v59  ;;  %v772_v6 = vunpack.c.h.bf16 %v900_v47  ;;  %v647_v7 = vunpack.c.l.bf16 %v870_v56  ;;  %v905_v59 = vld [vmem:[%s1473_s1 + $0x70] sm:$0xff]  }
  0x1d   :  { %v488_v8 = vmax.f32 %v424_v61, 0.0  ;;  %v425_v9 = vadd.f32 %v767_v51, %v233_v62  ;;  %v234_v10 = vadd.f32 %v961_v3, %v166_v63  ;;  %v168_v11 = vmul.f32 %v956_v1, %v644_v0 }
  0x1e   :  { %551 = vst [vmem:[%s1476_s4 + $0x70] sm:$0xff] %v487_v4  ;;  %v235_v13 = vadd.f32 %v961_v3, %v167_v5  ;;  %v169_v14 = vmul.f32 %v956_v1, %v647_v7  ;;  %v775_v15 = vunpack.c.l.bf16 %v901_v2  ;;  %v648_v16 = vunpack.c.h.bf16 %v870_v56 }
  0x1f   :  { %552 = vst [vmem:[%s1476_s4 + $0x78] sm:$0xff] %v488_v8  ;;  %v489_v18 = vmax.f32 %v425_v9, 0.0  ;;  %v426_v19 = vadd.f32 %v768_v55, %v234_v10  ;;  %v236_v20 = vadd.f32 %v961_v3, %v168_v11  ;;  %v776_v21 = vunpack.c.h.bf16 %v901_v2  ;;  %v906_v11 = vld [vmem:[%s1473_s1 + $0x78] sm:$0xff]  }
  0x20   :  { %v427_v22 = vadd.f32 %v771_v60, %v235_v13  ;;  %v237_v23 = vadd.f32 %v961_v3, %v169_v14  ;;  %v170_v24 = vmul.f32 %v956_v1, %v648_v16  ;;  %v651_v25 = vunpack.c.l.bf16 %v871_v12 }
  0x21   :  { %553 = vst [vmem:[%s1476_s4 + $0x80] sm:$0xff] %v489_v18  ;;  %v490_v27 = vmax.f32 %v426_v19, 0.0  ;;  %v428_v28 = vadd.f32 %v772_v6, %v236_v20  ;;  %v779_v29 = vunpack.c.l.bf16 %v902_v17  ;;  %v652_v30 = vunpack.c.h.bf16 %v871_v12  ;;  %v875_v6 = vld [vmem:[%s1472_s0 + $0x78] sm:$0xff]   ;;  %v876_v20 = vld [vmem:[%s1472_s0 + $0x80] sm:$0xff]  }
  0x22   :  { %v491_v32 = vmax.f32 %v427_v22, 0.0  ;;  %v429_v33 = vadd.f32 %v775_v15, %v237_v23  ;;  %v238_v34 = vadd.f32 %v961_v3, %v170_v24  ;;  %v171_v35 = vmul.f32 %v956_v1, %v651_v25  ;;  %v907_v25 = vld [vmem:[%s1473_s1 + $0x80] sm:$0xff]  }
  0x23   :  { %554 = vst [vmem:[%s1476_s4 + $0x88] sm:$0xff] %v490_v27  ;;  %v492_v36 = vmax.f32 %v428_v28, 0.0  ;;  %v172_v37 = vmul.f32 %v956_v1, %v652_v30  ;;  %v780_v38 = vunpack.c.h.bf16 %v902_v17  ;;  %v655_v39 = vunpack.c.l.bf16 %v872_v26 }
  0x24   :  { %555 = vst [vmem:[%s1476_s4 + $0x90] sm:$0xff] %v491_v32  ;;  %v493_v42 = vmax.f32 %v429_v33, 0.0  ;;  %v430_v43 = vadd.f32 %v776_v21, %v238_v34  ;;  %v239_v44 = vadd.f32 %v961_v3, %v171_v35  ;;  %v783_v45 = vunpack.c.l.bf16 %v903_v31  ;;  %v877_v34 = vld [vmem:[%s1472_s0 + $0x88] sm:$0xff]  }
  0x25   :  { %556 = vst [vmem:[%s1476_s4 + $0x98] sm:$0xff] %v492_v36  ;;  %v240_v46 = vadd.f32 %v961_v3, %v172_v37  ;;  %v173_v47 = vmul.f32 %v956_v1, %v655_v39  ;;  %v656_v48 = vunpack.c.h.bf16 %v872_v26  ;;  %v784_v49 = vunpack.c.h.bf16 %v903_v31  ;;  %v908_v35 = vld [vmem:[%s1473_s1 + $0x88] sm:$0xff]  }
  0x26   :  { %557 = vst [vmem:[%s1476_s4 + $0xa0] sm:$0xff] %v493_v42  ;;  %v494_v51 = vmax.f32 %v430_v43, 0.0  ;;  %v431_v52 = vadd.f32 %v779_v29, %v239_v44  ;;  %v659_v53 = vunpack.c.l.bf16 %v873_v40  ;;  %v787_v54 = vunpack.c.l.bf16 %v904_v41  ;;  %v878_v44 = vld [vmem:[%s1472_s0 + $0x90] sm:$0xff]  }
  0x27   :  { %v432_v55 = vadd.f32 %v780_v38, %v240_v46  ;;  %v241_v56 = vadd.f32 %v961_v3, %v173_v47  ;;  %v174_v57 = vmul.f32 %v956_v1, %v656_v48  ;;  %v660_v58 = vunpack.c.h.bf16 %v873_v40 }
  0x28   :  { %558 = vst [vmem:[%s1476_s4 + $0xa8] sm:$0xff] %v494_v51  ;;  %v495_v60 = vmax.f32 %v431_v52, 0.0  ;;  %v175_v61 = vmul.f32 %v956_v1, %v659_v53  ;;  %v788_v62 = vunpack.c.h.bf16 %v904_v41  ;;  %v663_v63 = vunpack.c.l.bf16 %v874_v50  ;;  %v909_v53 = vld [vmem:[%s1473_s1 + $0x90] sm:$0xff]  }
  0x29   :  { %v496_v0 = vmax.f32 %v432_v55, 0.0  ;;  %v433_v2 = vadd.f32 %v783_v45, %v241_v56  ;;  %v242_v4 = vadd.f32 %v961_v3, %v174_v57  ;;  %v176_v5 = vmul.f32 %v956_v1, %v660_v58 }
  0x2a   :  { %559 = vst [vmem:[%s1476_s4 + $0xb0] sm:$0xff] %v495_v60  ;;  %v243_v7 = vadd.f32 %v961_v3, %v175_v61  ;;  %v177_v8 = vmul.f32 %v956_v1, %v663_v63  ;;  %v791_v9 = vunpack.c.l.bf16 %v905_v59  ;;  %v664_v10 = vunpack.c.h.bf16 %v874_v50 }
  0x2b   :  { %560 = vst [vmem:[%s1476_s4 + $0xb8] sm:$0xff] %v496_v0  ;;  %v497_v12 = vmax.f32 %v433_v2, 0.0  ;;  %v434_v13 = vadd.f32 %v784_v49, %v242_v4  ;;  %v244_v14 = vadd.f32 %v961_v3, %v176_v5  ;;  %v792_v15 = vunpack.c.h.bf16 %v905_v59  ;;  %v910_v5 = vld [vmem:[%s1473_s1 + $0x98] sm:$0xff]  }
  0x2c   :  { %v435_v16 = vadd.f32 %v787_v54, %v243_v7  ;;  %v245_v17 = vadd.f32 %v961_v3, %v177_v8  ;;  %v178_v18 = vmul.f32 %v956_v1, %v664_v10  ;;  %v667_v19 = vunpack.c.l.bf16 %v875_v6 }
  0x2d   :  { %561 = vst [vmem:[%s1476_s4 + $0xc0] sm:$0xff] %v497_v12  ;;  %v498_v21 = vmax.f32 %v434_v13, 0.0  ;;  %v436_v22 = vadd.f32 %v788_v62, %v244_v14  ;;  %v795_v23 = vunpack.c.l.bf16 %v906_v11  ;;  %v668_v24 = vunpack.c.h.bf16 %v875_v6  ;;  %v879_v62 = vld [vmem:[%s1472_s0 + $0x98] sm:$0xff]   ;;  %v880_v14 = vld [vmem:[%s1472_s0 + $0xa0] sm:$0xff]  }
  0x2e   :  { %v499_v26 = vmax.f32 %v435_v16, 0.0  ;;  %v437_v27 = vadd.f32 %v791_v9, %v245_v17  ;;  %v246_v28 = vadd.f32 %v961_v3, %v178_v18  ;;  %v179_v29 = vmul.f32 %v956_v1, %v667_v19  ;;  %v911_v19 = vld [vmem:[%s1473_s1 + $0xa0] sm:$0xff]  }
  0x2f   :  { %562 = vst [vmem:[%s1476_s4 + $0xc8] sm:$0xff] %v498_v21  ;;  %v500_v30 = vmax.f32 %v436_v22, 0.0  ;;  %v180_v31 = vmul.f32 %v956_v1, %v668_v24  ;;  %v796_v32 = vunpack.c.h.bf16 %v906_v11  ;;  %v671_v33 = vunpack.c.l.bf16 %v876_v20 }
  0x30   :  { %563 = vst [vmem:[%s1476_s4 + $0xd0] sm:$0xff] %v499_v26  ;;  %v501_v36 = vmax.f32 %v437_v27, 0.0  ;;  %v438_v37 = vadd.f32 %v792_v15, %v246_v28  ;;  %v247_v38 = vadd.f32 %v961_v3, %v179_v29  ;;  %v799_v39 = vunpack.c.l.bf16 %v907_v25  ;;  %v881_v28 = vld [vmem:[%s1472_s0 + $0xa8] sm:$0xff]  }
  0x31   :  { %564 = vst [vmem:[%s1476_s4 + $0xd8] sm:$0xff] %v500_v30  ;;  %v248_v40 = vadd.f32 %v961_v3, %v180_v31  ;;  %v181_v41 = vmul.f32 %v956_v1, %v671_v33  ;;  %v672_v42 = vunpack.c.h.bf16 %v876_v20  ;;  %v800_v43 = vunpack.c.h.bf16 %v907_v25  ;;  %v912_v29 = vld [vmem:[%s1473_s1 + $0xa8] sm:$0xff]  }
  0x32   :  { %565 = vst [vmem:[%s1476_s4 + $0xe0] sm:$0xff] %v501_v36  ;;  %v502_v45 = vmax.f32 %v438_v37, 0.0  ;;  %v439_v46 = vadd.f32 %v795_v23, %v247_v38  ;;  %v675_v47 = vunpack.c.l.bf16 %v877_v34  ;;  %v803_v48 = vunpack.c.l.bf16 %v908_v35  ;;  %v882_v38 = vld [vmem:[%s1472_s0 + $0xb0] sm:$0xff]  }
  0x33   :  { %v440_v49 = vadd.f32 %v796_v32, %v248_v40  ;;  %v249_v50 = vadd.f32 %v961_v3, %v181_v41  ;;  %v182_v51 = vmul.f32 %v956_v1, %v672_v42  ;;  %v676_v52 = vunpack.c.h.bf16 %v877_v34 }
  0x34   :  { %566 = vst [vmem:[%s1476_s4 + $0xe8] sm:$0xff] %v502_v45  ;;  %v503_v54 = vmax.f32 %v439_v46, 0.0  ;;  %v183_v55 = vmul.f32 %v956_v1, %v675_v47  ;;  %v804_v56 = vunpack.c.h.bf16 %v908_v35  ;;  %v679_v57 = vunpack.c.l.bf16 %v878_v44  ;;  %v913_v47 = vld [vmem:[%s1473_s1 + $0xb0] sm:$0xff]  }
  0x35   :  { %v504_v58 = vmax.f32 %v440_v49, 0.0  ;;  %v441_v59 = vadd.f32 %v799_v39, %v249_v50  ;;  %v250_v60 = vadd.f32 %v961_v3, %v182_v51  ;;  %v184_v61 = vmul.f32 %v956_v1, %v676_v52 }
  0x36   :  { %567 = vst [vmem:[%s1476_s4 + $0xf0] sm:$0xff] %v503_v54  ;;  %v251_v63 = vadd.f32 %v961_v3, %v183_v55  ;;  %v185_v0 = vmul.f32 %v956_v1, %v679_v57  ;;  %v807_v2 = vunpack.c.l.bf16 %v909_v53  ;;  %v680_v4 = vunpack.c.h.bf16 %v878_v44 }
  0x37   :  { %568 = vst [vmem:[%s1476_s4 + $0xf8] sm:$0xff] %v504_v58  ;;  %v505_v6 = vmax.f32 %v441_v59, 0.0  ;;  %v442_v7 = vadd.f32 %v800_v43, %v250_v60  ;;  %v252_v8 = vadd.f32 %v961_v3, %v184_v61  ;;  %v808_v9 = vunpack.c.h.bf16 %v909_v53  ;;  %v914_v61 = vld [vmem:[%s1473_s1 + $0xb8] sm:$0xff]  }
  0x38   :  { %v443_v10 = vadd.f32 %v803_v48, %v251_v63  ;;  %v253_v11 = vadd.f32 %v961_v3, %v185_v0  ;;  %v186_v12 = vmul.f32 %v956_v1, %v680_v4  ;;  %v683_v13 = vunpack.c.l.bf16 %v879_v62 }
  0x39   :  { %569 = vst [vmem:[%s1476_s4 + $0x100] sm:$0xff] %v505_v6  ;;  %v506_v15 = vmax.f32 %v442_v7, 0.0  ;;  %v444_v16 = vadd.f32 %v804_v56, %v252_v8  ;;  %v811_v17 = vunpack.c.l.bf16 %v910_v5  ;;  %v684_v18 = vunpack.c.h.bf16 %v879_v62  ;;  %v883_v56 = vld [vmem:[%s1472_s0 + $0xb8] sm:$0xff]   ;;  %v884_v8 = vld [vmem:[%s1472_s0 + $0xc0] sm:$0xff]  }
  0x3a   :  { %v507_v20 = vmax.f32 %v443_v10, 0.0  ;;  %v445_v21 = vadd.f32 %v807_v2, %v253_v11  ;;  %v254_v22 = vadd.f32 %v961_v3, %v186_v12  ;;  %v187_v23 = vmul.f32 %v956_v1, %v683_v13  ;;  %v915_v13 = vld [vmem:[%s1473_s1 + $0xc0] sm:$0xff]  }
  0x3b   :  { %570 = vst [vmem:[%s1476_s4 + $0x108] sm:$0xff] %v506_v15  ;;  %v508_v24 = vmax.f32 %v444_v16, 0.0  ;;  %v188_v25 = vmul.f32 %v956_v1, %v684_v18  ;;  %v812_v26 = vunpack.c.h.bf16 %v910_v5  ;;  %v687_v27 = vunpack.c.l.bf16 %v880_v14 }
  0x3c   :  { %571 = vst [vmem:[%s1476_s4 + $0x110] sm:$0xff] %v507_v20  ;;  %v509_v30 = vmax.f32 %v445_v21, 0.0  ;;  %v446_v31 = vadd.f32 %v808_v9, %v254_v22  ;;  %v255_v32 = vadd.f32 %v961_v3, %v187_v23  ;;  %v815_v33 = vunpack.c.l.bf16 %v911_v19  ;;  %v885_v22 = vld [vmem:[%s1472_s0 + $0xc8] sm:$0xff]  }
  0x3d   :  { %572 = vst [vmem:[%s1476_s4 + $0x118] sm:$0xff] %v508_v24  ;;  %v256_v34 = vadd.f32 %v961_v3, %v188_v25  ;;  %v189_v35 = vmul.f32 %v956_v1, %v687_v27  ;;  %v688_v36 = vunpack.c.h.bf16 %v880_v14  ;;  %v816_v37 = vunpack.c.h.bf16 %v911_v19  ;;  %v916_v23 = vld [vmem:[%s1473_s1 + $0xc8] sm:$0xff]  }
  0x3e   :  { %573 = vst [vmem:[%s1476_s4 + $0x120] sm:$0xff] %v509_v30  ;;  %v510_v39 = vmax.f32 %v446_v31, 0.0  ;;  %v447_v40 = vadd.f32 %v811_v17, %v255_v32  ;;  %v691_v41 = vunpack.c.l.bf16 %v881_v28  ;;  %v819_v42 = vunpack.c.l.bf16 %v912_v29  ;;  %v886_v32 = vld [vmem:[%s1472_s0 + $0xd0] sm:$0xff]  }
  0x3f   :  { %v448_v43 = vadd.f32 %v812_v26, %v256_v34  ;;  %v257_v44 = vadd.f32 %v961_v3, %v189_v35  ;;  %v190_v45 = vmul.f32 %v956_v1, %v688_v36  ;;  %v692_v46 = vunpack.c.h.bf16 %v881_v28 }
  0x40   :  { %574 = vst [vmem:[%s1476_s4 + $0x128] sm:$0xff] %v510_v39  ;;  %v511_v48 = vmax.f32 %v447_v40, 0.0  ;;  %v191_v49 = vmul.f32 %v956_v1, %v691_v41  ;;  %v820_v50 = vunpack.c.h.bf16 %v912_v29  ;;  %v695_v51 = vunpack.c.l.bf16 %v882_v38  ;;  %v917_v41 = vld [vmem:[%s1473_s1 + $0xd0] sm:$0xff]  }
  0x41   :  { %v512_v52 = vmax.f32 %v448_v43, 0.0  ;;  %v449_v53 = vadd.f32 %v815_v33, %v257_v44  ;;  %v258_v54 = vadd.f32 %v961_v3, %v190_v45  ;;  %v192_v55 = vmul.f32 %v956_v1, %v692_v46 }
  0x42   :  { %575 = vst [vmem:[%s1476_s4 + $0x130] sm:$0xff] %v511_v48  ;;  %v259_v57 = vadd.f32 %v961_v3, %v191_v49  ;;  %v193_v58 = vmul.f32 %v956_v1, %v695_v51  ;;  %v823_v59 = vunpack.c.l.bf16 %v913_v47  ;;  %v696_v60 = vunpack.c.h.bf16 %v882_v38 }
  0x43   :  { %576 = vst [vmem:[%s1476_s4 + $0x138] sm:$0xff] %v512_v52  ;;  %v513_v62 = vmax.f32 %v449_v53, 0.0  ;;  %v450_v63 = vadd.f32 %v816_v37, %v258_v54  ;;  %v260_v0 = vadd.f32 %v961_v3, %v192_v55  ;;  %v824_v2 = vunpack.c.h.bf16 %v913_v47  ;;  %v918_v55 = vld [vmem:[%s1473_s1 + $0xd8] sm:$0xff]  }
  0x44   :  { %v451_v4 = vadd.f32 %v819_v42, %v259_v57  ;;  %v261_v5 = vadd.f32 %v961_v3, %v193_v58  ;;  %v194_v6 = vmul.f32 %v956_v1, %v696_v60  ;;  %v699_v7 = vunpack.c.l.bf16 %v883_v56 }
  0x45   :  { %577 = vst [vmem:[%s1476_s4 + $0x140] sm:$0xff] %v513_v62  ;;  %v514_v9 = vmax.f32 %v450_v63, 0.0  ;;  %v452_v10 = vadd.f32 %v820_v50, %v260_v0  ;;  %v827_v11 = vunpack.c.l.bf16 %v914_v61  ;;  %v700_v12 = vunpack.c.h.bf16 %v883_v56  ;;  %v887_v50 = vld [vmem:[%s1472_s0 + $0xd8] sm:$0xff]   ;;  %v888_v0 = vld [vmem:[%s1472_s0 + $0xe0] sm:$0xff]  }
  0x46   :  { %v515_v14 = vmax.f32 %v451_v4, 0.0  ;;  %v453_v15 = vadd.f32 %v823_v59, %v261_v5  ;;  %v262_v16 = vadd.f32 %v961_v3, %v194_v6  ;;  %v195_v17 = vmul.f32 %v956_v1, %v699_v7  ;;  %v919_v7 = vld [vmem:[%s1473_s1 + $0xe0] sm:$0xff]  }
  0x47   :  { %578 = vst [vmem:[%s1476_s4 + $0x148] sm:$0xff] %v514_v9  ;;  %v516_v18 = vmax.f32 %v452_v10, 0.0  ;;  %v196_v19 = vmul.f32 %v956_v1, %v700_v12  ;;  %v828_v20 = vunpack.c.h.bf16 %v914_v61  ;;  %v703_v21 = vunpack.c.l.bf16 %v884_v8 }
  0x48   :  { %579 = vst [vmem:[%s1476_s4 + $0x150] sm:$0xff] %v515_v14  ;;  %v517_v24 = vmax.f32 %v453_v15, 0.0  ;;  %v454_v25 = vadd.f32 %v824_v2, %v262_v16  ;;  %v263_v26 = vadd.f32 %v961_v3, %v195_v17  ;;  %v831_v27 = vunpack.c.l.bf16 %v915_v13  ;;  %v889_v16 = vld [vmem:[%s1472_s0 + $0xe8] sm:$0xff]  }
  0x49   :  { %580 = vst [vmem:[%s1476_s4 + $0x158] sm:$0xff] %v516_v18  ;;  %v264_v28 = vadd.f32 %v961_v3, %v196_v19  ;;  %v197_v29 = vmul.f32 %v956_v1, %v703_v21  ;;  %v704_v30 = vunpack.c.h.bf16 %v884_v8  ;;  %v832_v31 = vunpack.c.h.bf16 %v915_v13  ;;  %v920_v17 = vld [vmem:[%s1473_s1 + $0xe8] sm:$0xff]  }
  0x4a   :  { %581 = vst [vmem:[%s1476_s4 + $0x160] sm:$0xff] %v517_v24  ;;  %v518_v33 = vmax.f32 %v454_v25, 0.0  ;;  %v455_v34 = vadd.f32 %v827_v11, %v263_v26  ;;  %v707_v35 = vunpack.c.l.bf16 %v885_v22  ;;  %v835_v36 = vunpack.c.l.bf16 %v916_v23  ;;  %v890_v26 = vld [vmem:[%s1472_s0 + $0xf0] sm:$0xff]  }
  0x4b   :  { %v456_v37 = vadd.f32 %v828_v20, %v264_v28  ;;  %v265_v38 = vadd.f32 %v961_v3, %v197_v29  ;;  %v198_v39 = vmul.f32 %v956_v1, %v704_v30  ;;  %v708_v40 = vunpack.c.h.bf16 %v885_v22 }
  0x4c   :  { %582 = vst [vmem:[%s1476_s4 + $0x168] sm:$0xff] %v518_v33  ;;  %v519_v42 = vmax.f32 %v455_v34, 0.0  ;;  %v199_v43 = vmul.f32 %v956_v1, %v707_v35  ;;  %v836_v44 = vunpack.c.h.bf16 %v916_v23  ;;  %v711_v45 = vunpack.c.l.bf16 %v886_v32  ;;  %v921_v35 = vld [vmem:[%s1473_s1 + $0xf0] sm:$0xff]  }
  0x4d   :  { %v520_v46 = vmax.f32 %v456_v37, 0.0  ;;  %v457_v47 = vadd.f32 %v831_v27, %v265_v38  ;;  %v266_v48 = vadd.f32 %v961_v3, %v198_v39  ;;  %v200_v49 = vmul.f32 %v956_v1, %v708_v40 }
  0x4e   :  { %583 = vst [vmem:[%s1476_s4 + $0x170] sm:$0xff] %v519_v42  ;;  %v267_v51 = vadd.f32 %v961_v3, %v199_v43  ;;  %v201_v52 = vmul.f32 %v956_v1, %v711_v45  ;;  %v839_v53 = vunpack.c.l.bf16 %v917_v41  ;;  %v712_v54 = vunpack.c.h.bf16 %v886_v32 }
  0x4f   :  { %584 = vst [vmem:[%s1476_s4 + $0x178] sm:$0xff] %v520_v46  ;;  %v521_v56 = vmax.f32 %v457_v47, 0.0  ;;  %v458_v57 = vadd.f32 %v832_v31, %v266_v48  ;;  %v268_v58 = vadd.f32 %v961_v3, %v200_v49  ;;  %v840_v59 = vunpack.c.h.bf16 %v917_v41  ;;  %v922_v49 = vld [vmem:[%s1473_s1 + $0xf8] sm:$0xff]  }
  0x50   :  { %v459_v60 = vadd.f32 %v835_v36, %v267_v51  ;;  %v269_v61 = vadd.f32 %v961_v3, %v201_v52  ;;  %v202_v62 = vmul.f32 %v956_v1, %v712_v54  ;;  %v715_v63 = vunpack.c.l.bf16 %v887_v50 }
  0x51   :  { %585 = vst [vmem:[%s1476_s4 + $0x180] sm:$0xff] %v521_v56  ;;  %v522_v2 = vmax.f32 %v458_v57, 0.0  ;;  %v460_v4 = vadd.f32 %v836_v44, %v268_v58  ;;  %v843_v5 = vunpack.c.l.bf16 %v918_v55  ;;  %v716_v6 = vunpack.c.h.bf16 %v887_v50  ;;  %v891_v44 = vld [vmem:[%s1472_s0 + $0xf8] sm:$0xff]  }
  0x52   :  { %v523_v8 = vmax.f32 %v459_v60, 0.0  ;;  %v461_v9 = vadd.f32 %v839_v53, %v269_v61  ;;  %v270_v10 = vadd.f32 %v961_v3, %v202_v62  ;;  %v203_v11 = vmul.f32 %v956_v1, %v715_v63 }
  0x53   :  { %586 = vst [vmem:[%s1476_s4 + $0x188] sm:$0xff] %v522_v2  ;;  %v524_v12 = vmax.f32 %v460_v4, 0.0  ;;  %v204_v13 = vmul.f32 %v956_v1, %v716_v6  ;;  %v844_v14 = vunpack.c.h.bf16 %v918_v55  ;;  %v719_v15 = vunpack.c.l.bf16 %v888_v0 }
  0x54   :  { %587 = vst [vmem:[%s1476_s4 + $0x190] sm:$0xff] %v523_v8  ;;  %v525_v18 = vmax.f32 %v461_v9, 0.0  ;;  %v462_v19 = vadd.f32 %v840_v59, %v270_v10  ;;  %v271_v20 = vadd.f32 %v961_v3, %v203_v11  ;;  %v847_v21 = vunpack.c.l.bf16 %v919_v7 }
  0x55   :  { %588 = vst [vmem:[%s1476_s4 + $0x198] sm:$0xff] %v524_v12  ;;  %v272_v22 = vadd.f32 %v961_v3, %v204_v13  ;;  %v205_v23 = vmul.f32 %v956_v1, %v719_v15  ;;  %v720_v24 = vunpack.c.h.bf16 %v888_v0  ;;  %v848_v25 = vunpack.c.h.bf16 %v919_v7 }
  0x56   :  { %589 = vst [vmem:[%s1476_s4 + $0x1a0] sm:$0xff] %v525_v18  ;;  %v526_v27 = vmax.f32 %v462_v19, 0.0  ;;  %v463_v28 = vadd.f32 %v843_v5, %v271_v20  ;;  %v723_v29 = vunpack.c.l.bf16 %v889_v16  ;;  %v851_v30 = vunpack.c.l.bf16 %v920_v17 }
  0x57   :  { %v464_v31 = vadd.f32 %v844_v14, %v272_v22  ;;  %v273_v32 = vadd.f32 %v961_v3, %v205_v23  ;;  %v206_v33 = vmul.f32 %v956_v1, %v720_v24  ;;  %v724_v34 = vunpack.c.h.bf16 %v889_v16 }
  0x58   :  { %590 = vst [vmem:[%s1476_s4 + $0x1a8] sm:$0xff] %v526_v27  ;;  %v527_v36 = vmax.f32 %v463_v28, 0.0  ;;  %v207_v37 = vmul.f32 %v956_v1, %v723_v29  ;;  %v852_v38 = vunpack.c.h.bf16 %v920_v17  ;;  %v727_v39 = vunpack.c.l.bf16 %v890_v26 }
  0x59   :  { %v528_v40 = vmax.f32 %v464_v31, 0.0  ;;  %v465_v41 = vadd.f32 %v847_v21, %v273_v32  ;;  %v274_v42 = vadd.f32 %v961_v3, %v206_v33  ;;  %v208_v43 = vmul.f32 %v956_v1, %v724_v34 }
  0x5a   :  { %591 = vst [vmem:[%s1476_s4 + $0x1b0] sm:$0xff] %v527_v36  ;;  %v275_v45 = vadd.f32 %v961_v3, %v207_v37  ;;  %v209_v46 = vmul.f32 %v956_v1, %v727_v39  ;;  %v855_v47 = vunpack.c.l.bf16 %v921_v35  ;;  %v728_v48 = vunpack.c.h.bf16 %v890_v26 }
  0x5b   :  { %592 = vst [vmem:[%s1476_s4 + $0x1b8] sm:$0xff] %v528_v40  ;;  %v529_v50 = vmax.f32 %v465_v41, 0.0  ;;  %v466_v51 = vadd.f32 %v848_v25, %v274_v42  ;;  %v276_v52 = vadd.f32 %v961_v3, %v208_v43  ;;  %v856_v53 = vunpack.c.h.bf16 %v921_v35 }
  0x5c   :  { %v467_v54 = vadd.f32 %v851_v30, %v275_v45  ;;  %v277_v55 = vadd.f32 %v961_v3, %v209_v46  ;;  %v210_v56 = vmul.f32 %v956_v1, %v728_v48  ;;  %v731_v57 = vunpack.c.l.bf16 %v891_v44 }
  0x5d   :  { %593 = vst [vmem:[%s1476_s4 + $0x1c0] sm:$0xff] %v529_v50  ;;  %v530_v58 = vmax.f32 %v466_v51, 0.0  ;;  %v468_v59 = vadd.f32 %v852_v38, %v276_v52  ;;  %v859_v60 = vunpack.c.l.bf16 %v922_v49  ;;  %v732_v61 = vunpack.c.h.bf16 %v891_v44 }
  0x5e   :  { %v531_v62 = vmax.f32 %v467_v54, 0.0  ;;  %v469_v63 = vadd.f32 %v855_v47, %v277_v55  ;;  %v278_v0 = vadd.f32 %v961_v3, %v210_v56  ;;  %v211_v2 = vmul.f32 %v956_v1, %v731_v57 }
  0x5f   :  { %594 = vst [vmem:[%s1476_s4 + $0x1c8] sm:$0xff] %v530_v58  ;;  %v532_v4 = vmax.f32 %v468_v59, 0.0  ;;  %v212_v5 = vmul.f32 %v956_v1, %v732_v61  ;;  %v860_v6 = vunpack.c.h.bf16 %v922_v49 }
  0x60   :  { %595 = vst [vmem:[%s1476_s4 + $0x1d0] sm:$0xff] %v531_v62  ;;  %v533_v7 = vmax.f32 %v469_v63, 0.0  ;;  %v470_v8 = vadd.f32 %v856_v53, %v278_v0  ;;  %v279_v9 = vadd.f32 %v961_v3, %v211_v2 }
  0x61   :  { %596 = vst [vmem:[%s1476_s4 + $0x1d8] sm:$0xff] %v532_v4  ;;  %v280_v10 = vadd.f32 %v961_v3, %v212_v5 }
  0x62   :  { %597 = vst [vmem:[%s1476_s4 + $0x1e0] sm:$0xff] %v533_v7  ;;  %v534_v1 = vmax.f32 %v470_v8, 0.0  ;;  %v471_v11 = vadd.f32 %v859_v60, %v279_v9 }
  0x63   :  { %v472_v12 = vadd.f32 %v860_v6, %v280_v10 }
  0x64   :  { %598 = vst [vmem:[%s1476_s4 + $0x1e8] sm:$0xff] %v534_v1  ;;  %v535_v13 = vmax.f32 %v471_v11, 0.0 }
  0x65   :  { %v536_v14 = vmax.f32 %v472_v12, 0.0 }
  0x66   :  { %599 = vst [vmem:[%s1476_s4 + $0x1f0] sm:$0xff] %v535_v13 }
  0x67   :  { %600 = vst [vmem:[%s1476_s4 + $0x1f8] sm:$0xff] %v536_v14 }

// kernel: _block_impl.5
= control target key start
LH: loop header
LB: loop body
LE: loop exit
PB: predicated region body
PF: predicated region fallthrough
CT: control target
= control target key end

     0   :  { %s5066_s21 = smov 0   ;;  %s6895_s0 = inlined_call_operand.vmem [shape: bf16[2,16,16,128], index: 0, kind: input, shape index: {}]   ;;  %s6896_s1 = inlined_call_operand.vmem [shape: f32[1,128], index: 1, kind: input, shape index: {}]   ;;  %s6897_s2 = inlined_call_operand.vmem [shape: f32[1,128], index: 2, kind: input, shape index: {}]   ;;  %s6898_s3 = inlined_call_operand.vmem [shape: bf16[9,128,128], index: 3, kind: input, shape index: {}]   ;;  %s6899_s4 = inlined_call_operand.vmem [shape: f32[1,128], index: 4, kind: input, shape index: {}]   ;;  %s6900_s5 = inlined_call_operand.vmem [shape: bf16[2,16,16,128], index: 5, kind: output, shape index: {0}]   ;;  %s6901_s6 = inlined_call_operand.vmem [shape: f32[2,2,128], index: 6, kind: output, shape index: {1}]  }
   0x1 LB: > { %s4241_s22 = sadd.s32 4294967295, %s5027_s21   ;;  %p4245_p0 = scmp.ge.s32.totalorder %s5027_s21, 1  ;;  %s5027_s21 = sphi %s5066_s21, %s17_s21  }
   0x2   : > { %p215_p1 = scmp.lt.s32.totalorder %s5027_s21, 3 }
   0x4   : > { %p216_p2 = pnand %p4245_p0, %p215_p1 }
   0x6   : > { %219 = sbr.rel (%p216_p2) target bundleno = 810 (0x32a), region = 40 }
   0xb   : > { %v4742_v0 = vld [vmem:[%s6898_s3 + $0x38] sm:$0xff]  ;;  %p249_p3 = scmp.lt.s32.totalorder %s4241_s22, 1  ;;  %v466_v1 = vlaneseq  ;;  %v4741_v2 = vld [vmem:[%s6898_s3 + $0x30] sm:$0xff]  ;;  %vm5029_vm0 = vmmov 1   ;;  %v4740_v7 = vld [vmem:[%s6898_s3 + $0x28] sm:$0xff]  ;;  %v6936_v9 = vmov 0  }
   0xc   : > { %4981 = vmatpush.bf16.msra.mxu1 %v4742_v0  ;;  %4982 = vmatpush.bf16.msra.mxu2 %v4742_v0  ;;  %vm1293_vm1 = vmpackc.low %vm5029_vm0, %vm5029_vm0  ;;  %v5103_v8 = vld [vmem:[%s6896_s1] ss:$0 sm:$0xff]  ;;  %v5107_v11 = vunpack.c.l.b16 %v6936_v9  ;;  %v5112_v16 = vunpack.c.h.b16 %v6936_v9  ;;  %v4738_v49 = vld [vmem:[%s6898_s3 + $0x18] sm:$0xff]  ;;  %vm6977_vm5 = vsmask.f32 256 }
   0xd   : > { %s7495_s22 = smov (!%p249_p3, %s4241_s22), 1  ;;  %v5082_v3 = vshrl.u32 %v466_v1, 7  ;;  %4983 = vmatpush.bf16.msra.mxu3 %v4742_v0  ;;  %1581 = vmatpush.bf16.msra.mxu0 %v4742_v0  ;;  %v1323_v10 = vsel %vm1293_vm1, 65537, %v6936_v9  ;;  %v5118_v23 = vld [vmem:[%s6897_s2] ss:$0 sm:$0xff] }
   0xe   : > { %s4733_s27 = sshll.u32 %s7495_s22, 7  ;;  %v1353_v15 = vunpack.c.l.b16 %v1323_v10  ;;  %v4739_v33 = vld [vmem:[%s6898_s3 + $0x20] sm:$0xff] }
   0xf   : > { %v475_v4 = vadd.s32 64, %v5082_v3  ;;  %v483_v5 = vadd.s32 128, %v5082_v3  ;;  %v5088_v6 = vadd.s32 192, %v5082_v3  ;;  %s5098_s8 = scalar_lea.vmem %s6895_s0, %s4733_s27  ;;  %s6759_s20 = scalar_lea.vmem %s6900_s5, %s4733_s27 }
  0x10   : > { %4984 = vmatpush.bf16.msra.mxu1 %v4741_v2  ;;  %4985 = vmatpush.bf16.msra.mxu2 %v4741_v2  ;;  %v4952_v12 = vld [vmem:[%s5098_s8 + $0x10] sm:$0xff]   ;;  %v4953_v13 = vld [vmem:[%s5098_s8 + $0x18] sm:$0xff]   ;;  %v5129_v34 = vunpack.i.l.s16 %v1353_v15  ;;  %s4250_s27 = sshll.u32 %s7495_s22, 1 }
  0x11   : > { %v559_v14 = vand.u32 15, %v475_v4  ;;  %v4956_v17 = vld [vmem:[%s5098_s8 + $0x30] sm:$0xff]   ;;  %v615_v18 = vand.u32 15, %v483_v5  ;;  %4986 = vmatpush.bf16.msra.mxu3 %v4741_v2  ;;  %1582 = vmatpush.bf16.msra.mxu0 %v4741_v2  ;;  %v4817_v19 = vunpack.c.l.bf16 %v4952_v12  ;;  %v4818_v20 = vunpack.c.h.bf16 %v4952_v12  ;;  %v4957_v24 = vld [vmem:[%s5098_s8 + $0x38] sm:$0xff]   ;;  %s262_s25 = scalar_lea.vmem %s6901_s6, %s4250_s27 }
  0x12   : > { %v4821_v21 = vunpack.c.l.bf16 %v4953_v13  ;;  %v4822_v22 = vunpack.c.h.bf16 %v4953_v13  ;;  %v4833_v26 = vunpack.c.l.bf16 %v4956_v17  ;;  %v4834_v27 = vunpack.c.h.bf16 %v4956_v17  ;;  %v4960_v63 = vld [vmem:[%s5098_s8 + $0x50] sm:$0xff]  }
  0x13   : > { %v1108_v25 = vadd.s32 4294967295, %v559_v14  ;;  %v671_v28 = vand.u32 15, %v5088_v6  ;;  %v338_v29 = vmul.f32 %v5103_v8, %v4817_v19  ;;  %v339_v30 = vmul.f32 %v5103_v8, %v4818_v20  ;;  %v4737_v4 = vld [vmem:[%s6898_s3 + $0x10] sm:$0xff] }
  0x14   : > { %v340_v31 = vmul.f32 %v5103_v8, %v4821_v21  ;;  %v341_v32 = vmul.f32 %v5103_v8, %v4822_v22  ;;  %4987 = vmatpush.bf16.msra.mxu1 %v4740_v7  ;;  %4988 = vmatpush.bf16.msra.mxu2 %v4740_v7  ;;  %v4837_v35 = vunpack.c.l.bf16 %v4957_v24  ;;  %v4838_v36 = vunpack.c.h.bf16 %v4957_v24 }
  0x15   : > { %vm1140_vm2 = vcmp.ge.s32.totalorder %v1108_v25, 0  ;;  %4989 = vmatpush.bf16.msra.mxu3 %v4740_v7  ;;  %1583 = vmatpush.bf16.msra.mxu0 %v4740_v7  ;;  %v374_v37 = vadd.f32 %v5118_v23, %v338_v29  ;;  %v375_v38 = vadd.f32 %v5118_v23, %v339_v30  ;;  %v1116_v40 = vadd.s32 4294967295, %v615_v18 }
  0x16   : > { %v376_v39 = vadd.f32 %v5118_v23, %v340_v31  ;;  %vm1298_vm3 = vmpackc.low %vm1140_vm2, %vm1140_vm2  ;;  %v377_v41 = vadd.f32 %v5118_v23, %v341_v32  ;;  %v346_v43 = vmul.f32 %v5103_v8, %v4833_v26  ;;  %v347_v44 = vmul.f32 %v5103_v8, %v4834_v27  ;;  %v4961_v26 = vld [vmem:[%s5098_s8 + $0x58] sm:$0xff]   ;;  %v4736_v27 = vld [vmem:[%s6898_s3 + $0x8] sm:$0xff] }
  0x17   : > { %v1328_v42 = vsel %vm1298_vm3, 65537, %v6936_v9  ;;  %v406_v45 = vmax.f32 %v374_v37, 0.0  ;;  %v407_v46 = vmax.f32 %v375_v38, 0.0  ;;  %v348_v51 = vmul.f32 %v5103_v8, %v4837_v35 }
  0x18   : > { %v408_v47 = vmax.f32 %v376_v39, 0.0  ;;  %v1358_v48 = vunpack.c.l.b16 %v1328_v42  ;;  %4990 = vmatpush.bf16.msra.mxu1 %v4739_v33  ;;  %4991 = vmatpush.bf16.msra.mxu2 %v4739_v33  ;;  %v409_v50 = vmax.f32 %v377_v41, 0.0  ;;  %v349_v52 = vmul.f32 %v5103_v8, %v4838_v36 }
  0x19   : > { %v382_v53 = vadd.f32 %v5118_v23, %v346_v43  ;;  %4992 = vmatpush.bf16.msra.mxu3 %v4739_v33  ;;  %1584 = vmatpush.bf16.msra.mxu0 %v4739_v33  ;;  %v5144_v54 = vpack.c.bf16 %v406_v45, %v406_v45  ;;  %v5146_v55 = vpack.c.bf16 %v407_v46, %v407_v46  ;;  %vm1148_vm7 = vcmp.ge.s32.totalorder %v1116_v40, 0  ;;  %v4735_v46 = vld [vmem:[%s6898_s3] sm:$0xff] }
  0x1a   : > { %v5148_v56 = vpack.c.bf16 %v408_v47, %v408_v47  ;;  %vm5152_vm4 = vcmp.ne.s32.totalorder %v5129_v34, %v5112_v16  ;;  %v4257_v58 = vunpack.i.l.s16 %v1358_v48  ;;  %v5156_v59 = vpack.c.bf16 %v409_v50, %v409_v50  ;;  %vm1306_vm8 = vmpackc.low %vm1148_vm7, %vm1148_vm7 }
  0x1b   : > { %7094 = vst [vmem:[#allocation2_spill] sm:$0xff] %v5146_v55  ;;  %v383_v60 = vadd.f32 %v5118_v23, %v347_v44  ;;  %v384_v61 = vadd.f32 %v5118_v23, %v348_v51  ;;  %v385_v62 = vadd.f32 %v5118_v23, %v349_v52  ;;  %v6928_v0 = vunpack.c.l.b16 %v5144_v54 }
  0x1c   : > { %7095 = vst [vmem:[#allocation3_spill] sm:$0xff] %v5148_v56  ;;  %v6912_v1 = vunpack.c.l.b16 %v5146_v55  ;;  %v6911_v2 = vunpack.c.l.b16 %v5148_v56  ;;  %vm1422_vm6 = vcmp.ne.s32.totalorder %v4257_v58, %v5107_v11  ;;  %4993 = vmatpush.bf16.msra.mxu1 %v4738_v49  ;;  %4994 = vmatpush.bf16.msra.mxu2 %v4738_v49  ;;  %v6910_v5 = vunpack.c.l.b16 %v5156_v59 }
  0x1d   : > { %7098 = vst [vmem:[#allocation4_spill] sm:$0xff] %v5156_v59  ;;  %v414_v7 = vmax.f32 %v382_v53, 0.0  ;;  %v415_v10 = vmax.f32 %v383_v60, 0.0  ;;  %v416_v12 = vmax.f32 %v384_v61, 0.0  ;;  %4995 = vmatpush.bf16.msra.mxu3 %v4738_v49  ;;  %1585 = vmatpush.bf16.msra.mxu0 %v4738_v49  ;;  %v417_v14 = vmax.f32 %v385_v62, 0.0  ;;  %vm5234_vm9 = vmpackc.low %vm5152_vm4, %vm1422_vm6  ;;  %v4954_v60 = vld [vmem:[%s5098_s8 + $0x20] sm:$0xff]  }
  0x1e   : > { %v5174_v13 = vpack.c.b16 %v6912_v1, %v6928_v0  ;;  %v4849_v15 = vunpack.c.l.bf16 %v4960_v63  ;;  %v5180_v17 = vpack.c.b16 %v6910_v5, %v6911_v2  ;;  %v1336_v24 = vsel %vm1306_vm8, 65537, %v6936_v9  ;;  %v4748_v5 = vld [vmem:[%s6898_s3 + $0x68] sm:$0xff]  ;;  %v4755_v1 = vld [vmem:[%s6898_s3 + $0xa0] sm:$0xff] }
  0x1f   : > { %v5182_v18 = vpack.c.bf16 %v414_v7, %v414_v7  ;;  %v5184_v19 = vpack.c.bf16 %v415_v10, %v415_v10  ;;  %v5186_v20 = vpack.c.bf16 %v416_v12, %v416_v12  ;;  %v5189_v22 = vpack.c.bf16 %v417_v14, %v417_v14  ;;  %v4758_v7 = vld [vmem:[%s6898_s3 + $0xb8] sm:$0xff] }
  0x20   : > { %7099 = vst [vmem:[#allocation5_spill] sm:$0xff] %v5174_v13  ;;  %v6927_v21 = vshrl.u32 %v5174_v13, 16  ;;  %v4850_v25 = vunpack.c.h.bf16 %v4960_v63  ;;  %4996 = vmatpush.bf16.msra.mxu1 %v4737_v4  ;;  %4997 = vmatpush.bf16.msra.mxu2 %v4737_v4  ;;  %v6921_v29 = vshrl.u32 %v5180_v17, 16  ;;  %v6922_v30 = vshll.u32 %v5180_v17, 16  ;;  %v4766_v10 = vld [vmem:[%s6898_s3 + $0xf8] sm:$0xff] }
  0x21   : > { %7100 = vst [vmem:[#allocation6_spill] sm:$0xff] %v5180_v17  ;;  %v6907_v31 = vunpack.c.l.b16 %v5182_v18  ;;  %v6906_v32 = vunpack.c.l.b16 %v5184_v19  ;;  %4998 = vmatpush.bf16.msra.mxu3 %v4737_v4  ;;  %1586 = vmatpush.bf16.msra.mxu0 %v4737_v4  ;;  %v6905_v35 = vunpack.c.l.b16 %v5186_v20  ;;  %v6904_v36 = vunpack.c.l.b16 %v5189_v22 }
  0x22   : > { %7101 = vst [vmem:[#allocation7_spill] sm:$0xff] %v5182_v18  ;;  %v5202_v33 = vrot.slane %v6927_v21, 7  ;;  %v1366_v37 = vunpack.c.l.b16 %v1336_v24  ;;  %v5208_v38 = vrot.slane %v6921_v29, 7  ;;  %v4853_v40 = vunpack.c.l.bf16 %v4961_v26 }
  0x23   : > { %7102 = vst [vmem:[#allocation8_spill] sm:$0xff] %v5184_v19  ;;  %v5214_v39 = vpack.c.b16 %v6906_v32, %v6907_v31  ;;  %v4854_v41 = vunpack.c.h.bf16 %v4961_v26  ;;  %v5220_v42 = vpack.c.b16 %v6904_v36, %v6905_v35  ;;  %v354_v44 = vmul.f32 %v5103_v8, %v4849_v15 }
  0x24   : > { %7103 = vst [vmem:[#allocation9_spill] sm:$0xff] %v5186_v20  ;;  %v4265_v43 = vunpack.i.l.s16 %v1366_v37  ;;  %v355_v45 = vmul.f32 %v5103_v8, %v4850_v25  ;;  %4999 = vmatpush.bf16.msra.mxu1 %v4736_v27  ;;  %5000 = vmatpush.bf16.msra.mxu2 %v4736_v27  ;;  %v992_v47 = vor.u32 %v6922_v30, %v5208_v38  ;;  %v7107_v48 = vmov 0  ;;  %v4774_v25 = vld [vmem:[%s6898_s3 + $0x138] sm:$0xff] }
  0x25   : > { %7104 = vst [vmem:[#allocation10_spill] sm:$0xff] %v5189_v22  ;;  %v7108_v48 = vsel %vm5234_vm9, 4294967295, %v7107_v48  ;;  %v6920_v49 = vshrl.u32 %v5214_v39, 16  ;;  %v356_v50 = vmul.f32 %v5103_v8, %v4853_v40  ;;  %v357_v51 = vmul.f32 %v5103_v8, %v4854_v41  ;;  %5001 = vmatpush.bf16.msra.mxu3 %v4736_v27  ;;  %1587 = vmatpush.bf16.msra.mxu0 %v4736_v27  ;;  %v4750_v40 = vld [vmem:[%s6898_s3 + $0x78] sm:$0xff] }
  0x26   : > { %7105 = vst [vmem:[#allocation11_spill] sm:$0xff] %v5214_v39  ;;  %v6915_v52 = vshrl.u32 %v5220_v42, 16  ;;  %v6919_v53 = vshll.u32 %v5220_v42, 16  ;;  %vm1450_vm10 = vcmp.ne.s32.totalorder %v4265_v43, %v5107_v11  ;;  %v390_v58 = vadd.f32 %v5118_v23, %v354_v44  ;;  %v4757_v43 = vld [vmem:[%s6898_s3 + $0xb0] sm:$0xff] }
  0x27   : > { %7106 = vst [vmem:[#allocation12_spill] sm:$0xff] %v5220_v42  ;;  %v5248_v61 = vsel %vm6977_vm5, %v5202_v33, %v992_v47  ;;  %v5252_v62 = vrot.slane %v6920_v49, 7  ;;  %v391_v63 = vadd.f32 %v5118_v23, %v355_v45  ;;  %v392_v4 = vadd.f32 %v5118_v23, %v356_v50  ;;  %vm5285_vm11 = vmpackc.low %vm5152_vm4, %vm1450_vm10 }
  0x28   : > { %7109 = vst [vmem:[#allocation13_spill] sm:$0xff] %v7108_v48  ;;  %v1505_v12 = vsel %vm5234_vm9, %v5248_v61, 0  ;;  %v5267_v14 = vrot.slane %v6915_v52, 7  ;;  %v393_v15 = vadd.f32 %v5118_v23, %v357_v51  ;;  %v422_v24 = vmax.f32 %v390_v58, 0.0  ;;  %5002 = vmatpush.bf16.msra.mxu1 %v4735_v46  ;;  %5003 = vmatpush.bf16.msra.mxu2 %v4735_v46  ;;  %v4765_v51 = vld [vmem:[%s6898_s3 + $0xf0] sm:$0xff] }
  0x29   : > { %v423_v26 = vmax.f32 %v391_v63, 0.0  ;;  %v424_v27 = vmax.f32 %v392_v4, 0.0  ;;  %v1124_v37 = vadd.s32 4294967295, %v671_v28  ;;  %v4825_v41 = vunpack.c.l.bf16 %v4954_v60  ;;  %5004 = vmatpush.bf16.msra.mxu3 %v4735_v46  ;;  %1588 = vmatpush.bf16.msra.mxu0 %v4735_v46 }
  0x2a   : > { %v1024_v44 = vor.u32 %v6919_v53, %v5267_v14  ;;  %v7110_v45 = vmov 0  ;;  %v425_v6 = vmax.f32 %v393_v15, 0.0  ;;  %v5289_v28 = vpack.c.bf16 %v422_v24, %v422_v24  ;;  %v4808_v53 = vld [vmem:[%s5098_s8] sm:$0xff]  }
  0x2b   : > { %v7111_v45 = vsel %vm5285_vm11, 4294967295, %v7110_v45  ;;  %v4826_v47 = vunpack.c.h.bf16 %v4954_v60  ;;  %v5291_v50 = vpack.c.bf16 %v423_v26, %v423_v26  ;;  %v5293_v46 = vpack.c.bf16 %v424_v27, %v424_v27  ;;  %1609 = vmatmul.bf16.vlgmr.msra.gmra.mxu1 %v1505_v12 }
  0x2c   : > { %7112 = vst [vmem:[#allocation14_spill] sm:$0xff] %v7111_v45  ;;  %vm1156_vm12 = vcmp.ge.s32.totalorder %v1124_v37, 0  ;;  %2472 = vmatpush.bf16.msrb.mxu2 %v4758_v7  ;;  %v342_v58 = vmul.f32 %v5103_v8, %v4825_v41  ;;  %v5304_v60 = vsel %vm6977_vm5, %v5252_v62, %v1024_v44  ;;  %v5306_v63 = vpack.c.bf16 %v425_v6, %v425_v6 }
  0x2d   : > { %7113 = vst [vmem:[#allocation15_spill] sm:$0xff] %v5289_v28  ;;  %2700 = vmatpush.bf16.msrb.mxu3 %v4766_v10  ;;  %v6903_v4 = vunpack.c.l.b16 %v5289_v28  ;;  %vm1314_vm13 = vmpackc.low %vm1156_vm12, %vm1156_vm12  ;;  %2887 = vmatpush.bf16.msrb.mxu0 %v4774_v25  ;;  %v343_v7 = vmul.f32 %v5103_v8, %v4826_v47  ;;  %v4958_v10 = vld [vmem:[%s5098_s8 + $0x40] sm:$0xff]   ;;  %v1509_v15 = vsel %vm5285_vm11, %v5304_v60, 0  ;;  %v6902_v24 = vunpack.c.l.b16 %v5291_v50  ;;  %v4749_v25 = vld [vmem:[%s6898_s3 + $0x70] sm:$0xff] }
  0x2e   : > { %7114 = vst [vmem:[#allocation16_spill] sm:$0xff] %v5291_v50  ;;  %v6909_v12 = vunpack.c.l.b16 %v5293_v46  ;;  %v1344_v26 = vsel %vm1314_vm13, 65537, %v6936_v9  ;;  %1589 = vmatmul.bf16.vlgmr.msra.gmra.mxu0 %v6936_v9  ;;  %1782 = vmatpush.bf16.msrb.mxu1 %v4750_v40  ;;  %v6908_v27 = vunpack.c.l.b16 %v5306_v63  ;;  %v378_v41 = vadd.f32 %v5118_v23, %v342_v58  ;;  %v4959_v50 = vld [vmem:[%s5098_s8 + $0x48] sm:$0xff]  }
  0x2f   : > { %7115 = vst [vmem:[#allocation17_spill] sm:$0xff] %v5293_v46  ;;  %1629 = vmatmul.bf16.vlgmr.msra.gmra.mxu2 %v1509_v15  ;;  %v1374_v37 = vunpack.c.l.b16 %v1344_v26  ;;  %v379_v44 = vadd.f32 %v5118_v23, %v343_v7  ;;  %v5328_v6 = vpack.c.b16 %v6902_v24, %v6903_v4  ;;  %v477_v40 = vadd.s32 80, %v5082_v3  ;;  %v4756_v26 = vld [vmem:[%s6898_s3 + $0xa8] sm:$0xff] }
  0x30   : > { %7116 = vst [vmem:[#allocation18_spill] sm:$0xff] %v5306_v63  ;;  %2473 = vmatpush.bf16.msrb.mxu2 %v4757_v43  ;;  %v4841_v47 = vunpack.c.l.bf16 %v4958_v10  ;;  %v4842_v15 = vunpack.c.h.bf16 %v4958_v10  ;;  %v5338_v58 = vpack.c.b16 %v6908_v27, %v6909_v12  ;;  %v410_v24 = vmax.f32 %v378_v41, 0.0  ;;  %v4962_v27 = vld [vmem:[%s5098_s8 + $0x60] sm:$0xff]   ;;  %v4773_v12 = vld [vmem:[%s6898_s3 + $0x130] sm:$0xff] }
  0x31   : > { %2701 = vmatpush.bf16.msrb.mxu3 %v4765_v51  ;;  %v4273_v7 = vunpack.i.l.s16 %v1374_v37  ;;  %v411_v4 = vmax.f32 %v379_v44, 0.0  ;;  %v6914_v43 = vshrl.u32 %v5328_v6, 16  ;;  %v573_v51 = vand.u32 15, %v477_v40  ;;  %2888 = vmatpush.bf16.msrb.mxu0 %v4773_v12  ;;  %v4747_v12 = vld [vmem:[%s6898_s3 + $0x60] sm:$0xff] }
  0x32   : > { %7117 = vst [vmem:[#allocation19_spill] sm:$0xff] %v5338_v58  ;;  %1783 = vmatpush.bf16.msrb.mxu1 %v4749_v25  ;;  %v350_v36 = vmul.f32 %v5103_v8, %v4841_v47  ;;  %v351_v10 = vmul.f32 %v5103_v8, %v4842_v15  ;;  %v6913_v35 = vshrl.u32 %v5338_v58, 16  ;;  %v6916_v32 = vshll.u32 %v5338_v58, 16 }
  0x33   : > { %vm1478_vm14 = vcmp.ne.s32.totalorder %v4273_v7, %v5107_v11  ;;  %v5346_v31 = vpack.c.bf16 %v410_v24, %v410_v24  ;;  %v5351_v37 = vrot.slane %v6914_v43, 7  ;;  %v5353_v41 = vpack.c.bf16 %v411_v4, %v411_v4 }
  0x34   : > { %v1110_v25 = vadd.s32 4294967295, %v573_v51  ;;  %v386_v44 = vadd.f32 %v5118_v23, %v350_v36  ;;  %2474 = vmatpush.bf16.msrb.mxu2 %v4756_v26  ;;  %v5358_v40 = vrot.slane %v6913_v35, 7  ;;  %vm5362_vm15 = vmpackc.low %vm5152_vm4, %vm1478_vm14  ;;  %v7120_v24 = vmov 0  ;;  %v4764_v51 = vld [vmem:[%s6898_s3 + $0xe8] sm:$0xff] }
  0x35   : > { %7118 = vst [vmem:[#allocation20_spill] sm:$0xff] %v5346_v31  ;;  %v7121_v24 = vsel %vm5362_vm15, 4294967295, %v7120_v24  ;;  %v6918_v47 = vunpack.c.l.b16 %v5346_v31  ;;  %v387_v15 = vadd.f32 %v5118_v23, %v351_v10  ;;  %v485_v4 = vadd.s32 144, %v5082_v3  ;;  %2702 = vmatpush.bf16.msrb.mxu3 %v4764_v51  ;;  %v4745_v31 = vld [vmem:[%s6898_s3 + $0x50] sm:$0xff] }
  0x36   : > { %7119 = vst [vmem:[#allocation21_spill] sm:$0xff] %v5353_v41  ;;  %v6917_v7 = vunpack.c.l.b16 %v5353_v41  ;;  %vm1142_vm0 = vcmp.ge.s32.totalorder %v1110_v25, 0  ;;  %v418_v36 = vmax.f32 %v386_v44, 0.0  ;;  %v4857_v26 = vunpack.c.l.bf16 %v4962_v27  ;;  %1784 = vmatpush.bf16.msrb.mxu1 %v4748_v5 }
  0x37   : > { %7122 = vst [vmem:[#allocation22_spill] sm:$0xff] %v7121_v24  ;;  %v1056_v10 = vor.u32 %v6916_v32, %v5358_v40  ;;  %vm1300_vm1 = vmpackc.low %vm1142_vm0, %vm1142_vm0  ;;  %v419_v25 = vmax.f32 %v387_v15, 0.0  ;;  %v629_v44 = vand.u32 15, %v485_v4  ;;  %v4858_v2 = vunpack.c.h.bf16 %v4962_v27  ;;  %v4763_v27 = vld [vmem:[%s6898_s3 + $0xe0] sm:$0xff]  ;;  %v4772_v15 = vld [vmem:[%s6898_s3 + $0x128] sm:$0xff] }
  0x38   : > { %v5389_v35 = vpack.c.b16 %v6917_v7, %v6918_v47  ;;  %v1330_v43 = vsel %vm1300_vm1, 65537, %v6936_v9  ;;  %v5392_v52 = vpack.c.bf16 %v418_v36, %v418_v36  ;;  %v358_v32 = vmul.f32 %v5103_v8, %v4857_v26  ;;  %2475 = vmatpush.bf16.msrb.mxu2 %v4755_v1  ;;  %2889 = vmatpush.bf16.msrb.mxu0 %v4772_v15  ;;  %v4751_v24 = vld [vmem:[%s6898_s3 + $0x80] sm:$0xff] }
  0x39   : > { %v5403_v4 = vsel %vm6977_vm5, %v5351_v37, %v1056_v10  ;;  %v1360_v7 = vunpack.c.l.b16 %v1330_v43  ;;  %v5405_v47 = vpack.c.bf16 %v419_v25, %v419_v25  ;;  %v1118_v36 = vadd.s32 4294967295, %v629_v44  ;;  %2703 = vmatpush.bf16.msrb.mxu3 %v4763_v27 }
  0x3a   : > { %7123 = vst [vmem:[#allocation23_spill] sm:$0xff] %v5389_v35  ;;  %v1513_v26 = vsel %vm5362_vm15, %v5403_v4, 0  ;;  %v6925_v51 = vshrl.u32 %v5389_v35, 16  ;;  %v6926_v10 = vshll.u32 %v5389_v35, 16  ;;  %v6924_v43 = vunpack.c.l.b16 %v5392_v52  ;;  %1785 = vmatpush.bf16.msrb.mxu1 %v4747_v12 }
  0x3b   : > { %7124 = vst [vmem:[#allocation24_spill] sm:$0xff] %v5392_v52  ;;  %1649 = vmatmul.bf16.vlgmr.msra.gmra.mxu3 %v1513_v26  ;;  %v4259_v25 = vunpack.i.l.s16 %v1360_v7  ;;  %v6923_v44 = vunpack.c.l.b16 %v5405_v47  ;;  %vm1150_vm2 = vcmp.ge.s32.totalorder %v1118_v36, 0  ;;  %v359_v1 = vmul.f32 %v5103_v8, %v4858_v2  ;;  %v4963_v52 = vld [vmem:[%s5098_s8 + $0x68] sm:$0xff]  }
  0x3c   : > { %7125 = vst [vmem:[#allocation25_spill] sm:$0xff] %v5403_v4  ;;  %v5421_v5 = vrot.slane %v6925_v51, 7  ;;  %vm1308_vm3 = vmpackc.low %vm1150_vm2, %vm1150_vm2  ;;  %v394_v49 = vadd.f32 %v5118_v23, %v358_v32  ;;  %v493_v29 = vadd.s32 208, %v5082_v3  ;;  %v4809_v30 = vunpack.c.l.bf16 %v4808_v53 }
  0x3d   : > { %7126 = vst [vmem:[#allocation26_spill] sm:$0xff] %v5405_v47  ;;  %vm1429_vm6 = vcmp.ne.s32.totalorder %v4259_v25, %v5107_v11  ;;  %v5430_v7 = vpack.c.b16 %v6923_v44, %v6924_v43  ;;  %v1338_v2 = vsel %vm1308_vm3, 65537, %v6936_v9  ;;  %v395_v36 = vadd.f32 %v5118_v23, %v359_v1 }
  0x3e   : > { %v1000_v32 = vor.u32 %v6926_v10, %v5421_v5  ;;  %vm5439_vm7 = vmpackc.low %vm5152_vm4, %vm1429_vm6  ;;  %v7128_v27 = vmov 0  ;;  %v1368_v15 = vunpack.c.l.b16 %v1338_v2  ;;  %v426_v26 = vmax.f32 %v394_v49, 0.0 }
  0x3f   : > { %7127 = vst [vmem:[#allocation27_spill] sm:$0xff] %v5430_v7  ;;  %v7129_v27 = vsel %vm5439_vm7, 4294967295, %v7128_v27  ;;  %v685_v25 = vand.u32 15, %v493_v29  ;;  %v6929_v44 = vshrl.u32 %v5430_v7, 16  ;;  %v6930_v43 = vshll.u32 %v5430_v7, 16 }
  0x40   : > { %7130 = vst [vmem:[#allocation28_spill] sm:$0xff] %v7129_v27  ;;  %v427_v1 = vmax.f32 %v395_v36, 0.0  ;;  %v4810_v12 = vunpack.c.h.bf16 %v4808_v53  ;;  %v5447_v51 = vsel %vm6977_vm5, %v5208_v38, %v1000_v32  ;;  %v4267_v10 = vunpack.i.l.s16 %v1368_v15  ;;  %v4955_v36 = vld [vmem:[%s5098_s8 + $0x28] sm:$0xff]  }
  0x41   : > { %v5449_v21 = vpack.c.bf16 %v426_v26, %v426_v26  ;;  %v1126_v0 = vadd.s32 4294967295, %v685_v25  ;;  %v1506_v2 = vsel %vm5439_vm7, %v5447_v51, 0  ;;  %v5456_v29 = vrot.slane %v6929_v44, 7 }
  0x42   : > { %v5458_v49 = vpack.c.bf16 %v427_v1, %v427_v1  ;;  %v334_v53 = vmul.f32 %v5103_v8, %v4809_v30  ;;  %1614 = vmatmul.bf16.gmra.mxu1 %v1506_v2  ;;  %vm1457_vm8 = vcmp.ne.s32.totalorder %v4267_v10, %v5107_v11  ;;  %v335_v32 = vmul.f32 %v5103_v8, %v4810_v12 }
  0x43   : > { %7131 = vst [vmem:[#allocation29_spill] sm:$0xff] %v5449_v21  ;;  %v6935_v38 = vunpack.c.l.b16 %v5449_v21  ;;  %vm1158_vm10 = vcmp.ge.s32.totalorder %v1126_v0, 0  ;;  %v1032_v15 = vor.u32 %v6930_v43, %v5456_v29  ;;  %vm5470_vm12 = vmpackc.low %vm5152_vm4, %vm1457_vm8  ;;  %v7133_v26 = vmov 0 }
  0x44   : > { %7132 = vst [vmem:[#allocation30_spill] sm:$0xff] %v5458_v49  ;;  %v7134_v26 = vsel %vm5470_vm12, 4294967295, %v7133_v26  ;;  %v6934_v30 = vunpack.c.l.b16 %v5458_v49  ;;  %v370_v25 = vadd.f32 %v5118_v23, %v334_v53  ;;  %v469_v10 = vadd.s32 16, %v5082_v3  ;;  %vm1316_vm13 = vmpackc.low %vm1158_vm10, %vm1158_vm10 }
  0x45   : > { %7135 = vst [vmem:[#allocation31_spill] sm:$0xff] %v7134_v26  ;;  %v371_v0 = vadd.f32 %v5118_v23, %v335_v32  ;;  %v4829_v1 = vunpack.c.l.bf16 %v4955_v36  ;;  %v4830_v12 = vunpack.c.h.bf16 %v4955_v36  ;;  %v5480_v2 = vsel %vm6977_vm5, %v5267_v14, %v1032_v15 }
  0x46   : > { %v5486_v44 = vpack.c.b16 %v6934_v30, %v6935_v38  ;;  %v1346_v43 = vsel %vm1316_vm13, 65537, %v6936_v9  ;;  %v402_v53 = vmax.f32 %v370_v25, 0.0  ;;  %v1510_v32 = vsel %vm5470_vm12, %v5480_v2, 0 }
  0x47   : > { %v1376_v63 = vunpack.c.l.b16 %v1346_v43  ;;  %v403_v36 = vmax.f32 %v371_v0, 0.0  ;;  %v517_v46 = vand.u32 15, %v469_v10  ;;  %vm6976_vm14 = vcmask 1040384   ;;  %1634 = vmatmul.bf16.gmra.mxu2 %v1510_v32 }
  0x48   : > { %7136 = vst [vmem:[#allocation32_spill] sm:$0xff] %v5486_v44  ;;  %v6940_v14 = vshrl.u32 %v5486_v44, 16  ;;  %v6941_v15 = vshll.u32 %v5486_v44, 16  ;;  %v434_v49 = vpack.c.bf16 %v402_v53, %v402_v53  ;;  %v344_v30 = vmul.f32 %v5103_v8, %v4829_v1  ;;  %vm5555_vm10 = vmand %vm6976_vm14, %vm6977_vm5 }
  0x49   : > { %v4275_v38 = vunpack.i.l.s16 %v1376_v63  ;;  %v5495_v9 = vpack.c.bf16 %v403_v36, %v403_v36  ;;  %v1102_v25 = vadd.s32 4294967295, %v517_v46  ;;  %v345_v21 = vmul.f32 %v5103_v8, %v4830_v12 }
  0x4a   : > { %v5501_v43 = vrot.slane %v6940_v14, 7  ;;  %v917_v10 = vunpack.c.l.b16 %v434_v49  ;;  %v380_v0 = vadd.f32 %v5118_v23, %v344_v30  ;;  %v479_v32 = vadd.s32 96, %v5082_v3 }
  0x4b   : > { %vm1485_vm0 = vcmp.ne.s32.totalorder %v4275_v38, %v5107_v11  ;;  %v6944_v1 = vunpack.c.l.b16 %v5495_v9  ;;  %vm1134_vm1 = vcmp.ge.s32.totalorder %v1102_v25, 0  ;;  %v381_v63 = vadd.f32 %v5118_v23, %v345_v21  ;;  %v4754_v38 = vld [vmem:[%s6898_s3 + $0x98] sm:$0xff] }
  0x4c   : > { %v1064_v46 = vor.u32 %v6941_v15, %v5501_v43  ;;  %vm5513_vm2 = vmpackc.low %vm5152_vm4, %vm1485_vm0  ;;  %v7137_v12 = vmov 0  ;;  %v412_v49 = vmax.f32 %v380_v0, 0.0  ;;  %v587_v30 = vand.u32 15, %v479_v32  ;;  %2476 = vmatpush.bf16.msrb.mxu2 %v4754_v38 }
  0x4d   : > { %v7138_v12 = vsel %vm5513_vm2, 4294967295, %v7137_v12  ;;  %v4845_v53 = vunpack.c.l.bf16 %v4959_v50  ;;  %v5522_v21 = vpack.c.b16 %v6944_v1, %v917_v10  ;;  %vm1292_vm3 = vmpackc.low %vm1134_vm1, %vm1134_vm1  ;;  %v413_v36 = vmax.f32 %v381_v63, 0.0 }
  0x4e   : > { %7139 = vst [vmem:[#allocation33_spill] sm:$0xff] %v7138_v12  ;;  %v4846_v25 = vunpack.c.h.bf16 %v4959_v50  ;;  %v487_v14 = vadd.s32 160, %v5082_v3  ;;  %v5527_v15 = vsel %vm6977_vm5, %v5358_v40, %v1064_v46  ;;  %v7141_v0 = vmov 0  }
  0x4f   : > { %7140 = vst [vmem:[#allocation34_spill] sm:$0xff] %v5527_v15  ;;  %v1322_v32 = vsel %vm1292_vm3, 65537, %v7141_v0  ;;  %v5530_v28 = vpack.c.bf16 %v412_v49, %v412_v49  ;;  %v1112_v47 = vadd.s32 4294967295, %v587_v30  ;;  %v1514_v10 = vsel %vm5513_vm2, %v5527_v15, 0 }
  0x50   : > { %v6948_v1 = vshrl.u32 %v5522_v21, 16  ;;  %v6952_v50 = vshll.u32 %v5522_v21, 16  ;;  %v1352_v63 = vunpack.c.l.b16 %v1322_v32  ;;  %1654 = vmatmul.bf16.gmra.mxu3 %v1514_v10  ;;  %v5538_v22 = vpack.c.bf16 %v413_v36, %v413_v36  ;;  %v4762_v32 = vld [vmem:[%s6898_s3 + $0xd8] sm:$0xff]  ;;  %v4771_v36 = vld [vmem:[%s6898_s3 + $0x120] sm:$0xff] }
  0x51   : > { %7142 = vst [vmem:[#allocation35_spill] sm:$0xff] %v5530_v28  ;;  %vm1144_vm6 = vcmp.ge.s32.totalorder %v1112_v47, 0  ;;  %v352_v46 = vmul.f32 %v5103_v8, %v4845_v53  ;;  %v353_v38 = vmul.f32 %v5103_v8, %v4846_v25  ;;  %v643_v20 = vand.u32 15, %v487_v14  ;;  %2704 = vmatpush.bf16.msrb.mxu3 %v4762_v32  ;;  %2890 = vmatpush.bf16.msrb.mxu0 %v4771_v36 }
  0x52   : > { %7143 = vst [vmem:[#allocation36_spill] sm:$0xff] %v5538_v22  ;;  %v5544_v49 = vrot.slane %v6948_v1, 7  ;;  %v4251_v30 = vunpack.i.l.s16 %v1352_v63  ;;  %vm1302_vm8 = vmpackc.low %vm1144_vm6, %vm1144_vm6  ;;  %v7144_v47 = vmov 0  ;;  %v4861_v25 = vunpack.c.l.bf16 %v4963_v52  ;;  %v4746_v63 = vld [vmem:[%s6898_s3 + $0x58] sm:$0xff]  ;;  %v4753_v1 = vld [vmem:[%s6898_s3 + $0x90] sm:$0xff] }
  0x53   : > { %v7145_v47 = vsel %vm5555_vm10, 4294967295, %v7144_v47  ;;  %v1332_v10 = vsel %vm1302_vm8, 65537, %v7141_v0  ;;  %v388_v14 = vadd.f32 %v5118_v23, %v352_v46  ;;  %v389_v19 = vadd.f32 %v5118_v23, %v353_v38  ;;  %v4761_v46 = vld [vmem:[%s6898_s3 + $0xd0] sm:$0xff]  ;;  %1786 = vmatpush.bf16.msrb.mxu1 %v4746_v63  ;;  %2477 = vmatpush.bf16.msrb.mxu2 %v4753_v1 }
  0x54   : > { %7146 = vst [vmem:[#allocation37_spill] sm:$0xff] %v7145_v47  ;;  %v969_v40 = vor.u32 %v6952_v50, %v5544_v49  ;;  %vm1401_vm13 = vcmp.ne.s32.totalorder %v4251_v30, %v5107_v11  ;;  %v1362_v53 = vunpack.c.l.b16 %v1332_v10  ;;  %v7147_v18 = vmov 0  ;;  %v4770_v10 = vld [vmem:[%s6898_s3 + $0x118] sm:$0xff] }
  0x55   : > { %vm5578_vm0 = vmpackc.low %vm5152_vm4, %vm1401_vm13  ;;  %v7150_v41 = vunpack.c.l.b16 %v5530_v28  ;;  %v7151_v50 = vunpack.c.l.b16 %v5538_v22  ;;  %v420_v38 = vmax.f32 %v388_v14, 0.0  ;;  %v1120_v32 = vadd.s32 4294967295, %v643_v20  ;;  %v4951_v22 = vld [vmem:[%s5098_s8 + $0x8] sm:$0xff]   ;;  %2705 = vmatpush.bf16.msrb.mxu3 %v4761_v46  ;;  %2891 = vmatpush.bf16.msrb.mxu0 %v4770_v10 }
  0x56   : > { %v7148_v18 = vsel %vm5578_vm0, 4294967295, %v7147_v18  ;;  %v4862_v36 = vunpack.c.h.bf16 %v4963_v52  ;;  %v5596_v28 = vsel %vm5555_vm10, 0, %v969_v40  ;;  %v360_v14 = vmul.f32 %v5103_v8, %v4861_v25 }
  0x57   : > { %7149 = vst [vmem:[#allocation38_spill] sm:$0xff] %v7148_v18  ;;  %v5586_v30 = vpack.c.b16 %v7151_v50, %v7150_v41  ;;  %v4261_v41 = vunpack.i.l.s16 %v1362_v53  ;;  %v421_v50 = vmax.f32 %v389_v19, 0.0  ;;  %v1502_v20 = vsel %vm5578_vm0, %v5596_v28, 0  ;;  %1787 = vmatpush.bf16.msrb.mxu1 %v4745_v31 }
  0x58   : > { %v5604_v63 = vpack.c.bf16 %v420_v38, %v420_v38  ;;  %1594 = vmatmul.bf16.gmra.mxu0 %v1502_v20  ;;  %vm1152_vm3 = vcmp.ge.s32.totalorder %v1120_v32, 0  ;;  %v361_v19 = vmul.f32 %v5103_v8, %v4862_v36  ;;  %v396_v1 = vadd.f32 %v5118_v23, %v360_v14 }
  0x59   : > { %7152 = vst [vmem:[#allocation39_spill] sm:$0xff] %v5586_v30  ;;  %v6956_v52 = vshrl.u32 %v5586_v30, 16  ;;  %vm1436_vm1 = vcmp.ne.s32.totalorder %v4261_v41, %v5107_v11  ;;  %v5608_v40 = vpack.c.bf16 %v421_v50, %v421_v50  ;;  %v495_v38 = vadd.s32 224, %v5082_v3  ;;  %vm1310_vm6 = vmpackc.low %vm1152_vm3, %vm1152_vm3 }
  0x5a   : > { %7153 = vst [vmem:[#allocation40_spill] sm:$0xff] %v5604_v63  ;;  %v6961_v25 = vunpack.c.l.b16 %v5604_v63  ;;  %v397_v32 = vadd.f32 %v5118_v23, %v361_v19  ;;  %v4813_v50 = vunpack.c.l.bf16 %v4951_v22  ;;  %v4814_v36 = vunpack.c.h.bf16 %v4951_v22  ;;  %vm5627_vm8 = vmpackc.low %vm5152_vm4, %vm1436_vm1 }
  0x5b   : > { %7154 = vst [vmem:[#allocation41_spill] sm:$0xff] %v5608_v40  ;;  %v5613_v53 = vrot.slane %v6956_v52, 7  ;;  %v7155_v46 = vshll.u32 %v5586_v30, 16  ;;  %v7156_v14 = vmov 0  ;;  %v1340_v31 = vsel %vm1310_vm6, 65537, %v7141_v0 }
  0x5c   : > { %v7157_v14 = vsel %vm5627_vm8, 4294967295, %v7156_v14  ;;  %v428_v10 = vmax.f32 %v396_v1, 0.0  ;;  %v699_v20 = vand.u32 15, %v495_v38  ;;  %v7159_v22 = vunpack.c.l.b16 %v5608_v40  ;;  %v4744_v40 = vld [vmem:[%s6898_s3 + $0x48] sm:$0xff] }
  0x5d   : > { %v1008_v52 = vor.u32 %v7155_v46, %v5613_v53  ;;  %7158 = vst [vmem:[#allocation42_spill] sm:$0xff] %v7157_v14  ;;  %v1370_v47 = vunpack.c.l.b16 %v1340_v31  ;;  %v429_v46 = vmax.f32 %v397_v32, 0.0  ;;  %v336_v41 = vmul.f32 %v5103_v8, %v4813_v50  ;;  %1788 = vmatpush.bf16.msrb.mxu1 %v4744_v40 }
  0x5e   : > { %v5636_v19 = vpack.c.b16 %v7159_v22, %v6961_v25  ;;  %v5643_v56 = vpack.c.bf16 %v428_v10, %v428_v10  ;;  %v1128_v55 = vadd.s32 4294967295, %v699_v20  ;;  %v337_v1 = vmul.f32 %v5103_v8, %v4814_v36 }
  0x5f   : > { %v5641_v59 = vsel %vm6977_vm5, %v5421_v5, %v1008_v52  ;;  %v4269_v32 = vunpack.i.l.s16 %v1370_v47  ;;  %v5651_v50 = vpack.c.bf16 %v429_v46, %v429_v46  ;;  %v372_v52 = vadd.f32 %v5118_v23, %v336_v41 }
  0x60   : > { %7160 = vst [vmem:[#allocation43_spill] sm:$0xff] %v5643_v56  ;;  %v1507_v38 = vsel %vm5627_vm8, %v5641_v59, 0  ;;  %v6962_v22 = vshrl.u32 %v5636_v19, 16  ;;  %v6967_v31 = vshll.u32 %v5636_v19, 16  ;;  %vm1160_vm13 = vcmp.ge.s32.totalorder %v1128_v55, 0  ;;  %v4760_v55 = vld [vmem:[%s6898_s3 + $0xc8] sm:$0xff] }
  0x61   : > { %1619 = vmatmul.bf16.gmra.mxu1 %v1507_v38  ;;  %7161 = vst [vmem:[#allocation44_spill] sm:$0xff] %v5651_v50  ;;  %vm1464_vm1 = vcmp.ne.s32.totalorder %v4269_v32, %v5107_v11  ;;  %vm1318_vm3 = vmpackc.low %vm1160_vm13, %vm1160_vm13  ;;  %v373_v36 = vadd.f32 %v5118_v23, %v337_v1  ;;  %v471_v10 = vadd.s32 32, %v5082_v3  ;;  %v7162_v47 = vmov 0  ;;  %v4752_v32 = vld [vmem:[%s6898_s3 + $0x88] sm:$0xff]  ;;  %2706 = vmatpush.bf16.msrb.mxu3 %v4760_v55  ;;  %v4743_v55 = vld [vmem:[%s6898_s3 + $0x40] sm:$0xff] }
  0x62   : > { %v5657_v20 = vrot.slane %v6962_v22, 7  ;;  %vm5664_vm6 = vmpackc.low %vm5152_vm4, %vm1464_vm1  ;;  %v1348_v46 = vsel %vm1318_vm3, 65537, %v7141_v0  ;;  %v404_v41 = vmax.f32 %v372_v52, 0.0  ;;  %v481_v38 = vadd.s32 112, %v5082_v3  ;;  %v4769_v52 = vld [vmem:[%s6898_s3 + $0x110] sm:$0xff]  ;;  %2478 = vmatpush.bf16.msrb.mxu2 %v4752_v32  ;;  %1789 = vmatpush.bf16.msrb.mxu1 %v4743_v55 }
  0x63   : > { %v7163_v47 = vsel %vm5664_vm6, 4294967295, %v7162_v47  ;;  %v1378_v25 = vunpack.c.l.b16 %v1348_v46  ;;  %v405_v22 = vmax.f32 %v373_v36, 0.0  ;;  %v531_v5 = vand.u32 15, %v471_v10  ;;  %2892 = vmatpush.bf16.msrb.mxu0 %v4769_v52 }
  0x64   : > { %v1040_v1 = vor.u32 %v6967_v31, %v5657_v20  ;;  %v7164_v63 = vunpack.c.l.b16 %v5643_v56  ;;  %v7165_v12 = vunpack.c.l.b16 %v5651_v50  ;;  %v5692_v36 = vpack.c.bf16 %v404_v41, %v404_v41  ;;  %v4768_v41 = vld [vmem:[%s6898_s3 + $0x108] sm:$0xff] }
  0x65   : > { %v601_v10 = vand.u32 15, %v481_v38  ;;  %v6975_v46 = vshll.u32 %v5214_v39, 16  ;;  %v4277_v56 = vunpack.i.l.s16 %v1378_v25  ;;  %v5702_v4 = vpack.c.bf16 %v405_v22, %v405_v22 }
  0x66   : > { %v5690_v31 = vpack.c.b16 %v7165_v12, %v7164_v63  ;;  %v5700_v15 = vsel %vm6977_vm5, %v5456_v29, %v1040_v1  ;;  %v1104_v12 = vadd.s32 4294967295, %v531_v5  ;;  %v4759_v63 = vld [vmem:[%s6898_s3 + $0xc0] sm:$0xff]  ;;  %v4964_v5 = vld [vmem:[%s5098_s8 + $0x70] sm:$0xff]   ;;  %v489_v40 = vadd.s32 176, %v5082_v3  ;;  %2479 = vmatpush.bf16.msrb.mxu2 %v4751_v24 }
  0x67   : > { %v1511_v38 = vsel %vm5664_vm6, %v5700_v15, 0  ;;  %vm1492_vm13 = vcmp.ne.s32.totalorder %v4277_v56, %v5107_v11  ;;  %v6978_v32 = vunpack.c.l.b16 %v5702_v4  ;;  %v1016_v1 = vor.u32 %v6975_v46, %v5252_v62  ;;  %2707 = vmatpush.bf16.msrb.mxu3 %v4759_v63  ;;  %2893 = vmatpush.bf16.msrb.mxu0 %v4768_v41 }
  0x68   : > { %7166 = vst [vmem:[#allocation45_spill] sm:$0xff] %v5690_v31  ;;  %v6974_v29 = vshrl.u32 %v5690_v31, 16  ;;  %1639 = vmatmul.bf16.gmra.mxu2 %v1511_v38  ;;  %vm1136_vm1 = vcmp.ge.s32.totalorder %v1104_v12, 0  ;;  %v1114_v25 = vadd.s32 4294967295, %v601_v10  ;;  %v6981_v22 = vshll.u32 %v5328_v6, 16  ;;  %v4767_v10 = vld [vmem:[%s6898_s3 + $0x100] sm:$0xff] }
  0x69   : > { %v7167_v38 = vunpack.c.l.b16 %v5692_v36  ;;  %vm1294_vm3 = vmpackc.low %vm1136_vm1, %vm1136_vm1  ;;  %v5739_v62 = vsel %vm6977_vm5, %v5613_v53, %v1016_v1  ;;  %v4865_v12 = vunpack.c.l.bf16 %v4964_v5  ;;  %v7169_v24 = vshll.u32 %v5690_v31, 16 }
  0x6a   : > { %v5727_v52 = vrot.slane %v6974_v29, 7  ;;  %v4866_v29 = vunpack.c.h.bf16 %v4964_v5  ;;  %vm5751_vm1 = vmpackc.low %vm5152_vm4, %vm1492_vm13  ;;  %v1324_v53 = vsel %vm1294_vm3, 65537, %v7141_v0  ;;  %vm1146_vm14 = vcmp.ge.s32.totalorder %v1114_v25, 0 }
  0x6b   : > { %v5735_v50 = vpack.c.b16 %v6978_v32, %v7167_v38  ;;  %v7170_v38 = vmov 0  ;;  %v657_v63 = vand.u32 15, %v489_v40  ;;  %v1354_v1 = vunpack.c.l.b16 %v1324_v53  ;;  %vm1304_vm5 = vmpackc.low %vm1146_vm14, %vm1146_vm14  ;;  %2894 = vmatpush.bf16.msrb.mxu0 %v4767_v10 }
  0x6c   : > { %v1072_v46 = vor.u32 %v7169_v24, %v5727_v52  ;;  %v7171_v38 = vsel %vm5751_vm1, 4294967295, %v7170_v38  ;;  %v1048_v56 = vor.u32 %v6981_v22, %v5351_v37  ;;  %vm7173_vm13 = vsmask.f32 256 }
  0x6d   : > { %7168 = vst [vmem:[#allocation46_spill] sm:$0xff] %v5735_v50  ;;  %v6996_v41 = vshrl.u32 %v5735_v50, 16  ;;  %v1334_v32 = vsel %vm1304_vm5, 65537, %v7141_v0  ;;  %v1122_v31 = vadd.s32 4294967295, %v657_v63  ;;  %v362_v25 = vmul.f32 %v5103_v8, %v4865_v12  ;;  %vm7174_vm14 = vmmov %vm7173_vm13 }
  0x6e   : > { %7172 = vst [vmem:[#allocation47_spill] sm:$0xff] %v7171_v38  ;;  %v5763_v24 = vsel %vm7173_vm13, %v5501_v43, %v1072_v46  ;;  %v4253_v53 = vunpack.i.l.s16 %v1354_v1  ;;  %v1364_v5 = vunpack.c.l.b16 %v1334_v32  ;;  %v5774_v37 = vsel %vm7174_vm14, %v5657_v20, %v1048_v56 }
  0x6f   : > { %v1515_v55 = vsel %vm5751_vm1, %v5763_v24, 0  ;;  %v973_v40 = vrot.slane %v6996_v41, 7  ;;  %vm1154_vm3 = vcmp.ge.s32.totalorder %v1122_v31, 0  ;;  %v363_v43 = vmul.f32 %v5103_v8, %v4866_v29 }
  0x70   : > { %1659 = vmatmul.bf16.gmra.mxu3 %v1515_v55  ;;  %v398_v46 = vadd.f32 %v5118_v23, %v362_v25  ;;  %v7175_v12 = vshll.u32 %v5735_v50, 16  ;;  %vm1408_vm5 = vcmp.ne.s32.totalorder %v4253_v53, %v5107_v11  ;;  %v4263_v22 = vunpack.i.l.s16 %v1364_v5  ;;  %vm1312_vm13 = vmpackc.low %vm1154_vm3, %vm1154_vm3 }
  0x71   : > { %v497_v32 = vadd.s32 240, %v5082_v3  ;;  %vm5784_vm10 = vmpackc.low %vm5152_vm4, %vm1408_vm5  ;;  %v7176_v10 = vmov 0  ;;  %v1342_v31 = vsel %vm1312_vm13, 65537, %v7141_v0  ;;  %v399_v8 = vadd.f32 %v5118_v23, %v363_v43 }
  0x72   : > { %v976_v63 = vor.u32 %v7175_v12, %v973_v40  ;;  %v7177_v10 = vsel %vm5784_vm10, 4294967295, %v7176_v10  ;;  %v430_v20 = vmax.f32 %v398_v46, 0.0  ;;  %v473_v29 = vadd.s32 48, %v5082_v3 }
  0x73   : > { %7178 = vst [vmem:[#allocation48_spill] sm:$0xff] %v7177_v10  ;;  %vm1443_vm3 = vcmp.ne.s32.totalorder %v4263_v22, %v5107_v11  ;;  %v1372_v5 = vunpack.c.l.b16 %v1342_v31  ;;  %v713_v56 = vand.u32 15, %v497_v32  ;;  %v7179_v55 = vmov 0  ;;  %v4798_v32 = vld [vmem:[%s6898_s3 + $0x1f8] sm:$0xff] }
  0x74   : > { %v5793_v1 = vsel %vm7174_vm14, %v5544_v49, %v976_v63  ;;  %vm5801_vm5 = vmpackc.low %vm5152_vm4, %vm1443_vm3  ;;  %v431_v23 = vmax.f32 %v399_v8, 0.0  ;;  %v5805_v53 = vpack.c.bf16 %v430_v20, %v430_v20  ;;  %v545_v43 = vand.u32 15, %v473_v29  ;;  %v4790_v49 = vld [vmem:[%s6898_s3 + $0x1b8] sm:$0xff]  ;;  %3660 = vmatpush.bf16.msra.mxu3 %v4798_v32 }
  0x75   : > { %v1503_v25 = vsel %vm5784_vm10, %v5793_v1, 0  ;;  %v7180_v55 = vsel %vm5801_vm5, 4294967295, %v7179_v55  ;;  %v1508_v22 = vsel %vm5801_vm5, %v5739_v62, 0  ;;  %v4271_v46 = vunpack.i.l.s16 %v1372_v5  ;;  %v4782_v31 = vld [vmem:[%s6898_s3 + $0x178] sm:$0xff]  ;;  %3474 = vmatpush.bf16.msra.mxu2 %v4790_v49 }
  0x76   : > { %7181 = vst [vmem:[#allocation49_spill] sm:$0xff] %v7180_v55  ;;  %1599 = vmatmul.bf16.gmra.mxu0 %v1503_v25  ;;  %v1130_v12 = vadd.s32 4294967295, %v713_v56  ;;  %v6995_v63 = vshll.u32 %v5174_v13, 16  ;;  %v4806_v8 = vld [vmem:[%s6898_s3 + $0x238] sm:$0xff]  ;;  %1624 = vmatmul.bf16.gmra.mxu1 %v1508_v22  ;;  %v5823_v20 = vpack.c.bf16 %v431_v23, %v431_v23  ;;  %v6994_v29 = vunpack.c.l.b16 %v5805_v53 }
  0x77   : > { %7182 = vst [vmem:[#allocation50_spill] sm:$0xff] %v5805_v53  ;;  %v1106_v5 = vadd.s32 4294967295, %v545_v43  ;;  %v468_v56 = vadd.s32 8, %v5082_v3  ;;  %vm1471_vm13 = vcmp.ne.s32.totalorder %v4271_v46, %v5107_v11  ;;  %3095 = vmatpush.bf16.msra.mxu1 %v4782_v31  ;;  %v7184_v23 = vmov 0  ;;  %3861 = vmatpush.bf16.msra.mxu0 %v4806_v8 }
  0x78   : > { %7183 = vst [vmem:[#allocation51_spill] sm:$0xff] %v5823_v20  ;;  %vm1162_vm14 = vcmp.ge.s32.totalorder %v1130_v12, 0  ;;  %v984_v25 = vor.u32 %v6995_v63, %v5202_v33  ;;  %vm5833_vm1 = vmpackc.low %vm5152_vm4, %vm1471_vm13  ;;  %v6993_v43 = vunpack.c.l.b16 %v5823_v20  ;;  %v7187_v22 = vshll.u32 %v5522_v21, 16 }
  0x79   : > { %v7185_v23 = vsel %vm5833_vm1, 4294967295, %v7184_v23  ;;  %vm1138_vm2 = vcmp.ge.s32.totalorder %v1106_v5, 0  ;;  %v510_v49 = vand.u32 15, %v468_v56  ;;  %v1512_v33 = vsel %vm5833_vm1, %v5774_v37, 0  ;;  %vm1320_vm3 = vmpackc.low %vm1162_vm14, %vm1162_vm14 }
  0x7a   : > { %7186 = vst [vmem:[#allocation52_spill] sm:$0xff] %v7185_v23  ;;  %v5840_v46 = vrot.slane %v7187_v22, 1  ;;  %vm7188_vm15 = vsmask.f32 256  ;;  %vm1972_vm13 = vcmask 1047552   ;;  %1644 = vmatmul.bf16.gmra.mxu2 %v1512_v33  ;;  %v5852_v32 = vpack.c.b16 %v6993_v43, %v6994_v29  ;;  %vm1296_vm6 = vmpackc.low %vm1138_vm2, %vm1138_vm2 }
  0x7b   : > { %v5846_v12 = vsel %vm7188_vm15, %v973_v40, %v984_v25  ;;  %v1350_v31 = vsel %vm1320_vm3, 65537, %v7141_v0  ;;  %v1976_v8 = vadd.s32 1, %v510_v49  ;;  %vm5857_vm12 = vcmp.ne.s32.totalorder %v5129_v34, %v5107_v11 }
  0x7c   : > { %v503_v40 = vand.u32 15, %v5082_v3  ;;  %v1380_v56 = vunpack.c.l.b16 %v1350_v31  ;;  %v1326_v25 = vsel %vm1296_vm6, 65537, %v7141_v0  ;;  %vm7191_vm15 = vsmask.f32 7424 }
  0x7d   : > { %vm5864_vm14 = vmand %vm1972_vm13, %vm7191_vm15  ;;  %v7192_v22 = vmov 0  ;;  %v7195_v33 = vunpack.c.l.b16 %v5495_v9  ;;  %v7196_v49 = vunpack.c.l.b16 %v5692_v36  ;;  %v7197_v34 = vunpack.c.l.b16 %v5702_v4 }
  0x7e   : > { %v7193_v22 = vsel %vm5864_vm14, 4294967295, %v7192_v22  ;;  %v7198_v29 = vunpack.c.l.b16 %v5144_v54  ;;  %v7002_v41 = vshrl.u32 %v5852_v32, 16  ;;  %v7003_v31 = vshll.u32 %v5852_v32, 16 }
  0x7f   : > { %7194 = vst [vmem:[#allocation53_spill] sm:$0xff] %v7193_v22  ;;  %v3216_v43 = vpack.c.b16 %v7196_v49, %v7195_v33  ;;  %v1356_v20 = vunpack.c.l.b16 %v1326_v25  ;;  %v1974_v53 = vsel %vm5864_vm14, 0, %v5840_v46  ;;  %v4279_v38 = vunpack.i.l.s16 %v1380_v56 }
  0x80   : > { %v3217_v63 = vpack.c.b16 %v7198_v29, %v7197_v34  ;;  %vm2040_vm2 = vcmp.lt.s32.totalorder %v1976_v8, 16  ;;  %v1100_v9 = vadd.s32 4294967295, %v503_v40  ;;  %v5883_v36 = vrot.slane %v7002_v41, 7 }
  0x81   : > { %v4255_v4 = vunpack.i.l.s16 %v1356_v20  ;;  %vm2168_vm3 = vmpackc.low %vm2040_vm2, %vm2040_vm2  ;;  %v3234_v54 = vshrl.u32 %v3216_v43, 16  ;;  %v3237_v29 = vshll.u32 %v3216_v43, 16  ;;  %vm1499_vm13 = vcmp.ne.s32.totalorder %v4279_v38, %v5107_v11 }
  0x82   : > { %7199 = vst [vmem:[#allocation54_spill] sm:$0xff] %v5883_v36  ;;  %v2200_v25 = vsel %vm2168_vm3, 65537, %v7141_v0  ;;  %vm1132_vm15 = vcmp.ge.s32.totalorder %v1100_v9, 0  ;;  %v3242_v33 = vshrl.u32 %v3217_v63, 16  ;;  %v1080_v8 = vor.u32 %v7003_v31, %v5883_v36  ;;  %vm5892_vm6 = vmpackc.low %vm5152_vm4, %vm1499_vm13 }
  0x83   : > { %v7200_v40 = vmov 0  ;;  %vm1415_vm2 = vcmp.ne.s32.totalorder %v4255_v4, %v5107_v11  ;;  %v2232_v20 = vunpack.c.l.b16 %v2200_v25  ;;  %v3236_v43 = vrot.slane %v3234_v54, 3  ;;  %vm2605_vm13 = vmpackc.low %vm1132_vm15, %vm1132_vm15 }
  0x84   : > { %v7201_v40 = vsel %vm5892_vm6, 4294967295, %v7200_v40  ;;  %vm5899_vm14 = vmpackc.low %vm5152_vm4, %vm1415_vm2  ;;  %v7202_v38 = vmov 0  ;;  %v3239_v56 = vrot.slane %v3237_v29, 4  ;;  %v3244_v49 = vrot.slane %v3242_v33, 3 }
  0x85   : > { %v7203_v38 = vsel %vm5899_vm14, 4294967295, %v7202_v38  ;;  %v3245_v34 = vshll.u32 %v3217_v63, 16  ;;  %v470_v9 = vadd.s32 24, %v5082_v3  ;;  %vm7205_vm3 = vsmask.f32 256 }
  0x86   : > { %7204 = vst [vmem:[#allocation55_spill] sm:$0xff] %v7203_v38  ;;  %v5906_v41 = vsel %vm7205_vm3, %v5727_v52, %v1080_v8  ;;  %v1504_v4 = vsel %vm5899_vm14, %v5846_v12, 0  ;;  %v4362_v54 = vunpack.i.l.s16 %v2232_v20  ;;  %v7206_v25 = vshrl.u32 %v5522_v21, 16  ;;  %1790 = vmatmul.bf16.vlgmr.msrb.gmra.mxu1 %v7141_v0 }
  0x87   : > { %v1516_v63 = vsel %vm5892_vm6, %v5906_v41, 0  ;;  %v2607_v29 = vsel %vm2605_vm13, 65537, %v7141_v0  ;;  %v3240_v33 = vor.u32 %v3239_v56, %v3236_v43  ;;  %v3247_v22 = vrot.slane %v3245_v34, 4  ;;  %1604 = vmatmul.bf16.gmra.mxu0 %v1504_v4 }
  0x88   : > { %v1908_v31 = vor.u32 %v5840_v46, %v7206_v25  ;;  %1664 = vmatmul.bf16.gmra.mxu3 %v1516_v63  ;;  %vm2284_vm2 = vcmp.ne.s32.totalorder %v4362_v54, %v5112_v16  ;;  %v2609_v52 = vunpack.c.l.b16 %v2607_v29  ;;  %v524_v8 = vand.u32 15, %v470_v9 }
  0x89   : > { %v7207_v20 = vshll.u32 %v5735_v50, 16  ;;  %vm5923_vm15 = vmpackc.low %vm2284_vm2, %vm5857_vm12  ;;  %v7208_v46 = vmov 0  ;;  %v5927_v25 = vor.u32 %v3247_v22, %v3244_v49  ;;  %v472_v43 = vadd.s32 40, %v5082_v3 }
  0x8a   : > { %v7209_v46 = vsel %vm5923_vm15, 4294967295, %v7208_v46  ;;  %v4441_v56 = vunpack.i.l.s16 %v2609_v52  ;;  %vm7211_vm3 = vsmask.f32 7424  ;;  %v1978_v9 = vadd.s32 1, %v524_v8  ;;  %v4789_v8 = vld [vmem:[%s6898_s3 + $0x1b0] sm:$0xff] }
  0x8b   : > { %v1909_v36 = vrot.slane %v7207_v20, 1  ;;  %7210 = vst [vmem:[#allocation56_spill] sm:$0xff] %v5927_v25  ;;  %v2391_v4 = vsel %vm5923_vm15, %v1974_v53, 0  ;;  %vm7212_vm13 = vsmask.f32 4352  ;;  %v538_v49 = vand.u32 15, %v472_v43  ;;  %3475 = vmatpush.bf16.msra.mxu2 %v4789_v8 }
  0x8c   : > { %v5938_v54 = vsel %vm7212_vm13, %v3240_v33, %v5927_v25  ;;  %vm2616_vm2 = vcmp.ne.s32.totalorder %v4441_v56, %v5107_v11  ;;  %vm2042_vm6 = vcmp.lt.s32.totalorder %v1978_v9, 16  ;;  %2480 = vmatmul.bf16.vlgmr.msrb.gmra.mxu2 %v2391_v4  ;;  %v474_v20 = vadd.s32 56, %v5082_v3  ;;  %v4781_v43 = vld [vmem:[%s6898_s3 + $0x170] sm:$0xff] }
  0x8d   : > { %v5932_v34 = vsel %vm7211_vm3, %v1908_v31, %v1909_v36  ;;  %vm5946_vm3 = vmpackc.low %vm5152_vm4, %vm2616_vm2  ;;  %v1980_v33 = vadd.s32 1, %v538_v49  ;;  %v4805_v56 = vld [vmem:[%s6898_s3 + $0x230] sm:$0xff]  ;;  %3096 = vmatpush.bf16.msra.mxu1 %v4781_v43  ;;  %v2620_v8 = vsel %vm5578_vm0, %v5793_v1, 0  ;;  %v7230_v10 = vshll.u32 %v5389_v35, 16 }
  0x8e   : > { %vm2170_vm13 = vmpackc.low %vm2042_vm6, %vm2042_vm6  ;;  %v2619_v11 = vsel %vm5946_vm3, %v5596_v28, 0  ;;  %v4797_v28 = vld [vmem:[%s6898_s3 + $0x1f0] sm:$0xff]  ;;  %3862 = vmatpush.bf16.msra.mxu0 %v4805_v56  ;;  %v552_v49 = vand.u32 15, %v474_v20 }
  0x8f   : > { %v2202_v63 = vsel %vm2170_vm13, 65537, %v7141_v0  ;;  %vm2044_vm15 = vcmp.lt.s32.totalorder %v1980_v33, 16  ;;  %3661 = vmatpush.bf16.msra.mxu3 %v4797_v28  ;;  %v7220_v28 = vmov 0 }
  0x90   : > { %v2234_v29 = vunpack.c.l.b16 %v2202_v63  ;;  %vm2172_vm2 = vmpackc.low %vm2044_vm15, %vm2044_vm15 }
  0x91   : > { %v2204_v9 = vsel %vm2172_vm2, 65537, %v7141_v0 }
  0x92   : > { %v4364_v52 = vunpack.i.l.s16 %v2234_v29  ;;  %v2236_v63 = vunpack.c.l.b16 %v2204_v9  ;;  %v1982_v29 = vadd.s32 1, %v552_v49 }
  0x94   : > { %vm2291_vm4 = vcmp.ne.s32.totalorder %v4364_v52, %v5112_v16  ;;  %v4366_v33 = vunpack.i.l.s16 %v2236_v63  ;;  %v7217_v52 = vshrl.u32 %v5735_v50, 16  ;;  %vm2046_vm6 = vcmp.lt.s32.totalorder %v1982_v29, 16 }
  0x95   : > { %vm5960_vm1 = vmpackc.low %vm2291_vm4, %vm5857_vm12  ;;  %vm7219_vm4 = vsmask.f32 7424  ;;  %v7223_v63 = vshrl.u32 %v5174_v13, 16 }
  0x96   : > { %1795 = vmatmul.bf16.gmra.mxu1 %v5522_v21  ;;  %v2392_v4 = vsel %vm5960_vm1, %v5932_v34, 0  ;;  %vm2298_vm15 = vcmp.ne.s32.totalorder %v4366_v33, %v5112_v16  ;;  %vm2174_vm13 = vmpackc.low %vm2046_vm6, %vm2046_vm6  ;;  %v7224_v33 = vshll.u32 %v5180_v17, 16 }
  0x97   : > { %2895 = vmatmul.bf16.vlgmr.msrb.gmra.mxu0 %v5522_v21  ;;  %v7218_v21 = vshll.u32 %v5174_v13, 16  ;;  %vm5996_vm2 = vmpackc.low %vm2298_vm15, %vm5857_vm12  ;;  %v2206_v1 = vsel %vm2174_vm13, 65537, %v7141_v0 }
  0x98   : > { %2708 = vmatmul.bf16.vlgmr.msrb.gmra.mxu3 %v2619_v11  ;;  %v1911_v11 = vor.u32 %v1909_v36, %v7217_v52  ;;  %v7221_v28 = vsel %vm5996_vm2, 4294967295, %v7220_v28  ;;  %v476_v36 = vadd.s32 72, %v5082_v3  ;;  %v2238_v9 = vunpack.c.l.b16 %v2206_v1  ;;  %v4780_v1 = vld [vmem:[%s6898_s3 + $0x168] sm:$0xff] }
  0x99   : > { %v1912_v53 = vrot.slane %v7218_v21, 1  ;;  %7222 = vst [vmem:[#allocation57_spill] sm:$0xff] %v7221_v28  ;;  %v1915_v52 = vrot.slane %v7224_v33, 1  ;;  %3097 = vmatpush.bf16.msra.mxu1 %v4780_v1  ;;  %v480_v1 = vadd.s32 104, %v5082_v3 }
  0x9a   : > { %v566_v56 = vand.u32 15, %v476_v36  ;;  %v4368_v49 = vunpack.i.l.s16 %v2238_v9  ;;  %v478_v36 = vadd.s32 88, %v5082_v3 }
  0x9b   : > { %v5992_v20 = vsel %vm7219_vm4, %v1911_v11, %v1912_v53  ;;  %v1914_v29 = vor.u32 %v1912_v53, %v7223_v63  ;;  %v2621_v11 = vsel %vm5784_vm10, %v5846_v12, 0  ;;  %v4788_v53 = vld [vmem:[%s6898_s3 + $0x1a8] sm:$0xff] }
  0x9c   : > { %2485 = vmatmul.bf16.gmra.mxu2 %v2392_v4  ;;  %v2393_v43 = vsel %vm5996_vm2, %v5992_v20, 0  ;;  %v1984_v4 = vadd.s32 1, %v566_v56  ;;  %vm2305_vm15 = vcmp.ne.s32.totalorder %v4368_v49, %v5112_v16  ;;  %v4796_v12 = vld [vmem:[%s6898_s3 + $0x1e8] sm:$0xff]  ;;  %v580_v49 = vand.u32 15, %v478_v36 }
  0x9d   : > { %v6016_v21 = vsel %vm7219_vm4, %v1914_v29, %v1915_v52  ;;  %vm6020_vm2 = vmpackc.low %vm2305_vm15, %vm5857_vm12  ;;  %3476 = vmatpush.bf16.msra.mxu2 %v4788_v53  ;;  %3662 = vmatpush.bf16.msra.mxu3 %v4796_v12  ;;  %v1918_v53 = vrot.slane %v7230_v10, 1 }
  0x9e   : > { %vm2048_vm6 = vcmp.lt.s32.totalorder %v1984_v4, 16  ;;  %7225 = vst [vmem:[#allocation58_spill] sm:$0xff] %v6016_v21  ;;  %v2394_v9 = vsel %vm6020_vm2, %v6016_v21, 0  ;;  %v1986_v29 = vadd.s32 1, %v580_v49  ;;  %v7254_v21 = vshll.u32 %v5220_v42, 16 }
  0x9f   : > { %vm2176_vm13 = vmpackc.low %vm2048_vm6, %vm2048_vm6 }
  0xa0   : > { %v2208_v56 = vsel %vm2176_vm13, 65537, %v7141_v0  ;;  %vm2050_vm6 = vcmp.lt.s32.totalorder %v1986_v29, 16 }
  0xa1   : > { %v2240_v63 = vunpack.c.l.b16 %v2208_v56  ;;  %vm2178_vm13 = vmpackc.low %vm2050_vm6, %vm2050_vm6 }
  0xa3   : > { %v4370_v33 = vunpack.i.l.s16 %v2240_v63 }
  0xa5   : > { %vm2312_vm15 = vcmp.ne.s32.totalorder %v4370_v33, %v5112_v16 }
  0xa6   : > { %1800 = vmatmul.bf16.gmra.mxu1 %v5735_v50 }
  0xa7   : > { %2900 = vmatmul.bf16.gmra.mxu0 %v5735_v50 }
  0xa8   : > { %2713 = vmatmul.bf16.gmra.mxu3 %v2620_v8  ;;  %v7226_v8 = vmov 0  ;;  %v6043_v4 = vpop.f32.mrf.mxu1 }
  0xa9   : > { %v7227_v8 = vsel %vm6020_vm2, 4294967295, %v7226_v8  ;;  %vm6060_vm2 = vmpackc.low %vm2312_vm15, %vm5857_vm12 }
  0xaa   : > { %7228 = vst [vmem:[#allocation59_spill] sm:$0xff] %v7227_v8  ;;  %v2622_v8 = vsel %vm5899_vm14, %v5248_v61, 0  ;;  %v2210_v61 = vsel %vm2178_vm13, 65537, %v7141_v0 }
  0xab   : > { %v6073_v56 = vpop.f32.mrf.mxu0 }
  0xac   : > { %2490 = vmatmul.bf16.gmra.mxu2 %v2393_v43  ;;  %v4804_v43 = vld [vmem:[%s6898_s3 + $0x228] sm:$0xff] }
  0xad   : > { %3863 = vmatpush.bf16.msra.mxu0 %v4804_v43  ;;  %v2242_v43 = vunpack.c.l.b16 %v2210_v61 }
  0xaf   : > { %v4372_v29 = vunpack.i.l.s16 %v2242_v43 }
  0xb0   : > { %v6053_v12 = vpop.f32.mrf.mxu1 }
  0xb1   : > { %vm2319_vm15 = vcmp.ne.s32.totalorder %v4372_v29, %v5112_v16 }
  0xb2   : > { %v6064_v10 = vpop.f32.mrf.mxu2 }
  0xb3   : > { %v6089_v61 = vpop.f32.mrf.mxu0 }
  0xb6   : > { %1805 = vmatmul.bf16.gmra.mxu1 %v5174_v13 }
  0xb7   : > { %2905 = vmatmul.bf16.gmra.mxu0 %v5174_v13 }
  0xb8   : > { %2718 = vmatmul.bf16.gmra.mxu3 %v2621_v11  ;;  %v7229_v11 = vshrl.u32 %v5180_v17, 16 }
  0xba   : > { %v1917_v22 = vor.u32 %v1915_v52, %v7229_v11  ;;  %v7232_v52 = vmov 0  ;;  %v6079_v33 = vpop.f32.mrf.mxu2  ;;  %v7236_v11 = vshrl.u32 %v5389_v35, 16 }
  0xbb   : > { %v7233_v52 = vsel %vm6060_vm2, 4294967295, %v7232_v52 }
  0xbc   : > { %2495 = vmatmul.bf16.gmra.mxu2 %v2394_v9  ;;  %v6056_v36 = vsel %vm7219_vm4, %v1917_v22, %v1918_v53  ;;  %7234 = vst [vmem:[#allocation61_spill] sm:$0xff] %v7233_v52  ;;  %v1920_v38 = vor.u32 %v1918_v53, %v7236_v11  ;;  %v7239_v53 = vmov 0 }
  0xbd   : > { %7231 = vst [vmem:[#allocation60_spill] sm:$0xff] %v6056_v36  ;;  %v2395_v22 = vsel %vm6060_vm2, %v6056_v36, 0  ;;  %vm6096_vm2 = vmpackc.low %vm2319_vm15, %vm5857_vm12 }
  0xbe   : > { %v6075_v9 = vpop.f32.mrf.mxu3  ;;  %v7240_v53 = vsel %vm6096_vm2, 4294967295, %v7239_v53 }
  0xbf   : > { %7235 = vst [vmem:[#allocation62_spill] sm:$0xff] %v6075_v9  ;;  %v6077_v49 = vpop.f32.mrf.mxu1  ;;  %v4803_v9 = vld [vmem:[%s6898_s3 + $0x220] sm:$0xff] }
  0xc0   : > { %7241 = vst [vmem:[#allocation64_spill] sm:$0xff] %v7240_v53  ;;  %3864 = vmatpush.bf16.msra.mxu0 %v4803_v9 }
  0xc6   : > { %1810 = vmatmul.bf16.gmra.mxu1 %v5180_v17 }
  0xc7   : > { %2910 = vmatmul.bf16.gmra.mxu0 %v5180_v17  ;;  %v7237_v17 = vshll.u32 %v5586_v30, 16  ;;  %v6107_v43 = vpop.f32.mrf.mxu1 }
  0xc8   : > { %2723 = vmatmul.bf16.gmra.mxu3 %v2622_v8  ;;  %v594_v8 = vand.u32 15, %v480_v1  ;;  %v2623_v1 = vsel %vm5234_vm9, %v5447_v51, 0  ;;  %v482_v51 = vadd.s32 120, %v5082_v3 }
  0xc9   : > { %v1921_v52 = vrot.slane %v7237_v17, 1  ;;  %v4787_v17 = vld [vmem:[%s6898_s3 + $0x1a0] sm:$0xff] }
  0xca   : > { %v1988_v63 = vadd.s32 1, %v594_v8  ;;  %v6105_v8 = vpop.f32.mrf.mxu3  ;;  %3477 = vmatpush.bf16.msra.mxu2 %v4787_v17 }
  0xcb   : > { %7242 = vst [vmem:[#allocation65_spill] sm:$0xff] %v6105_v8  ;;  %v608_v8 = vand.u32 15, %v482_v51  ;;  %v7245_v51 = vshll.u32 %v5214_v39, 16 }
  0xcc   : > { %2500 = vmatmul.bf16.gmra.mxu2 %v2395_v22  ;;  %vm2052_vm6 = vcmp.lt.s32.totalorder %v1988_v63, 16  ;;  %v6092_v22 = vsel %vm7219_vm4, %v1920_v38, %v1921_v52  ;;  %v4795_v38 = vld [vmem:[%s6898_s3 + $0x1e0] sm:$0xff] }
  0xcd   : > { %vm2180_vm13 = vmpackc.low %vm2052_vm6, %vm2052_vm6  ;;  %7238 = vst [vmem:[#allocation63_spill] sm:$0xff] %v6092_v22  ;;  %v4779_v63 = vld [vmem:[%s6898_s3 + $0x160] sm:$0xff]  ;;  %v2396_v11 = vsel %vm6096_vm2, %v6092_v22, 0  ;;  %3663 = vmatpush.bf16.msra.mxu3 %v4795_v38  ;;  %v1990_v36 = vadd.s32 1, %v608_v8  ;;  %v7244_v38 = vshrl.u32 %v5586_v30, 16 }
  0xce   : > { %v2212_v29 = vsel %vm2180_vm13, 65537, %v7141_v0  ;;  %3098 = vmatpush.bf16.msra.mxu1 %v4779_v63 }
  0xcf   : > { %v2244_v48 = vunpack.c.l.b16 %v2212_v29  ;;  %v1923_v63 = vor.u32 %v1921_v52, %v7244_v38  ;;  %v1924_v29 = vrot.slane %v7245_v51, 1  ;;  %vm2054_vm6 = vcmp.lt.s32.totalorder %v1990_v36, 16 }
  0xd0   : > { %vm2182_vm13 = vmpackc.low %vm2054_vm6, %vm2054_vm6  ;;  %v7248_v52 = vmov 0  ;;  %v484_v36 = vadd.s32 136, %v5082_v3 }
  0xd1   : > { %v6142_v9 = vsel %vm7219_vm4, %v1923_v63, %v1924_v29 }
  0xd2   : > { %7247 = vst [vmem:[#allocation68_spill] sm:$0xff] %v6142_v9  ;;  %v622_v38 = vand.u32 15, %v484_v36  ;;  %v2625_v36 = vsel %vm5627_vm8, %v5739_v62, 0  ;;  %v4786_v62 = vld [vmem:[%s6898_s3 + $0x198] sm:$0xff] }
  0xd3   : > { %v6127_v17 = vpop.f32.mrf.mxu3  ;;  %3478 = vmatpush.bf16.msra.mxu2 %v4786_v62 }
  0xd4   : > { %7243 = vst [vmem:[#allocation66_spill] sm:$0xff] %v6127_v17  ;;  %v1992_v17 = vadd.s32 1, %v622_v38 }
  0xd5   : > { %v6125_v13 = vpop.f32.mrf.mxu0 }
  0xd6   : > { %1815 = vmatmul.bf16.gmra.mxu1 %v5389_v35  ;;  %vm2056_vm6 = vcmp.lt.s32.totalorder %v1992_v17, 16  ;;  %v4794_v17 = vld [vmem:[%s6898_s3 + $0x1d8] sm:$0xff] }
  0xd7   : > { %2915 = vmatmul.bf16.gmra.mxu0 %v5389_v35  ;;  %v4374_v35 = vunpack.i.l.s16 %v2244_v48  ;;  %3664 = vmatpush.bf16.msra.mxu3 %v4794_v17 }
  0xd8   : > { %2728 = vmatmul.bf16.gmra.mxu3 %v2623_v1  ;;  %v6120_v1 = vpop.f32.mrf.mxu2 }
  0xd9   : > { %vm2326_vm15 = vcmp.ne.s32.totalorder %v4374_v35, %v5112_v16 }
  0xda   : > { %vm6146_vm2 = vmpackc.low %vm2326_vm15, %vm5857_vm12 }
  0xdb   : > { %v7249_v52 = vsel %vm6146_vm2, 4294967295, %v7248_v52  ;;  %v2397_v35 = vsel %vm6146_vm2, %v6142_v9, 0  ;;  %v6159_v63 = vpop.f32.mrf.mxu3 }
  0xdc   : > { %2505 = vmatmul.bf16.gmra.mxu2 %v2396_v11  ;;  %v2624_v11 = vsel %vm5439_vm7, %v5641_v59, 0  ;;  %7250 = vst [vmem:[#allocation69_spill] sm:$0xff] %v7249_v52  ;;  %v2214_v59 = vsel %vm2182_vm13, 65537, %v7141_v0  ;;  %v1927_v52 = vrot.slane %v7254_v21, 1  ;;  %vm2184_vm13 = vmpackc.low %vm2056_vm6, %vm2056_vm6  ;;  %v7258_v21 = vmov 0 }
  0xdd   : > { %v6157_v8 = vpop.f32.mrf.mxu0  ;;  %7251 = vst [vmem:[#allocation70_spill] sm:$0xff] %v6159_v63 }
  0xde   : > { %v6129_v53 = vpop.f32.mrf.mxu1 }
  0xe0   : > { %v6139_v48 = vpop.f32.mrf.mxu2 }
  0xe1   : > { %7246 = vst [vmem:[#allocation67_spill] sm:$0xff] %v6139_v48 }
  0xe6   : > { %1820 = vmatmul.bf16.gmra.mxu1 %v5586_v30  ;;  %v6161_v51 = vpop.f32.mrf.mxu1 }
  0xe7   : > { %2920 = vmatmul.bf16.gmra.mxu0 %v5586_v30  ;;  %v7253_v30 = vshrl.u32 %v5214_v39, 16 }
  0xe8   : > { %2733 = vmatmul.bf16.gmra.mxu3 %v2624_v11  ;;  %v2246_v11 = vunpack.c.l.b16 %v2214_v59 }
  0xe9   : > { %v1926_v28 = vor.u32 %v1924_v29, %v7253_v30 }
  0xea   : > { %v4376_v22 = vunpack.i.l.s16 %v2246_v11  ;;  %v4778_v11 = vld [vmem:[%s6898_s3 + $0x158] sm:$0xff] }
  0xeb   : > { %v6163_v27 = vpop.f32.mrf.mxu2  ;;  %v6182_v30 = vsel %vm7219_vm4, %v1926_v28, %v1927_v52  ;;  %v2216_v28 = vsel %vm2184_vm13, 65537, %v7141_v0  ;;  %3099 = vmatpush.bf16.msra.mxu1 %v4778_v11  ;;  %v7264_v11 = vshll.u32 %v5430_v7, 16 }
  0xec   : > { %2510 = vmatmul.bf16.gmra.mxu2 %v2397_v35  ;;  %7252 = vst [vmem:[#allocation71_spill] sm:$0xff] %v6163_v27  ;;  %vm2333_vm15 = vcmp.ne.s32.totalorder %v4376_v22, %v5112_v16  ;;  %v486_v22 = vadd.s32 152, %v5082_v3  ;;  %v2248_v14 = vunpack.c.l.b16 %v2216_v28  ;;  %v7263_v28 = vshrl.u32 %v5220_v42, 16 }
  0xed   : > { %7257 = vst [vmem:[#allocation74_spill] sm:$0xff] %v6182_v30  ;;  %vm6186_vm2 = vmpackc.low %vm2333_vm15, %vm5857_vm12 }
  0xee   : > { %v7259_v21 = vsel %vm6186_vm2, 4294967295, %v7258_v21  ;;  %v2398_v29 = vsel %vm6186_vm2, %v6182_v30, 0  ;;  %v4378_v9 = vunpack.i.l.s16 %v2248_v14 }
  0xef   : > { %7260 = vst [vmem:[#allocation75_spill] sm:$0xff] %v7259_v21 }
  0xf0   : > { %vm2340_vm15 = vcmp.ne.s32.totalorder %v4378_v9, %v5112_v16 }
  0xf1   : > { %vm6239_vm2 = vmpackc.low %vm2340_vm15, %vm5857_vm12 }
  0xf3   : > { %v6173_v63 = vpop.f32.mrf.mxu0  ;;  %v6175_v59 = vpop.f32.mrf.mxu3 }
  0xf4   : > { %7255 = vst [vmem:[#allocation72_spill] sm:$0xff] %v6175_v59  ;;  %v6177_v35 = vpop.f32.mrf.mxu1  ;;  %v6179_v38 = vpop.f32.mrf.mxu2 }
  0xf5   : > { %7256 = vst [vmem:[#allocation73_spill] sm:$0xff] %v6179_v38  ;;  %v1930_v38 = vrot.slane %v7264_v11, 1 }
  0xf6   : > { %1825 = vmatmul.bf16.gmra.mxu1 %v5214_v39 }
  0xf7   : > { %2925 = vmatmul.bf16.gmra.mxu0 %v5214_v39  ;;  %v4802_v39 = vld [vmem:[%s6898_s3 + $0x218] sm:$0xff] }
  0xf8   : > { %2738 = vmatmul.bf16.gmra.mxu3 %v2625_v36  ;;  %v636_v36 = vand.u32 15, %v486_v22  ;;  %3865 = vmatpush.bf16.msra.mxu0 %v4802_v39  ;;  %v6220_v22 = vld [vmem:[%s6899_s4] ss:$0 sm:$0xff]  ;;  %v2626_v39 = vsel %vm5801_vm5, %v5304_v60, 0  ;;  %v488_v60 = vadd.s32 168, %v5082_v3 }
  0xf9   : > { %v1670_v14 = vadd.f32 %v6220_v22, %v6073_v56  ;;  %v1687_v31 = vadd.f32 %v6220_v22, %v6079_v33 }
  0xfa   : > { %v1994_v21 = vadd.s32 1, %v636_v36 }
  0xfb   : > { %v6206_v59 = vpop.f32.mrf.mxu0  ;;  %v6213_v30 = vpop.f32.mrf.mxu3 }
  0xfc   : > { %2515 = vmatmul.bf16.gmra.mxu2 %v2398_v29  ;;  %v6211_v62 = vpop.f32.mrf.mxu1  ;;  %7261 = vst [vmem:[#allocation76_spill] sm:$0xff] %v6213_v30  ;;  %v1929_v29 = vor.u32 %v1927_v52, %v7263_v28  ;;  %vm2058_vm6 = vcmp.lt.s32.totalorder %v1994_v21, 16  ;;  %v7265_v21 = vmov 0 }
  0xfd   : > { %v6215_v17 = vpop.f32.mrf.mxu2  ;;  %vm2186_vm13 = vmpackc.low %vm2058_vm6, %vm2058_vm6  ;;  %v7266_v21 = vsel %vm6239_vm2, 4294967295, %v7265_v21 }
  0xfe   : > { %7262 = vst [vmem:[#allocation77_spill] sm:$0xff] %v6215_v17  ;;  %v6235_v52 = vsel %vm7219_vm4, %v1929_v29, %v1930_v38  ;;  %v2218_v9 = vsel %vm2186_vm13, 65537, %v7141_v0  ;;  %v650_v29 = vand.u32 15, %v488_v60  ;;  %v2627_v60 = vsel %vm5285_vm11, %v5480_v2, 0 }
  0xff   : > { %7267 = vst [vmem:[#allocation78_spill] sm:$0xff] %v7266_v21  ;;  %v2399_v28 = vsel %vm6239_vm2, %v6235_v52, 0  ;;  %v2250_v11 = vunpack.c.l.b16 %v2218_v9  ;;  %v1671_v9 = vadd.f32 %v6220_v22, %v6089_v61  ;;  %v7272_v2 = vmov 0  ;;  %v4785_v61 = vld [vmem:[%s6898_s3 + $0x190] sm:$0xff] }
 0x100   : > { %v1996_v55 = vadd.s32 1, %v650_v29  ;;  %3479 = vmatpush.bf16.msra.mxu2 %v4785_v61 }
 0x101   : > { %v4380_v48 = vunpack.i.l.s16 %v2250_v11 }
 0x102   : > { %vm2060_vm6 = vcmp.lt.s32.totalorder %v1996_v55, 16 }
 0x103   : > { %vm2347_vm15 = vcmp.ne.s32.totalorder %v4380_v48, %v5112_v16  ;;  %vm2188_vm13 = vmpackc.low %vm2060_vm6, %vm2060_vm6 }
 0x104   : > { %v6232_v36 = vpop.f32.mrf.mxu0  ;;  %v1791_v30 = vpop.f32.mrf.mxu1  ;;  %vm6275_vm11 = vmpackc.low %vm2347_vm15, %vm5857_vm12  ;;  %v2220_v29 = vsel %vm2188_vm13, 65537, %v7141_v0  ;;  %vm7278_vm15 = vnez %v7134_v26 }
 0x105   : > { %v1871_v17 = vadd.f32 %v1791_v30, %v1670_v14  ;;  %v6245_v56 = vpop.f32.mrf.mxu2  ;;  %v7273_v2 = vsel %vm6275_vm11, 4294967295, %v7272_v2 }
 0x106   : > { %7268 = vst [vmem:[#allocation79_spill] sm:$0xff] %v6245_v56  ;;  %1830 = vmatmul.bf16.gmra.mxu1 %v5220_v42 }
 0x107   : > { %2930 = vmatmul.bf16.gmra.mxu0 %v5220_v42  ;;  %v7270_v42 = vshrl.u32 %v5430_v7, 16  ;;  %7274 = vst [vmem:[#allocation81_spill] sm:$0xff] %v7273_v2 }
 0x108   : > { %2743 = vmatmul.bf16.gmra.mxu3 %v2626_v39 }
 0x109   : > { %v1932_v25 = vor.u32 %v1930_v38, %v7270_v42 }
 0x10b   : > { %v6249_v30 = vpop.f32.mrf.mxu3 }
 0x10c   : > { %7269 = vst [vmem:[#allocation80_spill] sm:$0xff] %v6249_v30  ;;  %v6254_v39 = vpop.f32.mrf.mxu0  ;;  %2520 = vmatmul.bf16.gmra.mxu2 %v2399_v28  ;;  %v1793_v14 = vpop.f32.mrf.mxu1  ;;  %v7271_v30 = vshll.u32 %v5636_v19, 16 }
 0x10d   : > { %v1872_v42 = vadd.f32 %v1793_v14, %v1671_v9  ;;  %v4777_v9 = vld [vmem:[%s6898_s3 + $0x150] sm:$0xff] }
 0x10e   : > { %v1933_v50 = vrot.slane %v7271_v30, 1  ;;  %3100 = vmatpush.bf16.msra.mxu1 %v4777_v9 }
 0x10f   : > { %v2481_v27 = vpop.f32.mrf.mxu2 }
 0x110   : > { %v2561_v56 = vadd.f32 %v2481_v27, %v1871_v17  ;;  %v1672_v27 = vadd.f32 %v6220_v22, %v6125_v13  ;;  %v6271_v55 = vsel %vm7219_vm4, %v1932_v25, %v1933_v50  ;;  %v490_v13 = vadd.s32 184, %v5082_v3  ;;  %v4793_v25 = vld [vmem:[%s6898_s3 + $0x1d0] sm:$0xff] }
 0x111   : > { %v2400_v14 = vsel %vm6275_vm11, %v6271_v55, 0  ;;  %3665 = vmatpush.bf16.msra.mxu3 %v4793_v25  ;;  %vm7280_vm11 = vsmask.f32 7424 }
 0x113   : > { %v6256_v18 = vpop.f32.mrf.mxu3 }
 0x114   : > { %v2896_v17 = vpop.f32.mrf.mxu0  ;;  %v1796_v28 = vpop.f32.mrf.mxu1 }
 0x115   : > { %v1873_v38 = vadd.f32 %v1796_v28, %v1672_v27  ;;  %v664_v27 = vand.u32 15, %v490_v13  ;;  %v2252_v28 = vunpack.c.l.b16 %v2220_v29  ;;  %v7276_v13 = vshrl.u32 %v5636_v19, 16 }
 0x116   : > { %1835 = vmatmul.bf16.gmra.mxu1 %v5430_v7 }
 0x117   : > { %2935 = vmatmul.bf16.gmra.mxu0 %v5430_v7  ;;  %v2483_v48 = vpop.f32.mrf.mxu2  ;;  %v1998_v2 = vadd.s32 1, %v664_v27  ;;  %v1935_v29 = vor.u32 %v1933_v50, %v7276_v13 }
 0x118   : > { %2748 = vmatmul.bf16.gmra.mxu3 %v2627_v60  ;;  %v2562_v30 = vadd.f32 %v2483_v48, %v1872_v42  ;;  %v4801_v42 = vld [vmem:[%s6898_s3 + $0x210] sm:$0xff] }
 0x119   : > { %3866 = vmatpush.bf16.msra.mxu0 %v4801_v42  ;;  %vm2062_vm6 = vcmp.lt.s32.totalorder %v1998_v2, 16 }
 0x11a   : > { %vm2190_vm4 = vmpackc.low %vm2062_vm6, %vm2062_vm6  ;;  %vm7286_vm6 = vnez %v7163_v47 }
 0x11b   : > { %v2709_v11 = vpop.f32.mrf.mxu3 }
 0x11c   : > { %v2789_v60 = vadd.f32 %v2709_v11, %v2561_v56  ;;  %v2898_v45 = vpop.f32.mrf.mxu0  ;;  %2525 = vmatmul.bf16.gmra.mxu2 %v2400_v14  ;;  %v1798_v48 = vpop.f32.mrf.mxu1  ;;  %v4382_v56 = vunpack.i.l.s16 %v2252_v28  ;;  %v7277_v14 = vshll.u32 %v5328_v6, 16 }
 0x11e   : > { %v6298_v61 = vadd.f32 %v2896_v17, %v2789_v60  ;;  %v1936_v9 = vrot.slane %v7277_v14, 1  ;;  %v2628_v17 = vsel %vm7278_vm15, %v5700_v15, 0  ;;  %vm2354_vm13 = vcmp.ne.s32.totalorder %v4382_v56, %v5112_v16 }
 0x11f   : > { %v2486_v25 = vpop.f32.mrf.mxu2  ;;  %v1673_v60 = vadd.f32 %v6220_v22, %v6157_v8  ;;  %vm6319_vm15 = vmpackc.low %vm2354_vm13, %vm5857_vm12  ;;  %v7281_v15 = vmov 0  ;;  %v492_v8 = vadd.s32 200, %v5082_v3 }
 0x120   : > { %7275 = vst [vmem:[#allocation82_spill] sm:$0xff] %v6298_v61  ;;  %v2563_v11 = vadd.f32 %v2486_v25, %v1873_v38  ;;  %v1674_v38 = vadd.f32 %v6220_v22, %v6173_v63  ;;  %v6315_v28 = vsel %vm7280_vm11, %v1935_v29, %v1936_v9  ;;  %v7282_v15 = vsel %vm6319_vm15, 4294967295, %v7281_v15 }
 0x121   : > { %v1874_v27 = vadd.f32 %v1798_v48, %v1673_v60  ;;  %7283 = vst [vmem:[#allocation84_spill] sm:$0xff] %v7282_v15  ;;  %v2401_v48 = vsel %vm6319_vm15, %v6315_v28, 0  ;;  %v678_v56 = vand.u32 15, %v492_v8  ;;  %v1675_v29 = vadd.f32 %v6220_v22, %v6206_v59 }
 0x122   : > { %v7284_v15 = vshrl.u32 %v5328_v6, 16  ;;  %v7285_v8 = vshll.u32 %v5338_v58, 16  ;;  %v2629_v59 = vsel %vm7286_vm6, %v5774_v37, 0  ;;  %vm7287_vm15 = vsmask.f32 7424  ;;  %v4784_v37 = vld [vmem:[%s6898_s3 + $0x188] sm:$0xff] }
 0x123   : > { %v2711_v7 = vpop.f32.mrf.mxu3  ;;  %3480 = vmatpush.bf16.msra.mxu2 %v4784_v37 }
 0x124   : > { %v2790_v21 = vadd.f32 %v2711_v7, %v2562_v30  ;;  %v2901_v7 = vpop.f32.mrf.mxu0  ;;  %v1801_v50 = vpop.f32.mrf.mxu1 }
 0x125   : > { %v1875_v2 = vadd.f32 %v1801_v50, %v1674_v38  ;;  %v2000_v50 = vadd.s32 1, %v678_v56 }
 0x126   : > { %v6312_v30 = vadd.f32 %v2898_v45, %v2790_v21  ;;  %1840 = vmatmul.bf16.gmra.mxu1 %v5636_v19  ;;  %v2222_v21 = vsel %vm2190_vm4, 65537, %v7141_v0 }
 0x127   : > { %2940 = vmatmul.bf16.gmra.mxu0 %v5636_v19  ;;  %v2488_v45 = vpop.f32.mrf.mxu2  ;;  %v2254_v13 = vunpack.c.l.b16 %v2222_v21  ;;  %v1939_v21 = vrot.slane %v7285_v8, 1  ;;  %vm2064_vm11 = vcmp.lt.s32.totalorder %v2000_v50, 16 }
 0x128   : > { %7279 = vst [vmem:[#allocation83_spill] sm:$0xff] %v6312_v30  ;;  %2753 = vmatmul.bf16.gmra.mxu3 %v2628_v17  ;;  %v2564_v63 = vadd.f32 %v2488_v45, %v1874_v27  ;;  %vm2192_vm4 = vmpackc.low %vm2064_vm11, %vm2064_vm11  ;;  %vm7294_vm11 = vnez %v7185_v23  ;;  %v7300_v23 = vshrl.u32 %v5486_v44, 16 }
 0x129   : > { %v4384_v45 = vunpack.i.l.s16 %v2254_v13  ;;  %v2224_v56 = vsel %vm2192_vm4, 65537, %v7141_v0 }
 0x12b   : > { %v2714_v42 = vpop.f32.mrf.mxu3  ;;  %vm2361_vm13 = vcmp.ne.s32.totalorder %v4384_v45, %v5112_v16 }
 0x12c   : > { %v2791_v25 = vadd.f32 %v2714_v42, %v2563_v11  ;;  %v2903_v14 = vpop.f32.mrf.mxu0  ;;  %2530 = vmatmul.bf16.gmra.mxu2 %v2401_v48  ;;  %v1803_v60 = vpop.f32.mrf.mxu1  ;;  %v1938_v11 = vor.u32 %v1936_v9, %v7284_v15  ;;  %vm6351_vm2 = vmpackc.low %vm2361_vm13, %vm5857_vm12  ;;  %v4792_v48 = vld [vmem:[%s6898_s3 + $0x1c8] sm:$0xff] }
 0x12d   : > { %v1876_v38 = vadd.f32 %v1803_v60, %v1675_v29  ;;  %3666 = vmatpush.bf16.msra.mxu3 %v4792_v48  ;;  %v4776_v60 = vld [vmem:[%s6898_s3 + $0x148] sm:$0xff] }
 0x12e   : > { %v6332_v17 = vadd.f32 %v2901_v7, %v2791_v25  ;;  %v1676_v7 = vadd.f32 %v6220_v22, %v6232_v36  ;;  %v6347_v15 = vsel %vm7287_vm15, %v1938_v11, %v1939_v21  ;;  %v494_v36 = vadd.s32 216, %v5082_v3  ;;  %3101 = vmatpush.bf16.msra.mxu1 %v4776_v60  ;;  %v4800_v11 = vld [vmem:[%s6898_s3 + $0x208] sm:$0xff]  ;;  %v7293_v60 = vld [vmem:[#allocation25_spill] sm:$0xff] }
 0x12f   : > { %v2491_v27 = vpop.f32.mrf.mxu2  ;;  %v2402_v29 = vsel %vm6351_vm2, %v6347_v15, 0  ;;  %3867 = vmatpush.bf16.msra.mxu0 %v4800_v11  ;;  %v496_v11 = vadd.s32 232, %v5082_v3 }
 0x130   : > { %v2565_v30 = vadd.f32 %v2491_v27, %v1875_v2  ;;  %v692_v50 = vand.u32 15, %v494_v36  ;;  %v2256_v27 = vunpack.c.l.b16 %v2224_v56 }
 0x132   : > { %v4386_v37 = vunpack.i.l.s16 %v2256_v27 }
 0x133   : > { %v2716_v26 = vpop.f32.mrf.mxu3 }
 0x134   : > { %v2792_v61 = vadd.f32 %v2716_v26, %v2564_v63  ;;  %v2906_v42 = vpop.f32.mrf.mxu0  ;;  %v1806_v26 = vpop.f32.mrf.mxu1  ;;  %v7288_v63 = vmov 0  ;;  %vm2368_vm13 = vcmp.ne.s32.totalorder %v4386_v37, %v5112_v16 }
 0x135   : > { %v1877_v9 = vadd.f32 %v1806_v26, %v1676_v7  ;;  %v7289_v63 = vsel %vm6351_vm2, 4294967295, %v7288_v63  ;;  %v2002_v7 = vadd.s32 1, %v692_v50  ;;  %vm7296_vm2 = vsmask.f32 7424  ;;  %vm6395_vm6 = vmpackc.low %vm2368_vm13, %vm5857_vm12 }
 0x136   : > { %v6344_v2 = vadd.f32 %v2903_v14, %v2792_v61  ;;  %7290 = vst [vmem:[#allocation85_spill] sm:$0xff] %v7289_v63  ;;  %1845 = vmatmul.bf16.gmra.mxu1 %v5328_v6 }
 0x137   : > { %2945 = vmatmul.bf16.gmra.mxu0 %v5328_v6  ;;  %v2493_v61 = vpop.f32.mrf.mxu2  ;;  %vm2066_vm15 = vcmp.lt.s32.totalorder %v2002_v7, 16 }
 0x138   : > { %2758 = vmatmul.bf16.gmra.mxu3 %v2629_v59  ;;  %v2566_v25 = vadd.f32 %v2493_v61, %v1876_v38  ;;  %v1677_v38 = vadd.f32 %v6220_v22, %v6254_v39  ;;  %v7291_v39 = vshrl.u32 %v5338_v58, 16  ;;  %vm2194_vm4 = vmpackc.low %vm2066_vm15, %vm2066_vm15 }
 0x13a   : > { %v1941_v56 = vor.u32 %v1939_v21, %v7291_v39 }
 0x13b   : > { %v2719_v13 = vpop.f32.mrf.mxu3 }
 0x13c   : > { %v2793_v14 = vadd.f32 %v2719_v13, %v2565_v30  ;;  %v2908_v45 = vpop.f32.mrf.mxu0  ;;  %2535 = vmatmul.bf16.gmra.mxu2 %v2402_v29  ;;  %v1808_v59 = vpop.f32.mrf.mxu1  ;;  %v7292_v13 = vshll.u32 %v5486_v44, 16 }
 0x13d   : > { %v1878_v30 = vadd.f32 %v1808_v59, %v1677_v38  ;;  %v7297_v38 = vmov 0  ;;  %v2226_v59 = vsel %vm2194_vm4, 65537, %v7141_v0 }
 0x13e   : > { %v6376_v8 = vadd.f32 %v2906_v42, %v2793_v14  ;;  %v1942_v29 = vrot.slane %v7292_v13, 1  ;;  %v2630_v42 = vsel %vm7294_vm11, %v7293_v60, 0  ;;  %v1678_v14 = vadd.f32 %v6220_v22, %v6043_v4 }
 0x13f   : > { %v2496_v26 = vpop.f32.mrf.mxu2  ;;  %v7298_v38 = vsel %vm6395_vm6, 4294967295, %v7297_v38 }
 0x140   : > { %v2567_v36 = vadd.f32 %v2496_v26, %v1877_v9  ;;  %v6391_v27 = vsel %vm7296_vm2, %v1941_v56, %v1942_v29  ;;  %7299 = vst [vmem:[#allocation86_spill] sm:$0xff] %v7298_v38  ;;  %v7301_v38 = vld [vmem:[#allocation45_spill] sm:$0xff] }
 0x141   : > { %v2403_v26 = vsel %vm6395_vm6, %v6391_v27, 0  ;;  %v7302_v63 = vshll.u32 %v7301_v38, 16  ;;  %vm7307_vm6 = vsmask.f32 7424 }
 0x143   : > { %v2721_v61 = vpop.f32.mrf.mxu3 }
 0x144   : > { %v2794_v48 = vadd.f32 %v2721_v61, %v2566_v25  ;;  %v2911_v50 = vpop.f32.mrf.mxu0  ;;  %v1811_v25 = vpop.f32.mrf.mxu1  ;;  %v706_v61 = vand.u32 15, %v496_v11  ;;  %v7303_v11 = vld [vmem:[#allocation34_spill] sm:$0xff] }
 0x145   : > { %v1879_v21 = vadd.f32 %v1811_v25, %v1678_v14 }
 0x146   : > { %v6388_v9 = vadd.f32 %v2908_v45, %v2794_v48  ;;  %1850 = vmatmul.bf16.gmra.mxu1 %v5338_v58  ;;  %v2258_v48 = vunpack.c.l.b16 %v2226_v59  ;;  %v2004_v60 = vadd.s32 1, %v706_v61  ;;  %v7304_v59 = vld [vmem:[#allocation22_spill] sm:$0xff] }
 0x147   : > { %2950 = vmatmul.bf16.gmra.mxu0 %v5338_v58  ;;  %v2498_v4 = vpop.f32.mrf.mxu2  ;;  %v1944_v58 = vor.u32 %v1942_v29, %v7300_v23  ;;  %vm7305_vm15 = vnez %v7304_v59  ;;  %v7311_v59 = vshrl.u32 %v7301_v38, 16 }
 0x148   : > { %7295 = vst [vmem:[#allocation25_spill] sm:$0xff] %v6388_v9  ;;  %2763 = vmatmul.bf16.gmra.mxu3 %v2630_v42  ;;  %v2568_v45 = vadd.f32 %v2498_v4, %v1878_v30  ;;  %v4388_v42 = vunpack.i.l.s16 %v2258_v48  ;;  %v4965_v4 = vld [vmem:[%s5098_s8 + $0x78] sm:$0xff]   ;;  %vm2068_vm2 = vcmp.lt.s32.totalorder %v2004_v60, 16  ;;  %v7308_v48 = vmov 0 }
 0x149   : > { %vm2196_vm4 = vmpackc.low %vm2068_vm2, %vm2068_vm2  ;;  %v4870_v60 = vunpack.c.h.bf16 %v4965_v4 }
 0x14a   : > { %vm2375_vm13 = vcmp.ne.s32.totalorder %v4388_v42, %v5112_v16 }
 0x14b   : > { %v2724_v7 = vpop.f32.mrf.mxu3 }
 0x14c   : > { %v2795_v37 = vadd.f32 %v2724_v7, %v2567_v36  ;;  %v2913_v39 = vpop.f32.mrf.mxu0  ;;  %2540 = vmatmul.bf16.gmra.mxu2 %v2403_v26  ;;  %v1813_v13 = vpop.f32.mrf.mxu1  ;;  %v1945_v36 = vrot.slane %v7302_v63, 1  ;;  %v1679_v7 = vadd.f32 %v6220_v22, %v6053_v12  ;;  %v4869_v26 = vunpack.c.l.bf16 %v4965_v4  ;;  %v4783_v12 = vld [vmem:[%s6898_s3 + $0x180] sm:$0xff] }
 0x14d   : > { %3481 = vmatpush.bf16.msra.mxu2 %v4783_v12  ;;  %v4799_v4 = vld [vmem:[%s6898_s3 + $0x200] sm:$0xff] }
 0x14e   : > { %v6406_v56 = vadd.f32 %v2911_v50, %v2795_v37  ;;  %v2631_v50 = vsel %vm7305_vm15, %v7303_v11, 0  ;;  %v1880_v63 = vadd.f32 %v1813_v13, %v1679_v7  ;;  %v6424_v61 = vsel %vm7307_vm6, %v1944_v58, %v1945_v36  ;;  %vm6428_vm15 = vmpackc.low %vm2375_vm13, %vm5857_vm12  ;;  %v4791_v58 = vld [vmem:[%s6898_s3 + $0x1c0] sm:$0xff]  ;;  %3868 = vmatpush.bf16.msra.mxu0 %v4799_v4 }
 0x14f   : > { %v2501_v30 = vpop.f32.mrf.mxu2  ;;  %v7309_v48 = vsel %vm6428_vm15, 4294967295, %v7308_v48  ;;  %v2228_v13 = vsel %vm2196_vm4, 65537, %v7141_v0  ;;  %3667 = vmatpush.bf16.msra.mxu3 %v4791_v58 }
 0x150   : > { %v2569_v14 = vadd.f32 %v2501_v30, %v1879_v21  ;;  %v1680_v21 = vadd.f32 %v6220_v22, %v6077_v49  ;;  %7310 = vst [vmem:[#allocation34_spill] sm:$0xff] %v7309_v48  ;;  %v498_v49 = vadd.s32 248, %v5082_v3  ;;  %v5018_v30 = vld [vmem:[%s6896_s1] ss:$0 sm:$0xff] }
 0x151   : > { %v364_v42 = vmul.f32 %v5018_v30, %v4869_v26  ;;  %v365_v26 = vmul.f32 %v5018_v30, %v4870_v60  ;;  %v1947_v60 = vor.u32 %v1945_v36, %v7311_v59  ;;  %v7312_v30 = vshll.u32 %v5852_v32, 16 }
 0x152   : > { %v720_v7 = vand.u32 15, %v498_v49 }
 0x153   : > { %v2726_v25 = vpop.f32.mrf.mxu3 }
 0x154   : > { %v2796_v9 = vadd.f32 %v2726_v25, %v2568_v45  ;;  %v2916_v45 = vpop.f32.mrf.mxu0  ;;  %v1816_v23 = vpop.f32.mrf.mxu1  ;;  %v2404_v25 = vsel %vm6428_vm15, %v6424_v61, 0  ;;  %v2006_v58 = vadd.s32 1, %v720_v7  ;;  %vm7315_vm15 = vsmask.f32 7424 }
 0x155   : > { %v1881_v29 = vadd.f32 %v1816_v23, %v1680_v21  ;;  %v2260_v21 = vunpack.c.l.b16 %v2228_v13 }
 0x156   : > { %v6421_v37 = vadd.f32 %v2913_v39, %v2796_v9  ;;  %1855 = vmatmul.bf16.gmra.mxu1 %v5486_v44  ;;  %vm2070_vm6 = vcmp.lt.s32.totalorder %v2006_v58, 16 }
 0x157   : > { %2955 = vmatmul.bf16.gmra.mxu0 %v5486_v44  ;;  %v2503_v9 = vpop.f32.mrf.mxu2  ;;  %v4390_v13 = vunpack.i.l.s16 %v2260_v21  ;;  %v1948_v44 = vrot.slane %v7312_v30, 1  ;;  %vm2198_vm4 = vmpackc.low %vm2070_vm6, %vm2070_vm6 }
 0x158   : > { %7306 = vst [vmem:[#allocation45_spill] sm:$0xff] %v6421_v37  ;;  %2768 = vmatmul.bf16.gmra.mxu3 %v2631_v50  ;;  %v2570_v39 = vadd.f32 %v2503_v9, %v1880_v63  ;;  %v4775_v50 = vld [vmem:[%s6898_s3 + $0x140] sm:$0xff] }
 0x159   : > { %3102 = vmatpush.bf16.msra.mxu1 %v4775_v50  ;;  %v5019_v63 = vld [vmem:[%s6897_s2] ss:$0 sm:$0xff]  ;;  %vm2382_vm13 = vcmp.ne.s32.totalorder %v4390_v13, %v5112_v16 }
 0x15a   : > { %v400_v12 = vadd.f32 %v5019_v63, %v364_v42  ;;  %v401_v50 = vadd.f32 %v5019_v63, %v365_v26  ;;  %v7313_v42 = vld [vmem:[#allocation33_spill] sm:$0xff] }
 0x15b   : > { %v2729_v3 = vpop.f32.mrf.mxu3  ;;  %vm7314_vm2 = vnez %v7313_v42 }
 0x15c   : > { %v2797_v11 = vadd.f32 %v2729_v3, %v2569_v14  ;;  %v2918_v23 = vpop.f32.mrf.mxu0  ;;  %2545 = vmatmul.bf16.gmra.mxu2 %v2404_v25  ;;  %v1818_v9 = vpop.f32.mrf.mxu1  ;;  %v432_v25 = vmax.f32 %v400_v12, 0.0  ;;  %v433_v7 = vmax.f32 %v401_v50, 0.0 }
 0x15e   : > { %v6457_v14 = vadd.f32 %v2916_v45, %v2797_v11  ;;  %v1681_v45 = vadd.f32 %v6220_v22, %v6107_v43  ;;  %v2632_v11 = vsel %vm7314_vm2, %v5763_v24, 0  ;;  %v6474_v43 = vsel %vm7315_vm15, %v1947_v60, %v1948_v44  ;;  %vm6478_vm2 = vmpackc.low %vm2382_vm13, %vm5857_vm12 }
 0x15f   : > { %v2506_v49 = vpop.f32.mrf.mxu2  ;;  %v465_v63 = vpack.c.bf16 %v433_v7, %v433_v7  ;;  %vm7321_vm13 = vsmask.f32 7424 }
 0x160   : > { %v2571_v3 = vadd.f32 %v2506_v49, %v1881_v29  ;;  %v1682_v29 = vadd.f32 %v6220_v22, %v6129_v53  ;;  %v1882_v21 = vadd.f32 %v1818_v9, %v1681_v45  ;;  %v2405_v9 = vsel %vm6478_vm2, %v6474_v43, 0 }
 0x161   : > { %v6494_v60 = vunpack.c.l.b16 %v465_v63 }
 0x163   : > { %v2731_v48 = vpop.f32.mrf.mxu3 }
 0x164   : > { %v2798_v37 = vadd.f32 %v2731_v48, %v2570_v39  ;;  %v2921_v48 = vpop.f32.mrf.mxu0  ;;  %v464_v39 = vpack.c.bf16 %v432_v25, %v432_v25  ;;  %v1821_v59 = vpop.f32.mrf.mxu1  ;;  %v1683_v25 = vadd.f32 %v6220_v22, %v6161_v51  ;;  %v7318_v51 = vshrl.u32 %v5852_v32, 16 }
 0x165   : > { %v1883_v4 = vadd.f32 %v1821_v59, %v1682_v29 }
 0x166   : > { %v6471_v36 = vadd.f32 %v2918_v23, %v2798_v37  ;;  %1860 = vmatmul.bf16.gmra.mxu1 %v7301_v38  ;;  %v6484_v37 = vunpack.c.l.b16 %v464_v39  ;;  %v2230_v23 = vsel %vm2198_vm4, 65537, %v7141_v0 }
 0x167   : > { %2960 = vmatmul.bf16.gmra.mxu0 %v7301_v38  ;;  %v2508_v53 = vpop.f32.mrf.mxu2  ;;  %v2262_v13 = vunpack.c.l.b16 %v2230_v23  ;;  %v6504_v23 = vor.u32 %v1948_v44, %v7318_v51 }
 0x168   : > { %2773 = vmatmul.bf16.gmra.mxu3 %v2632_v11  ;;  %v2572_v26 = vadd.f32 %v2508_v53, %v1882_v21  ;;  %v1905_v49 = vpack.c.b16 %v6484_v37, %v6484_v37 }
 0x169   : > { %v4392_v7 = vunpack.i.l.s16 %v2262_v13 }
 0x16a   : > { %v1952_v29 = vshll.u32 %v1905_v49, 16 }
 0x16b   : > { %v2734_v12 = vpop.f32.mrf.mxu3  ;;  %vm2389_vm6 = vcmp.ne.s32.totalorder %v4392_v7, %v5112_v16 }
 0x16c   : > { %v2799_v58 = vadd.f32 %v2734_v12, %v2571_v3  ;;  %v2923_v50 = vpop.f32.mrf.mxu0  ;;  %2550 = vmatmul.bf16.gmra.mxu2 %v2405_v9  ;;  %v1823_v45 = vpop.f32.mrf.mxu1  ;;  %v6500_v3 = vpack.c.b16 %v6494_v60, %v6484_v37  ;;  %v1954_v63 = vrot.slane %v1952_v29, 1  ;;  %vm6519_vm4 = vmpackc.low %vm2389_vm6, %vm5857_vm12  ;;  %vm7325_vm12 = vsmask.f32 256 }
 0x16d   : > { %v1884_v11 = vadd.f32 %v1823_v45, %v1683_v25  ;;  %vm7326_vm6 = vnez %v7201_v40 }
 0x16e   : > { %v6496_v30 = vadd.f32 %v2921_v48, %v2799_v58  ;;  %v7319_v48 = vld [vmem:[#allocation47_spill] sm:$0xff]  ;;  %v7092_v58 = vshrl.u32 %v6500_v3, 16  ;;  %v1955_v44 = vsel %vm7321_vm13, %v6504_v23, %v1954_v63  ;;  %vm7331_vm13 = vnez %v7209_v46  ;;  %v7335_v46 = vld [vmem:[#allocation56_spill] sm:$0xff] }
 0x16f   : > { %v2511_v39 = vpop.f32.mrf.mxu2  ;;  %vm7320_vm15 = vnez %v7319_v48  ;;  %v2406_v29 = vsel %vm6519_vm4, %v1955_v44, 0 }
 0x170   : > { %v2573_v59 = vadd.f32 %v2511_v39, %v1883_v4  ;;  %v2633_v12 = vsel %vm7320_vm15, %v5906_v41, 0  ;;  %v1684_v4 = vadd.f32 %v6220_v22, %v6177_v35  ;;  %v2599_v25 = vrot.slane %v7092_v58, 7 }
 0x171   : > { %v1685_v39 = vadd.f32 %v6220_v22, %v6211_v62  ;;  %v1686_v62 = vadd.f32 %v6220_v22, %v6064_v10 }
 0x173   : > { %v2736_v21 = vpop.f32.mrf.mxu3 }
 0x174   : > { %v2800_v53 = vadd.f32 %v2736_v21, %v2572_v26  ;;  %v2926_v9 = vpop.f32.mrf.mxu0  ;;  %v1826_v26 = vpop.f32.mrf.mxu1 }
 0x175   : > { %v1885_v13 = vadd.f32 %v1826_v26, %v1684_v4 }
 0x176   : > { %v6513_v49 = vadd.f32 %v2923_v50, %v2800_v53  ;;  %1865 = vmatmul.bf16.gmra.mxu1 %v5852_v32  ;;  %v7093_v50 = vshll.u32 %v6500_v3, 16 }
 0x177   : > { %2965 = vmatmul.bf16.gmra.mxu0 %v5852_v32  ;;  %v2513_v16 = vpop.f32.mrf.mxu2 }
 0x178   : > { %2778 = vmatmul.bf16.gmra.mxu3 %v2633_v12  ;;  %v2574_v35 = vadd.f32 %v2513_v16, %v1884_v11  ;;  %v2602_v11 = vor.u32 %v7093_v50, %v2599_v25  ;;  %v7324_v12 = vld [vmem:[#allocation54_spill] sm:$0xff] }
 0x17a   : > { %v2603_v4 = vsel %vm7325_vm12, %v7324_v12, %v2602_v11 }
 0x17b   : > { %v2739_v45 = vpop.f32.mrf.mxu3 }
 0x17c   : > { %v2801_v5 = vadd.f32 %v2739_v45, %v2573_v59  ;;  %v2928_v7 = vpop.f32.mrf.mxu0  ;;  %2555 = vmatmul.bf16.gmra.mxu2 %v2406_v29  ;;  %v1828_v53 = vpop.f32.mrf.mxu1  ;;  %v2634_v59 = vsel %vm7326_vm6, %v2603_v4, 0 }
 0x17d   : > { %v1886_v51 = vadd.f32 %v1828_v53, %v1685_v39  ;;  %v7329_v53 = vld [vmem:[#allocation3_spill] sm:$0xff] }
 0x17e   : > { %v6534_v21 = vadd.f32 %v2926_v9, %v2801_v5  ;;  %v7327_v5 = vld [vmem:[#allocation2_spill] sm:$0xff]  ;;  %v7330_v58 = vunpack.c.l.b16 %v7329_v53 }
 0x17f   : > { %v2516_v63 = vpop.f32.mrf.mxu2  ;;  %v7328_v39 = vunpack.c.l.b16 %v7327_v5 }
 0x180   : > { %v2575_v26 = vadd.f32 %v2516_v63, %v1885_v13  ;;  %v7332_v63 = vsel %vm7331_vm13, %v5932_v34, 0 }
 0x181   : > { %v3218_v11 = vpack.c.b16 %v7330_v58, %v7328_v39 }
 0x183   : > { %v2741_v16 = vpop.f32.mrf.mxu3  ;;  %v3251_v12 = vshrl.u32 %v3218_v11, 16  ;;  %v3254_v4 = vshll.u32 %v3218_v11, 16 }
 0x184   : > { %v2802_v44 = vadd.f32 %v2741_v16, %v2574_v35  ;;  %v2931_v45 = vpop.f32.mrf.mxu0  ;;  %v1831_v9 = vpop.f32.mrf.mxu1 }
 0x185   : > { %v1887_v25 = vadd.f32 %v1831_v9, %v1686_v62  ;;  %v3253_v62 = vrot.slane %v3251_v12, 3  ;;  %v7337_v12 = vld [vmem:[#allocation4_spill] sm:$0xff] }
 0x186   : > { %v6542_v29 = vadd.f32 %v2928_v7, %v2802_v44  ;;  %3103 = vmatmul.bf16.vlgmr.msra.gmra.mxu1 %v7332_v63  ;;  %v7333_v44 = vsel %vm5946_vm3, %v5938_v54, 0  ;;  %v1688_v54 = vadd.f32 %v6220_v22, %v6120_v1  ;;  %vm7336_vm3 = vsmask.f32 4352 }
 0x187   : > { %2970 = vmatmul.bf16.gmra.mxu0 %v6500_v3  ;;  %v2518_v13 = vpop.f32.mrf.mxu2  ;;  %v7338_v33 = vunpack.c.l.b16 %v7337_v12  ;;  %vm7349_vm12 = vmmov %vm7336_vm3 }
 0x188   : > { %2783 = vmatmul.bf16.gmra.mxu3 %v2634_v59  ;;  %v2576_v35 = vadd.f32 %v2518_v13, %v1886_v51  ;;  %v3256_v51 = vrot.slane %v3254_v4, 4  ;;  %v7339_v4 = vld [vmem:[#allocation20_spill] sm:$0xff] }
 0x18a   : > { %v3257_v53 = vor.u32 %v3256_v51, %v3253_v62 }
 0x18b   : > { %v2744_v10 = vpop.f32.mrf.mxu3 }
 0x18c   : > { %v2803_v7 = vadd.f32 %v2744_v10, %v2575_v26  ;;  %v2933_v16 = vpop.f32.mrf.mxu0  ;;  %3482 = vmatmul.bf16.vlgmr.msra.gmra.mxu2 %v7333_v44  ;;  %v1833_v59 = vpop.f32.mrf.mxu1  ;;  %v3781_v26 = vsel %vm7331_vm13, %v5992_v20, 0  ;;  %v7340_v44 = vunpack.c.l.b16 %v7339_v4 }
 0x18d   : > { %v1888_v63 = vadd.f32 %v1833_v59, %v1687_v31 }
 0x18e   : > { %v6557_v58 = vadd.f32 %v2931_v45, %v2803_v7  ;;  %v3258_v7 = vsel %vm7336_vm3, %v7335_v46, %v3257_v53  ;;  %v3219_v1 = vpack.c.b16 %v7340_v44, %v7338_v33 }
 0x18f   : > { %v2521_v9 = vpop.f32.mrf.mxu2 }
 0x190   : > { %v2577_v5 = vadd.f32 %v2521_v9, %v1887_v25  ;;  %v3015_v25 = vsel %vm5960_vm1, %v5992_v20, 0  ;;  %v3394_v20 = vsel %vm5578_vm0, %v3258_v7, 0  ;;  %v3263_v59 = vshll.u32 %v3219_v1, 16 }
 0x192   : > { %v3265_v46 = vrot.slane %v3263_v59, 4 }
 0x193   : > { %v2746_v39 = vpop.f32.mrf.mxu3 }
 0x194   : > { %v2804_v34 = vadd.f32 %v2746_v39, %v2576_v35  ;;  %v2936_v45 = vpop.f32.mrf.mxu0  ;;  %v1836_v13 = vpop.f32.mrf.mxu1  ;;  %v7334_v35 = vld [vmem:[#allocation46_spill] sm:$0xff] }
 0x195   : > { %v1889_v10 = vadd.f32 %v1836_v13, %v1688_v54 }
 0x196   : > { %v6566_v11 = vadd.f32 %v2933_v16, %v2804_v34  ;;  %3108 = vmatmul.bf16.gmra.mxu1 %v3015_v25  ;;  %v3260_v34 = vshrl.u32 %v3219_v1, 16  ;;  %v7342_v25 = vld [vmem:[#allocation67_spill] sm:$0xff]  ;;  %v7344_v1 = vld [vmem:[#allocation58_spill] sm:$0xff] }
 0x197   : > { %3869 = vmatmul.bf16.vlgmr.msra.gmra.mxu0 %v3781_v26  ;;  %v2523_v16 = vpop.f32.mrf.mxu2  ;;  %v1689_v44 = vadd.f32 %v6220_v22, %v7342_v25 }
 0x198   : > { %3668 = vmatmul.bf16.vlgmr.msra.gmra.mxu3 %v7334_v35  ;;  %v2578_v62 = vadd.f32 %v2523_v16, %v1888_v63  ;;  %v3262_v35 = vrot.slane %v3260_v34, 3  ;;  %v7343_v16 = vld [vmem:[#allocation71_spill] sm:$0xff] }
 0x19a   : > { %v3266_v63 = vor.u32 %v3265_v46, %v3262_v35  ;;  %v7350_v35 = vld [vmem:[#allocation21_spill] sm:$0xff] }
 0x19b   : > { %v2749_v51 = vpop.f32.mrf.mxu3  ;;  %v7351_v46 = vunpack.c.l.b16 %v7350_v35 }
 0x19c   : > { %v2805_v39 = vadd.f32 %v2749_v51, %v2577_v5  ;;  %v2938_v31 = vpop.f32.mrf.mxu0  ;;  %3487 = vmatmul.bf16.gmra.mxu2 %v3394_v20  ;;  %v1838_v13 = vpop.f32.mrf.mxu1  ;;  %v1690_v5 = vadd.f32 %v6220_v22, %v7343_v16  ;;  %v7346_v20 = vld [vmem:[#allocation57_spill] sm:$0xff]  ;;  %v3267_v59 = vsel %vm7349_vm12, %v3257_v53, %v3266_v63 }
 0x19d   : > { %vm7347_vm0 = vnez %v7346_v20  ;;  %v3395_v50 = vsel %vm5784_vm10, %v3267_v59, 0  ;;  %v7357_v59 = vld [vmem:[#allocation77_spill] sm:$0xff] }
 0x19e   : > { %v6580_v54 = vadd.f32 %v2936_v45, %v2805_v39  ;;  %v3782_v45 = vsel %vm5960_vm1, %v7344_v1, 0  ;;  %v1890_v39 = vadd.f32 %v1838_v13, %v1689_v44  ;;  %v7355_v13 = vld [vmem:[#allocation73_spill] sm:$0xff]  ;;  %vm7363_vm1 = vmmov %vm7336_vm3 }
 0x19f   : > { %v2526_v12 = vpop.f32.mrf.mxu2  ;;  %v1691_v44 = vadd.f32 %v6220_v22, %v7355_v13  ;;  %v7364_v13 = vld [vmem:[#allocation36_spill] sm:$0xff]  ;;  %vm7377_vm13 = vmmov %vm7363_vm1 }
 0x1a0   : > { %v2579_v33 = vadd.f32 %v2526_v12, %v1889_v10  ;;  %v3016_v10 = vsel %vm7347_vm0, %v7344_v1, 0  ;;  %v7352_v12 = vld [vmem:[#allocation35_spill] sm:$0xff]  ;;  %vm7391_vm3 = vmmov %vm7363_vm1 }
 0x1a3   : > { %v2751_v26 = vpop.f32.mrf.mxu3 }
 0x1a4   : > { %v2806_v4 = vadd.f32 %v2751_v26, %v2578_v62  ;;  %v2941_v7 = vpop.f32.mrf.mxu0  ;;  %v1841_v9 = vpop.f32.mrf.mxu1  ;;  %v7348_v62 = vld [vmem:[#allocation5_spill] sm:$0xff]  ;;  %v7353_v26 = vunpack.c.l.b16 %v7352_v12 }
 0x1a5   : > { %v1891_v34 = vadd.f32 %v1841_v9, %v1690_v5 }
 0x1a6   : > { %v6589_v51 = vadd.f32 %v2938_v31, %v2806_v4  ;;  %v3220_v25 = vpack.c.b16 %v7353_v26, %v7351_v46  ;;  %3113 = vmatmul.bf16.gmra.mxu1 %v3016_v10 }
 0x1a7   : > { %3874 = vmatmul.bf16.gmra.mxu0 %v3782_v45  ;;  %v2528_v57 = vpop.f32.mrf.mxu2 }
 0x1a8   : > { %7345 = vst [vmem:[#allocation33_spill] sm:$0xff] %v6589_v51  ;;  %3673 = vmatmul.bf16.gmra.mxu3 %v7348_v62  ;;  %v2580_v31 = vadd.f32 %v2528_v57, %v1890_v39  ;;  %v3269_v51 = vshrl.u32 %v3220_v25, 16  ;;  %v3272_v62 = vshll.u32 %v3220_v25, 16 }
 0x1aa   : > { %v3271_v45 = vrot.slane %v3269_v51, 3  ;;  %v3274_v46 = vrot.slane %v3272_v62, 4  ;;  %v7362_v62 = vld [vmem:[#allocation6_spill] sm:$0xff] }
 0x1ab   : > { %v2754_v4 = vpop.f32.mrf.mxu3 }
 0x1ac   : > { %v2807_v1 = vadd.f32 %v2754_v4, %v2579_v33  ;;  %v2943_v53 = vpop.f32.mrf.mxu0  ;;  %3492 = vmatmul.bf16.gmra.mxu2 %v3395_v50  ;;  %v1843_v9 = vpop.f32.mrf.mxu1  ;;  %v3275_v57 = vor.u32 %v3274_v46, %v3271_v45  ;;  %v1692_v33 = vadd.f32 %v6220_v22, %v7357_v59  ;;  %v7358_v4 = vld [vmem:[#allocation60_spill] sm:$0xff] }
 0x1ad   : > { %v1892_v35 = vadd.f32 %v1843_v9, %v1691_v44  ;;  %v3783_v16 = vsel %vm7347_vm0, %v7358_v4, 0  ;;  %v7365_v44 = vunpack.c.l.b16 %v7364_v13  ;;  %v7366_v9 = vld [vmem:[#allocation7_spill] sm:$0xff]  ;;  %vm7405_vm0 = vmmov %vm7363_vm1 }
 0x1ae   : > { %v6604_v5 = vadd.f32 %v2941_v7, %v2807_v1  ;;  %v7360_v1 = vld [vmem:[#allocation59_spill] sm:$0xff]  ;;  %v7367_v45 = vunpack.c.l.b16 %v7366_v9  ;;  %vm7416_vm12 = vmmov %vm7405_vm0 }
 0x1af   : > { %v2531_v39 = vpop.f32.mrf.mxu2  ;;  %vm7361_vm10 = vnez %v7360_v1 }
 0x1b0   : > { %7356 = vst [vmem:[#allocation47_spill] sm:$0xff] %v6604_v5  ;;  %v2581_v10 = vadd.f32 %v2531_v39, %v1891_v34  ;;  %v3017_v51 = vsel %vm7361_vm10, %v7358_v4, 0  ;;  %v3221_v46 = vpack.c.b16 %v7367_v45, %v7365_v44 }
 0x1b2   : > { %v3278_v4 = vshrl.u32 %v3221_v46, 16 }
 0x1b3   : > { %v2756_v12 = vpop.f32.mrf.mxu3 }
 0x1b4   : > { %v2808_v26 = vadd.f32 %v2756_v12, %v2580_v31  ;;  %v2946_v25 = vpop.f32.mrf.mxu0  ;;  %v1846_v7 = vpop.f32.mrf.mxu1  ;;  %v3276_v31 = vsel %vm7363_vm1, %v3266_v63, %v3275_v57 }
 0x1b5   : > { %v1893_v34 = vadd.f32 %v1846_v7, %v1692_v33 }
 0x1b6   : > { %v6611_v50 = vadd.f32 %v2943_v53, %v2808_v26  ;;  %3118 = vmatmul.bf16.gmra.mxu1 %v3017_v51  ;;  %v3396_v26 = vsel %vm5899_vm14, %v3276_v31, 0  ;;  %v7371_v31 = vld [vmem:[#allocation62_spill] sm:$0xff] }
 0x1b7   : > { %3879 = vmatmul.bf16.gmra.mxu0 %v3783_v16  ;;  %v2533_v20 = vpop.f32.mrf.mxu2  ;;  %v3280_v16 = vrot.slane %v3278_v4, 3  ;;  %v7376_v4 = vld [vmem:[#allocation23_spill] sm:$0xff] }
 0x1b8   : > { %7359 = vst [vmem:[#allocation54_spill] sm:$0xff] %v6611_v50  ;;  %3678 = vmatmul.bf16.gmra.mxu3 %v7362_v62  ;;  %v2582_v39 = vadd.f32 %v2533_v20, %v1892_v35  ;;  %v3281_v50 = vshll.u32 %v3221_v46, 16  ;;  %v7369_v62 = vld [vmem:[#allocation79_spill] sm:$0xff] }
 0x1b9   : > { %v1693_v33 = vadd.f32 %v6220_v22, %v7369_v62 }
 0x1ba   : > { %v3283_v9 = vrot.slane %v3281_v50, 4 }
 0x1bb   : > { %v2759_v53 = vpop.f32.mrf.mxu3 }
 0x1bc   : > { %v2809_v59 = vadd.f32 %v2759_v53, %v2581_v10  ;;  %v2948_v63 = vpop.f32.mrf.mxu0  ;;  %3497 = vmatmul.bf16.gmra.mxu2 %v3396_v26  ;;  %v1848_v13 = vpop.f32.mrf.mxu1  ;;  %v3284_v12 = vor.u32 %v3283_v9, %v3280_v16  ;;  %v1694_v10 = vadd.f32 %v6220_v22, %v7371_v31  ;;  %v7372_v53 = vld [vmem:[#allocation63_spill] sm:$0xff]  ;;  %v7380_v16 = vld [vmem:[#allocation9_spill] sm:$0xff] }
 0x1bd   : > { %v1894_v44 = vadd.f32 %v1848_v13, %v1693_v33  ;;  %v3784_v62 = vsel %vm7361_vm10, %v7372_v53, 0  ;;  %v7378_v33 = vld [vmem:[#allocation8_spill] sm:$0xff]  ;;  %v7381_v9 = vunpack.c.l.b16 %v7380_v16  ;;  %vm7425_vm10 = vmmov %vm7405_vm0 }
 0x1be   : > { %v6626_v7 = vadd.f32 %v2946_v25, %v2809_v59  ;;  %v7374_v59 = vld [vmem:[#allocation61_spill] sm:$0xff]  ;;  %v7379_v13 = vunpack.c.l.b16 %v7378_v33 }
 0x1bf   : > { %v2536_v35 = vpop.f32.mrf.mxu2  ;;  %vm7375_vm14 = vnez %v7374_v59 }
 0x1c0   : > { %7370 = vst [vmem:[#allocation2_spill] sm:$0xff] %v6626_v7  ;;  %v2583_v51 = vadd.f32 %v2536_v35, %v1893_v34  ;;  %v3018_v50 = vsel %vm7375_vm14, %v7372_v53, 0  ;;  %v3222_v35 = vpack.c.b16 %v7381_v9, %v7379_v13 }
 0x1c2   : > { %v3287_v53 = vshrl.u32 %v3222_v35, 16  ;;  %v3290_v7 = vshll.u32 %v3222_v35, 16  ;;  %v7386_v35 = vld [vmem:[#allocation68_spill] sm:$0xff] }
 0x1c3   : > { %v2761_v45 = vpop.f32.mrf.mxu3 }
 0x1c4   : > { %v2810_v20 = vadd.f32 %v2761_v45, %v2582_v39  ;;  %v2951_v46 = vpop.f32.mrf.mxu0  ;;  %v1851_v25 = vpop.f32.mrf.mxu1  ;;  %v3285_v39 = vsel %vm7377_vm13, %v3275_v57, %v3284_v12  ;;  %v3292_v33 = vrot.slane %v3290_v7, 4  ;;  %v7388_v7 = vld [vmem:[#allocation64_spill] sm:$0xff]  ;;  %vm7439_vm13 = vmmov %vm7405_vm0 }
 0x1c5   : > { %v1895_v34 = vadd.f32 %v1851_v25, %v1694_v10  ;;  %v3397_v31 = vsel %vm5234_vm9, %v3285_v39, 0  ;;  %v3289_v25 = vrot.slane %v3287_v53, 3  ;;  %vm7389_vm9 = vnez %v7388_v7 }
 0x1c6   : > { %v6633_v26 = vadd.f32 %v2948_v63, %v2810_v20  ;;  %3123 = vmatmul.bf16.gmra.mxu1 %v3018_v50  ;;  %v7384_v50 = vld [vmem:[#allocation65_spill] sm:$0xff]  ;;  %v7385_v20 = vld [vmem:[#allocation66_spill] sm:$0xff] }
 0x1c7   : > { %3884 = vmatmul.bf16.gmra.mxu0 %v3784_v62  ;;  %v2538_v1 = vpop.f32.mrf.mxu2 }
 0x1c8   : > { %7373 = vst [vmem:[#allocation3_spill] sm:$0xff] %v6633_v26  ;;  %3683 = vmatmul.bf16.gmra.mxu3 %v7376_v4  ;;  %v2584_v45 = vadd.f32 %v2538_v1, %v1894_v44  ;;  %v3293_v44 = vor.u32 %v3292_v33, %v3289_v25  ;;  %v1695_v1 = vadd.f32 %v6220_v22, %v7384_v50  ;;  %v7392_v33 = vld [vmem:[#allocation10_spill] sm:$0xff] }
 0x1ca   : > { %v3294_v25 = vsel %vm7391_vm3, %v3284_v12, %v3293_v44 }
 0x1cb   : > { %v2764_v63 = vpop.f32.mrf.mxu3 }
 0x1cc   : > { %v2811_v26 = vadd.f32 %v2764_v63, %v2583_v51  ;;  %v2953_v4 = vpop.f32.mrf.mxu0  ;;  %3502 = vmatmul.bf16.gmra.mxu2 %v3397_v31  ;;  %v1853_v57 = vpop.f32.mrf.mxu1  ;;  %v1696_v51 = vadd.f32 %v6220_v22, %v7385_v20  ;;  %v7393_v22 = vunpack.c.l.b16 %v7392_v33  ;;  %v7404_v20 = vld [vmem:[#allocation11_spill] sm:$0xff] }
 0x1cd   : > { %v1896_v31 = vadd.f32 %v1853_v57, %v1695_v1 }
 0x1ce   : > { %v6646_v10 = vadd.f32 %v2951_v46, %v2811_v26  ;;  %v3785_v46 = vsel %vm7375_vm14, %v7386_v35, 0 }
 0x1cf   : > { %v2541_v16 = vpop.f32.mrf.mxu2 }
 0x1d0   : > { %7383 = vst [vmem:[#allocation46_spill] sm:$0xff] %v6646_v10  ;;  %v2585_v13 = vadd.f32 %v2541_v16, %v1895_v34  ;;  %v3019_v34 = vsel %vm7389_vm9, %v7386_v35, 0  ;;  %v7394_v16 = vld [vmem:[#allocation24_spill] sm:$0xff] }
 0x1d3   : > { %v2766_v62 = vpop.f32.mrf.mxu3 }
 0x1d4   : > { %v2812_v9 = vadd.f32 %v2766_v62, %v2584_v45  ;;  %v2956_v39 = vpop.f32.mrf.mxu0  ;;  %v1856_v63 = vpop.f32.mrf.mxu1  ;;  %v7390_v45 = vld [vmem:[#allocation39_spill] sm:$0xff]  ;;  %v7395_v62 = vunpack.c.l.b16 %v7394_v16 }
 0x1d5   : > { %v1897_v53 = vadd.f32 %v1856_v63, %v1696_v51 }
 0x1d6   : > { %v6655_v26 = vadd.f32 %v2953_v4, %v2812_v9  ;;  %v3223_v50 = vpack.c.b16 %v7395_v62, %v7393_v22  ;;  %3128 = vmatmul.bf16.gmra.mxu1 %v3019_v34  ;;  %v5020_v34 = vld [vmem:[%s6899_s4] ss:$0 sm:$0xff]  ;;  %v7399_v62 = vld [vmem:[#allocation72_spill] sm:$0xff] }
 0x1d7   : > { %3889 = vmatmul.bf16.gmra.mxu0 %v3785_v46  ;;  %v2543_v59 = vpop.f32.mrf.mxu2 }
 0x1d8   : > { %7387 = vst [vmem:[#allocation56_spill] sm:$0xff] %v6655_v26  ;;  %3688 = vmatmul.bf16.gmra.mxu3 %v7390_v45  ;;  %v2586_v4 = vadd.f32 %v2543_v59, %v1896_v31  ;;  %v3398_v26 = vsel %vm5439_vm7, %v3294_v25, 0  ;;  %v3296_v10 = vshrl.u32 %v3223_v50, 16  ;;  %v3299_v45 = vshll.u32 %v3223_v50, 16  ;;  %v7398_v25 = vld [vmem:[#allocation70_spill] sm:$0xff] }
 0x1d9   : > { %v1698_v50 = vadd.f32 %v5020_v34, %v7399_v62 }
 0x1da   : > { %v3298_v51 = vrot.slane %v3296_v10, 3  ;;  %v3301_v63 = vrot.slane %v3299_v45, 4 }
 0x1db   : > { %v2769_v9 = vpop.f32.mrf.mxu3 }
 0x1dc   : > { %v2813_v35 = vadd.f32 %v2769_v9, %v2585_v13  ;;  %v2958_v57 = vpop.f32.mrf.mxu0  ;;  %3507 = vmatmul.bf16.gmra.mxu2 %v3398_v26  ;;  %v1858_v12 = vpop.f32.mrf.mxu1  ;;  %v3302_v31 = vor.u32 %v3301_v63, %v3298_v51  ;;  %v1697_v13 = vadd.f32 %v5020_v34, %v7398_v25  ;;  %v7400_v26 = vld [vmem:[#allocation74_spill] sm:$0xff] }
 0x1dd   : > { %v7406_v63 = vld [vmem:[#allocation26_spill] sm:$0xff] }
 0x1de   : > { %v6668_v1 = vadd.f32 %v2956_v39, %v2813_v35  ;;  %v3786_v39 = vsel %vm7389_vm9, %v7400_v26, 0  ;;  %v1898_v35 = vadd.f32 %v1858_v12, %v1697_v13  ;;  %v3303_v51 = vsel %vm7405_vm0, %v3293_v44, %v3302_v31  ;;  %v7411_v12 = vld [vmem:[#allocation76_spill] sm:$0xff] }
 0x1df   : > { %v2546_v33 = vpop.f32.mrf.mxu2  ;;  %v1699_v13 = vadd.f32 %v5020_v34, %v7411_v12 }
 0x1e0   : > { %7397 = vst [vmem:[#allocation4_spill] sm:$0xff] %v6668_v1  ;;  %v2587_v22 = vadd.f32 %v2546_v33, %v1897_v53  ;;  %v7402_v53 = vld [vmem:[#allocation69_spill] sm:$0xff]  ;;  %v7407_v33 = vunpack.c.l.b16 %v7406_v63  ;;  %v3399_v1 = vsel %vm5627_vm8, %v3303_v51, 0 }
 0x1e1   : > { %vm7403_vm7 = vnez %v7402_v53 }
 0x1e3   : > { %v2771_v46 = vpop.f32.mrf.mxu3 }
 0x1e4   : > { %v2814_v16 = vadd.f32 %v2771_v46, %v2586_v4  ;;  %v2961_v59 = vpop.f32.mrf.mxu0  ;;  %v1861_v9 = vpop.f32.mrf.mxu1  ;;  %v3020_v4 = vsel %vm7403_vm7, %v7400_v26, 0  ;;  %v7408_v46 = vld [vmem:[#allocation40_spill] sm:$0xff] }
 0x1e5   : > { %v1899_v45 = vadd.f32 %v1861_v9, %v1698_v50  ;;  %v7409_v25 = vunpack.c.l.b16 %v7408_v46 }
 0x1e6   : > { %v6678_v10 = vadd.f32 %v2958_v57, %v2814_v16  ;;  %3133 = vmatmul.bf16.gmra.mxu1 %v3020_v4 }
 0x1e7   : > { %v3224_v62 = vpack.c.b16 %v7409_v25, %v7407_v33  ;;  %3894 = vmatmul.bf16.gmra.mxu0 %v3786_v39  ;;  %v2548_v7 = vpop.f32.mrf.mxu2 }
 0x1e8   : > { %7401 = vst [vmem:[#allocation20_spill] sm:$0xff] %v6678_v10  ;;  %3693 = vmatmul.bf16.gmra.mxu3 %v7404_v20  ;;  %v2588_v57 = vadd.f32 %v2548_v7, %v1898_v35  ;;  %v7412_v10 = vld [vmem:[#allocation80_spill] sm:$0xff] }
 0x1e9   : > { %v3305_v5 = vshrl.u32 %v3224_v62, 16  ;;  %v3308_v20 = vshll.u32 %v3224_v62, 16  ;;  %v1700_v51 = vadd.f32 %v5020_v34, %v7412_v10  ;;  %v3787_v62 = vsel %vm7403_vm7, %v6235_v52, 0  ;;  %vm7446_vm7 = vmmov %vm7405_vm0 }
 0x1ea   : > { %vm7451_vm0 = vnez %v7163_v47 }
 0x1eb   : > { %v2774_v16 = vpop.f32.mrf.mxu3  ;;  %v3307_v33 = vrot.slane %v3305_v5, 3  ;;  %v3310_v39 = vrot.slane %v3308_v20, 4  ;;  %v7417_v20 = vld [vmem:[#allocation41_spill] sm:$0xff] }
 0x1ec   : > { %v2815_v26 = vadd.f32 %v2774_v16, %v2587_v22  ;;  %v2963_v50 = vpop.f32.mrf.mxu0  ;;  %3512 = vmatmul.bf16.gmra.mxu2 %v3399_v1  ;;  %v1863_v9 = vpop.f32.mrf.mxu1  ;;  %v7418_v12 = vunpack.c.l.b16 %v7417_v20 }
 0x1ed   : > { %v1900_v63 = vadd.f32 %v1863_v9, %v1699_v13  ;;  %v3311_v7 = vor.u32 %v3310_v39, %v3307_v33  ;;  %v7419_v13 = vld [vmem:[#allocation15_spill] sm:$0xff] }
 0x1ee   : > { %v6692_v44 = vadd.f32 %v2961_v59, %v2815_v26  ;;  %v7413_v59 = vld [vmem:[#allocation75_spill] sm:$0xff]  ;;  %v7415_v26 = vld [vmem:[#allocation12_spill] sm:$0xff]  ;;  %v7420_v9 = vunpack.c.l.b16 %v7419_v13 }
 0x1ef   : > { %v2551_v46 = vpop.f32.mrf.mxu2  ;;  %vm7414_vm8 = vnez %v7413_v59 }
 0x1f0   : > { %v2589_v35 = vadd.f32 %v2551_v46, %v1899_v45  ;;  %v3021_v5 = vsel %vm7414_vm8, %v6235_v52, 0  ;;  %v3225_v33 = vpack.c.b16 %v7420_v9, %v7418_v12 }
 0x1f2   : > { %v3314_v52 = vshrl.u32 %v3225_v33, 16  ;;  %v3317_v10 = vshll.u32 %v3225_v33, 16  ;;  %v7424_v33 = vld [vmem:[#allocation27_spill] sm:$0xff] }
 0x1f3   : > { %v2776_v4 = vpop.f32.mrf.mxu3 }
 0x1f4   : > { %v2816_v25 = vadd.f32 %v2776_v4, %v2588_v57  ;;  %v2966_v22 = vpop.f32.mrf.mxu0  ;;  %v1866_v1 = vpop.f32.mrf.mxu1  ;;  %v3312_v57 = vsel %vm7416_vm12, %v3302_v31, %v3311_v7  ;;  %v3316_v12 = vrot.slane %v3314_v52, 3  ;;  %vm7454_vm12 = vmmov %vm7446_vm7 }
 0x1f5   : > { %v1901_v45 = vadd.f32 %v1866_v1, %v1700_v51  ;;  %v3400_v4 = vsel %vm5801_vm5, %v3312_v57, 0  ;;  %v1701_v51 = vadd.f32 %v5020_v34, %v6256_v18  ;;  %v7422_v34 = vld [vmem:[#allocation78_spill] sm:$0xff] }
 0x1f6   : > { %v6698_v16 = vadd.f32 %v2963_v50, %v2816_v25  ;;  %3138 = vmatmul.bf16.gmra.mxu1 %v3021_v5  ;;  %vm7423_vm5 = vnez %v7422_v34 }
 0x1f7   : > { %3899 = vmatmul.bf16.gmra.mxu0 %v3787_v62  ;;  %v2553_v53 = vpop.f32.mrf.mxu2  ;;  %v3319_v62 = vrot.slane %v3317_v10, 4 }
 0x1f8   : > { %3698 = vmatmul.bf16.gmra.mxu3 %v7415_v26  ;;  %v2590_v39 = vadd.f32 %v2553_v53, %v1900_v63 }
 0x1f9   : > { %v3320_v53 = vor.u32 %v3319_v62, %v3316_v12 }
 0x1fb   : > { %v2779_v50 = vpop.f32.mrf.mxu3 }
 0x1fc   : > { %v2817_v25 = vadd.f32 %v2779_v50, %v2589_v35  ;;  %v2968_v1 = vpop.f32.mrf.mxu0  ;;  %3517 = vmatmul.bf16.gmra.mxu2 %v3400_v4  ;;  %v1868_v26 = vpop.f32.mrf.mxu1  ;;  %v3788_v35 = vsel %vm7414_vm8, %v6271_v55, 0  ;;  %v3321_v50 = vsel %vm7425_vm10, %v3311_v7, %v3320_v53 }
 0x1fd   : > { %v1902_v20 = vadd.f32 %v1868_v26, %v1701_v51 }
 0x1fe   : > { %v6712_v31 = vadd.f32 %v2966_v22, %v2817_v25  ;;  %v3022_v22 = vsel %vm7423_vm5, %v6271_v55, 0 }
 0x1ff   : > { %v2556_v13 = vpop.f32.mrf.mxu2 }
 0x200   : > { %v2591_v63 = vadd.f32 %v2556_v13, %v1901_v45  ;;  %v7426_v45 = vld [vmem:[#allocation16_spill] sm:$0xff] }
 0x201   : > { %v7427_v4 = vunpack.c.l.b16 %v7426_v45 }
 0x203   : > { %v2781_v5 = vpop.f32.mrf.mxu3 }
 0x204   : > { %v2818_v9 = vadd.f32 %v2781_v5, %v2590_v39  ;;  %v2971_v46 = vpop.f32.mrf.mxu0  ;;  %v3104_v18 = vpop.f32.mrf.mxu1  ;;  %v7428_v39 = vld [vmem:[#allocation17_spill] sm:$0xff] }
 0x205   : > { %v7429_v25 = vunpack.c.l.b16 %v7428_v39 }
 0x206   : > { %v6717_v57 = vadd.f32 %v2968_v1, %v2818_v9  ;;  %3143 = vmatmul.bf16.gmra.mxu1 %v3022_v22  ;;  %v7430_v1 = vld [vmem:[#allocation14_spill] sm:$0xff]  ;;  %v3789_v22 = vsel %vm7423_vm5, %v6315_v28, 0  ;;  %vm7464_vm5 = vmmov %vm7446_vm7 }
 0x207   : > { %v3226_v52 = vpack.c.b16 %v7429_v25, %v7427_v4  ;;  %3904 = vmatmul.bf16.gmra.mxu0 %v3788_v35  ;;  %v2558_v10 = vpop.f32.mrf.mxu2  ;;  %vm7431_vm1 = vnez %v7430_v1  ;;  %v7433_v25 = vld [vmem:[#allocation81_spill] sm:$0xff] }
 0x208   : > { %3703 = vmatmul.bf16.gmra.mxu3 %v7424_v33  ;;  %v2592_v59 = vadd.f32 %v2558_v10, %v1902_v20  ;;  %v3401_v26 = vsel %vm7431_vm1, %v3321_v50, 0  ;;  %vm7434_vm14 = vnez %v7433_v25 }
 0x209   : > { %v3323_v62 = vshrl.u32 %v3226_v52, 16  ;;  %v3326_v55 = vshll.u32 %v3226_v52, 16  ;;  %v7435_v52 = vld [vmem:[#allocation18_spill] sm:$0xff] }
 0x20a   : > { %v7436_v10 = vunpack.c.l.b16 %v7435_v52 }
 0x20b   : > { %v2784_v51 = vpop.f32.mrf.mxu3  ;;  %v3325_v9 = vrot.slane %v3323_v62, 3  ;;  %v3328_v33 = vrot.slane %v3326_v55, 4 }
 0x20c   : > { %v2819_v12 = vadd.f32 %v2784_v51, %v2591_v63  ;;  %v2973_v13 = vpop.f32.mrf.mxu0  ;;  %3522 = vmatmul.bf16.gmra.mxu2 %v3401_v26  ;;  %v3106_v7 = vpop.f32.mrf.mxu1  ;;  %v7437_v51 = vld [vmem:[#allocation29_spill] sm:$0xff] }
 0x20d   : > { %v3329_v39 = vor.u32 %v3328_v33, %v3325_v9  ;;  %v7438_v1 = vunpack.c.l.b16 %v7437_v51  ;;  %v7441_v9 = vld [vmem:[#allocation31_spill] sm:$0xff] }
 0x20e   : > { %v6730_v5 = vadd.f32 %v2971_v46, %v2819_v12  ;;  %v3023_v46 = vsel %vm7434_vm14, %v6315_v28, 0  ;;  %v7440_v12 = vld [vmem:[#allocation82_spill] sm:$0xff]  ;;  %vm7442_vm9 = vnez %v7441_v9 }
 0x20f   : > { %v3483_v45 = vpop.f32.mrf.mxu2  ;;  %v3227_v26 = vpack.c.b16 %v7438_v1, %v7436_v10  ;;  %v3184_v62 = vadd.f32 %v3104_v18, %v7440_v12 }
 0x211   : > { %v3563_v55 = vadd.f32 %v3483_v45, %v3184_v62  ;;  %v3332_v28 = vshrl.u32 %v3227_v26, 16 }
 0x213   : > { %v2786_v4 = vpop.f32.mrf.mxu3 }
 0x214   : > { %v2820_v35 = vadd.f32 %v2786_v4, %v2592_v59  ;;  %v3870_v20 = vpop.f32.mrf.mxu0  ;;  %v3109_v63 = vpop.f32.mrf.mxu1  ;;  %v3330_v59 = vsel %vm7439_vm13, %v3320_v53, %v3329_v39  ;;  %v3335_v4 = vshll.u32 %v3227_v26, 16  ;;  %v3334_v53 = vrot.slane %v3332_v28, 3 }
 0x215   : > { %v3402_v33 = vsel %vm7442_vm9, %v3330_v59, 0  ;;  %v3186_v59 = vadd.f32 %v3109_v63, %v6332_v17  ;;  %v7447_v63 = vld [vmem:[#allocation30_spill] sm:$0xff]  ;;  %vm7474_vm13 = vnez %v7313_v42  ;;  %vm7476_vm9 = vsmask.f32 7424 }
 0x216   : > { %v6735_v50 = vadd.f32 %v2973_v13, %v2820_v35  ;;  %3148 = vmatmul.bf16.gmra.mxu1 %v3023_v46  ;;  %v7443_v35 = vld [vmem:[#allocation83_spill] sm:$0xff]  ;;  %v3337_v1 = vrot.slane %v3335_v4, 4 }
 0x217   : > { %3909 = vmatmul.bf16.gmra.mxu0 %v3789_v22  ;;  %v3485_v34 = vpop.f32.mrf.mxu2  ;;  %v3185_v52 = vadd.f32 %v3106_v7, %v7443_v35  ;;  %v3790_v7 = vsel %vm7434_vm14, %v6347_v15, 0  ;;  %vm7473_vm14 = vmmov %vm7464_vm5 }
 0x218   : > { %7432 = vst [vmem:[#allocation38_spill] sm:$0xff] %v6735_v50  ;;  %3708 = vmatmul.bf16.gmra.mxu3 %v5636_v19  ;;  %v3338_v45 = vor.u32 %v3337_v1, %v3334_v53 }
 0x219   : > { %v3564_v18 = vadd.f32 %v3485_v34, %v3185_v52  ;;  %v7444_v34 = vld [vmem:[#allocation84_spill] sm:$0xff] }
 0x21a   : > { %vm7445_vm3 = vnez %v7444_v34  ;;  %v3339_v17 = vsel %vm7446_vm7, %v3329_v39, %v3338_v45 }
 0x21b   : > { %v3669_v13 = vpop.f32.mrf.mxu3 }
 0x21c   : > { %v3872_v51 = vpop.f32.mrf.mxu0  ;;  %3527 = vmatmul.bf16.gmra.mxu2 %v3402_v33  ;;  %v3749_v19 = vadd.f32 %v3669_v13, %v3563_v55  ;;  %v3111_v10 = vpop.f32.mrf.mxu1  ;;  %v3024_v55 = vsel %vm7445_vm3, %v6347_v15, 0  ;;  %v7448_v13 = vunpack.c.l.b16 %v7447_v63  ;;  %v7449_v33 = vld [vmem:[#allocation43_spill] sm:$0xff]  ;;  %v3403_v15 = vsel %vm7451_vm0, %v3339_v17, 0 }
 0x21d   : > { %v7450_v25 = vunpack.c.l.b16 %v7449_v33  ;;  %v3187_v63 = vadd.f32 %v3111_v10, %v6344_v2  ;;  %v3791_v2 = vsel %vm7445_vm3, %v6391_v27, 0  ;;  %vm7477_vm3 = vmmov %vm7464_vm5 }
 0x21e   : > { %v3950_v12 = vadd.f32 %v3870_v20, %v3749_v19 }
 0x21f   : > { %v3488_v22 = vpop.f32.mrf.mxu2  ;;  %v3228_v28 = vpack.c.b16 %v7450_v25, %v7448_v13 }
 0x220   : > { %v4083_v26 = vmul.f32 %v3950_v12, %v3950_v12 }
 0x221   : > { %v3341_v39 = vshrl.u32 %v3228_v28, 16 }
 0x223   : > { %v3671_v46 = vpop.f32.mrf.mxu3 }
 0x224   : > { %v3750_v62 = vadd.f32 %v3671_v46, %v3564_v18  ;;  %v3875_v9 = vpop.f32.mrf.mxu0  ;;  %v3114_v20 = vpop.f32.mrf.mxu1  ;;  %v3344_v18 = vshll.u32 %v3228_v28, 16 }
 0x225   : > { %v3188_v28 = vadd.f32 %v3114_v20, %v6376_v8  ;;  %v7459_v20 = vld [vmem:[#allocation19_spill] sm:$0xff] }
 0x226   : > { %v3951_v50 = vadd.f32 %v3872_v51, %v3750_v62  ;;  %v3565_v51 = vadd.f32 %v3488_v22, %v3186_v59  ;;  %3153 = vmatmul.bf16.gmra.mxu1 %v3024_v55  ;;  %v3346_v22 = vrot.slane %v3344_v18, 4 }
 0x227   : > { %3914 = vmatmul.bf16.gmra.mxu0 %v3790_v7  ;;  %v3490_v19 = vpop.f32.mrf.mxu2 }
 0x228   : > { %v4874_v4 = vpack.c.bf16 %v3951_v50, %v3950_v12  ;;  %v4046_v35 = vadd.f32 %v3951_v50, %v3950_v12  ;;  %v4084_v52 = vmul.f32 %v3951_v50, %v3951_v50  ;;  %3713 = vmatmul.bf16.gmra.mxu3 %v5328_v6  ;;  %v3343_v6 = vrot.slane %v3341_v39, 3 }
 0x229   : > { %v3566_v13 = vadd.f32 %v3490_v19, %v3187_v63 }
 0x22a   : > { %4875 = vst [vmem:[%s6759_s20] sm:$0xff] %v4874_v4   ;;  %v4115_v53 = vadd.f32 %v4084_v52, %v4083_v26  ;;  %v3347_v25 = vor.u32 %v3346_v22, %v3343_v6  ;;  %v7452_v4 = vld [vmem:[#allocation85_spill] sm:$0xff] }
 0x22b   : > { %v3674_v1 = vpop.f32.mrf.mxu3  ;;  %vm7453_vm8 = vnez %v7452_v4 }
 0x22c   : > { %v3751_v46 = vadd.f32 %v3674_v1, %v3565_v51  ;;  %v3877_v12 = vpop.f32.mrf.mxu0  ;;  %3532 = vmatmul.bf16.gmra.mxu2 %v3403_v15  ;;  %v3116_v50 = vpop.f32.mrf.mxu1  ;;  %v3348_v52 = vsel %vm7454_vm12, %v3338_v45, %v3347_v25  ;;  %v7455_v51 = vld [vmem:[#allocation44_spill] sm:$0xff] }
 0x22d   : > { %v7456_v19 = vunpack.c.l.b16 %v7455_v51  ;;  %v3404_v45 = vsel %vm7294_vm11, %v3348_v52, 0 }
 0x22e   : > { %v3952_v62 = vadd.f32 %v3875_v9, %v3751_v46 }
 0x22f   : > { %v3493_v26 = vpop.f32.mrf.mxu2 }
 0x230   : > { %v4047_v59 = vadd.f32 %v4046_v35, %v3952_v62  ;;  %v4085_v7 = vmul.f32 %v3952_v62, %v3952_v62  ;;  %v3025_v35 = vsel %vm7453_vm8, %v6391_v27, 0  ;;  %v3567_v46 = vadd.f32 %v3493_v26, %v3188_v28 }
 0x232   : > { %v4116_v55 = vadd.f32 %v4115_v53, %v4085_v7  ;;  %v7457_v53 = vld [vmem:[#allocation50_spill] sm:$0xff] }
 0x233   : > { %v3676_v33 = vpop.f32.mrf.mxu3  ;;  %v7458_v1 = vunpack.c.l.b16 %v7457_v53 }
 0x234   : > { %v3752_v47 = vadd.f32 %v3676_v33, %v3566_v13  ;;  %v3880_v9 = vpop.f32.mrf.mxu0  ;;  %v3119_v10 = vpop.f32.mrf.mxu1  ;;  %v7461_v33 = vld [vmem:[#allocation25_spill] sm:$0xff] }
 0x235   : > { %v3229_v15 = vpack.c.b16 %v7458_v1, %v7456_v19 }
 0x236   : > { %v3953_v17 = vadd.f32 %v3877_v12, %v3752_v47  ;;  %3158 = vmatmul.bf16.gmra.mxu1 %v3025_v35 }
 0x237   : > { %3919 = vmatmul.bf16.gmra.mxu0 %v3791_v2  ;;  %v3495_v34 = vpop.f32.mrf.mxu2  ;;  %v3350_v6 = vshrl.u32 %v3229_v15, 16  ;;  %v3353_v22 = vshll.u32 %v3229_v15, 16  ;;  %v3190_v15 = vadd.f32 %v3119_v10, %v6406_v56  ;;  %v7467_v56 = vld [vmem:[#allocation32_spill] sm:$0xff] }
 0x238   : > { %v4879_v39 = vpack.c.bf16 %v3953_v17, %v3952_v62  ;;  %v4048_v18 = vadd.f32 %v4047_v59, %v3953_v17  ;;  %v4086_v8 = vmul.f32 %v3953_v17, %v3953_v17  ;;  %3718 = vmatmul.bf16.gmra.mxu3 %v7459_v20  ;;  %v3189_v62 = vadd.f32 %v3116_v50, %v7461_v33 }
 0x239   : > { %v3352_v17 = vrot.slane %v3350_v6, 3  ;;  %v3355_v26 = vrot.slane %v3353_v22, 4  ;;  %v3792_v50 = vsel %vm7453_vm8, %v6424_v61, 0 }
 0x23a   : > { %4966 = vst [vmem:[%s6759_s20 + $0x8] sm:$0xff] %v4879_v39   ;;  %v4117_v63 = vadd.f32 %v4116_v55, %v4086_v8  ;;  %v3568_v51 = vadd.f32 %v3495_v34, %v3189_v62  ;;  %v7462_v8 = vld [vmem:[#allocation86_spill] sm:$0xff] }
 0x23b   : > { %v3679_v12 = vpop.f32.mrf.mxu3  ;;  %v3356_v53 = vor.u32 %v3355_v26, %v3352_v17  ;;  %vm7463_vm11 = vnez %v7462_v8 }
 0x23c   : > { %v3753_v7 = vadd.f32 %v3679_v12, %v3567_v46  ;;  %v3882_v59 = vpop.f32.mrf.mxu0  ;;  %3537 = vmatmul.bf16.gmra.mxu2 %v3404_v45  ;;  %v3121_v47 = vpop.f32.mrf.mxu1  ;;  %v7465_v46 = vld [vmem:[#allocation51_spill] sm:$0xff] }
 0x23d   : > { %v3357_v20 = vsel %vm7464_vm5, %v3347_v25, %v3356_v53  ;;  %v7466_v34 = vunpack.c.l.b16 %v7465_v46 }
 0x23e   : > { %v3954_v13 = vadd.f32 %v3880_v9, %v3753_v7  ;;  %v7468_v7 = vld [vmem:[#allocation22_spill] sm:$0xff] }
 0x23f   : > { %v3498_v55 = vpop.f32.mrf.mxu2  ;;  %vm7469_vm10 = vnez %v7468_v7 }
 0x240   : > { %v4049_v28 = vadd.f32 %v4048_v18, %v3954_v13  ;;  %v4087_v2 = vmul.f32 %v3954_v13, %v3954_v13  ;;  %v3026_v18 = vsel %vm7463_vm11, %v6424_v61, 0  ;;  %v3569_v10 = vadd.f32 %v3498_v55, %v3190_v15 }
 0x241   : > { %v3405_v61 = vsel %vm7469_vm10, %v3357_v20, 0 }
 0x242   : > { %v4118_v35 = vadd.f32 %v4117_v63, %v4087_v2  ;;  %v3230_v63 = vpack.c.b16 %v6484_v37, %v7466_v34  ;;  %v7470_v37 = vld [vmem:[#allocation45_spill] sm:$0xff]  ;;  %v7471_v34 = vld [vmem:[#allocation34_spill] sm:$0xff] }
 0x243   : > { %v3681_v19 = vpop.f32.mrf.mxu3  ;;  %vm7472_vm1 = vnez %v7471_v34 }
 0x244   : > { %v3754_v1 = vadd.f32 %v3681_v19, %v3568_v51  ;;  %v3885_v9 = vpop.f32.mrf.mxu0  ;;  %v3124_v39 = vpop.f32.mrf.mxu1  ;;  %v3359_v25 = vshrl.u32 %v3230_v63, 16  ;;  %v3362_v33 = vshll.u32 %v3230_v63, 16  ;;  %v3027_v63 = vsel %vm7472_vm1, %v6474_v43, 0 }
 0x245   : > { %v3192_v20 = vadd.f32 %v3124_v39, %v6457_v14 }
 0x246   : > { %v3955_v52 = vadd.f32 %v3882_v59, %v3754_v1  ;;  %3163 = vmatmul.bf16.gmra.mxu1 %v3026_v18  ;;  %v3364_v2 = vrot.slane %v3362_v33, 4 }
 0x247   : > { %3924 = vmatmul.bf16.gmra.mxu0 %v3792_v50  ;;  %v3500_v4 = vpop.f32.mrf.mxu2 }
 0x248   : > { %v4884_v12 = vpack.c.bf16 %v3955_v52, %v3954_v13  ;;  %v4050_v27 = vadd.f32 %v4049_v28, %v3955_v52  ;;  %v4088_v45 = vmul.f32 %v3955_v52, %v3955_v52  ;;  %3723 = vmatmul.bf16.gmra.mxu3 %v7467_v56  ;;  %v3191_v13 = vadd.f32 %v3121_v47, %v7470_v37 }
 0x249   : > { %v3361_v28 = vrot.slane %v3359_v25, 3  ;;  %v3793_v47 = vsel %vm7463_vm11, %v6474_v43, 0 }
 0x24a   : > { %4967 = vst [vmem:[%s6759_s20 + $0x10] sm:$0xff] %v4884_v12   ;;  %v4119_v6 = vadd.f32 %v4118_v35, %v4088_v45  ;;  %v3570_v19 = vadd.f32 %v3500_v4, %v3191_v13 }
 0x24b   : > { %v3684_v22 = vpop.f32.mrf.mxu3  ;;  %v3365_v15 = vor.u32 %v3364_v2, %v3361_v28 }
 0x24c   : > { %v3755_v62 = vadd.f32 %v3684_v22, %v3569_v10  ;;  %v3887_v17 = vpop.f32.mrf.mxu0  ;;  %3542 = vmatmul.bf16.gmra.mxu2 %v3405_v61  ;;  %v3126_v26 = vpop.f32.mrf.mxu1 }
 0x24d   : > { %v3366_v12 = vsel %vm7473_vm14, %v3356_v53, %v3365_v15 }
 0x24e   : > { %v3956_v59 = vadd.f32 %v3885_v9, %v3755_v62  ;;  %v3406_v43 = vsel %vm7474_vm13, %v3366_v12, 0 }
 0x24f   : > { %v3503_v35 = vpop.f32.mrf.mxu2 }
 0x250   : > { %v4051_v51 = vadd.f32 %v4050_v27, %v3956_v59  ;;  %v4089_v55 = vmul.f32 %v3956_v59, %v3956_v59  ;;  %v3231_v27 = vpack.c.b16 %v6494_v60, %v6494_v60  ;;  %v3571_v14 = vadd.f32 %v3503_v35, %v3192_v20 }
 0x251   : > { %v3193_v60 = vadd.f32 %v3126_v26, %v6471_v36 }
 0x252   : > { %v4120_v1 = vadd.f32 %v4119_v6, %v4089_v55  ;;  %v3368_v6 = vshrl.u32 %v3231_v27, 16  ;;  %v3371_v53 = vshll.u32 %v3231_v27, 16 }
 0x253   : > { %v3686_v52 = vpop.f32.mrf.mxu3 }
 0x254   : > { %v3756_v50 = vadd.f32 %v3686_v52, %v3570_v19  ;;  %v3890_v9 = vpop.f32.mrf.mxu0  ;;  %v3129_v46 = vpop.f32.mrf.mxu1  ;;  %v6824_v62 = vrot.slane %v3368_v6, 3 }
 0x255   : > { %v3194_v19 = vadd.f32 %v3129_v46, %v6496_v30 }
 0x256   : > { %v3957_v18 = vadd.f32 %v3887_v17, %v3756_v50  ;;  %3168 = vmatmul.bf16.gmra.mxu1 %v3027_v63 }
 0x257   : > { %3929 = vmatmul.bf16.gmra.mxu0 %v3793_v47  ;;  %v3505_v39 = vpop.f32.mrf.mxu2 }
 0x258   : > { %v4889_v45 = vpack.c.bf16 %v3957_v18, %v3956_v59  ;;  %v4052_v56 = vadd.f32 %v4051_v51, %v3957_v18  ;;  %v4090_v10 = vmul.f32 %v3957_v18, %v3957_v18  ;;  %3728 = vmatmul.bf16.gmra.mxu3 %v7301_v38  ;;  %v7475_v38 = vshll.u32 %v6500_v3, 16 }
 0x259   : > { %v3373_v59 = vrot.slane %v3371_v53, 4  ;;  %v3572_v17 = vadd.f32 %v3505_v39, %v3193_v60  ;;  %v7479_v53 = vld [vmem:[#allocation53_spill] sm:$0xff] }
 0x25a   : > { %4968 = vst [vmem:[%s6759_s20 + $0x18] sm:$0xff] %v4889_v45   ;;  %v4121_v8 = vadd.f32 %v4120_v1, %v4090_v10  ;;  %v3008_v25 = vrot.slane %v7475_v38, 1  ;;  %vm7480_vm7 = vnez %v7479_v53 }
 0x25b   : > { %v3689_v4 = vpop.f32.mrf.mxu3  ;;  %v3374_v36 = vor.u32 %v3373_v59, %v6824_v62 }
 0x25c   : > { %v3757_v22 = vadd.f32 %v3689_v4, %v3571_v14  ;;  %v3892_v61 = vpop.f32.mrf.mxu0  ;;  %3547 = vmatmul.bf16.gmra.mxu2 %v3406_v43  ;;  %v3131_v33 = vpop.f32.mrf.mxu1  ;;  %v3009_v51 = vsel %vm7476_vm9, %v6504_v23, %v3008_v25 }
 0x25d   : > { %v3794_v1 = vsel %vm7472_vm1, %v3009_v51, 0  ;;  %v3028_v50 = vsel %vm6478_vm2, %v3009_v51, 0  ;;  %v3375_v18 = vsel %vm7477_vm3, %v3365_v15, %v3374_v36  ;;  %v3195_v45 = vadd.f32 %v3131_v33, %v6513_v49  ;;  %v7481_v33 = vld [vmem:[#allocation37_spill] sm:$0xff] }
 0x25e   : > { %v3958_v7 = vadd.f32 %v3890_v9, %v3757_v22  ;;  %v3407_v34 = vsel %vm7320_vm15, %v3375_v18, 0  ;;  %vm7482_vm15 = vnez %v7481_v33  ;;  %v7483_v33 = vld [vmem:[#allocation33_spill] sm:$0xff] }
 0x25f   : > { %v3508_v42 = vpop.f32.mrf.mxu2  ;;  %v3392_v59 = vsel %vm7482_vm15, %v6824_v62, 0 }
 0x260   : > { %v4053_v37 = vadd.f32 %v4052_v56, %v3958_v7  ;;  %v4091_v13 = vmul.f32 %v3958_v7, %v3958_v7  ;;  %v3573_v47 = vadd.f32 %v3508_v42, %v3194_v19  ;;  %v7478_v56 = vshrl.u32 %v6500_v3, 16 }
 0x261   : > { %v3408_v41 = vsel %vm7326_vm6, %v3392_v59, 0 }
 0x262   : > { %v4122_v28 = vadd.f32 %v4121_v8, %v4091_v13  ;;  %v3010_v10 = vor.u32 %v3008_v25, %v7478_v56 }
 0x263   : > { %v3691_v2 = vpop.f32.mrf.mxu3 }
 0x264   : > { %v3758_v26 = vadd.f32 %v3691_v2, %v3572_v17  ;;  %v3895_v35 = vpop.f32.mrf.mxu0  ;;  %v3134_v52 = vpop.f32.mrf.mxu1  ;;  %v3013_v48 = vsel %vm7480_vm7, %v3010_v10, 0 }
 0x265   : > { %v3196_v49 = vadd.f32 %v3134_v52, %v6534_v21  ;;  %v3029_v25 = vsel %vm6519_vm4, %v3013_v48, 0 }
 0x266   : > { %v3959_v55 = vadd.f32 %v3892_v61, %v3758_v26  ;;  %3173 = vmatmul.bf16.gmra.mxu1 %v3028_v50  ;;  %v3795_v61 = vsel %vm6478_vm2, %v3013_v48, 0  ;;  %vm7493_vm2 = vcmask 1040384  }
 0x267   : > { %3934 = vmatmul.bf16.gmra.mxu0 %v3794_v1  ;;  %v3510_v63 = vpop.f32.mrf.mxu2 }
 0x268   : > { %v4894_v20 = vpack.c.bf16 %v3959_v55, %v3958_v7  ;;  %v4054_v9 = vadd.f32 %v4053_v37, %v3959_v55  ;;  %v4092_v23 = vmul.f32 %v3959_v55, %v3959_v55  ;;  %3733 = vmatmul.bf16.gmra.mxu3 %v5852_v32  ;;  %v3574_v8 = vadd.f32 %v3510_v63, %v3195_v45 }
 0x26a   : > { %4969 = vst [vmem:[%s6759_s20 + $0x20] sm:$0xff] %v4894_v20   ;;  %v4123_v30 = vadd.f32 %v4122_v28, %v4092_v23 }
 0x26b   : > { %v3694_v46 = vpop.f32.mrf.mxu3 }
 0x26c   : > { %v3759_v12 = vadd.f32 %v3694_v46, %v3573_v47  ;;  %v3897_v15 = vpop.f32.mrf.mxu0  ;;  %3552 = vmatmul.bf16.gmra.mxu2 %v3407_v34  ;;  %v3136_v32 = vpop.f32.mrf.mxu1 }
 0x26d   : > { %v3197_v36 = vadd.f32 %v3136_v32, %v6542_v29 }
 0x26e   : > { %v3960_v27 = vadd.f32 %v3895_v35, %v3759_v12 }
 0x26f   : > { %v3513_v4 = vpop.f32.mrf.mxu2 }
 0x270   : > { %v4055_v14 = vadd.f32 %v4054_v9, %v3960_v27  ;;  %v4093_v39 = vmul.f32 %v3960_v27, %v3960_v27  ;;  %v3575_v42 = vadd.f32 %v3513_v4, %v3196_v49 }
 0x272   : > { %v4124_v43 = vadd.f32 %v4123_v30, %v4093_v39 }
 0x273   : > { %v3696_v6 = vpop.f32.mrf.mxu3 }
 0x274   : > { %v3760_v22 = vadd.f32 %v3696_v6, %v3574_v8  ;;  %v3900_v60 = vpop.f32.mrf.mxu0  ;;  %v3139_v38 = vpop.f32.mrf.mxu1 }
 0x275   : > { %v3198_v20 = vadd.f32 %v3139_v38, %v6557_v58 }
 0x276   : > { %v3961_v7 = vadd.f32 %v3897_v15, %v3760_v22  ;;  %3178 = vmatmul.bf16.gmra.mxu1 %v3029_v25 }
 0x277   : > { %3939 = vmatmul.bf16.gmra.mxu0 %v3795_v61  ;;  %v3515_v21 = vpop.f32.mrf.mxu2 }
 0x278   : > { %v4899_v37 = vpack.c.bf16 %v3961_v7, %v3960_v27  ;;  %v4056_v13 = vadd.f32 %v4055_v14, %v3961_v7  ;;  %v4094_v17 = vmul.f32 %v3961_v7, %v3961_v7  ;;  %3738 = vmatmul.bf16.gmra.mxu3 %v6500_v3  ;;  %v3576_v3 = vadd.f32 %v3515_v21, %v3197_v36 }
 0x27a   : > { %4970 = vst [vmem:[%s6759_s20 + $0x28] sm:$0xff] %v4899_v37   ;;  %v4125_v28 = vadd.f32 %v4124_v43, %v4094_v17 }
 0x27b   : > { %v3699_v24 = vpop.f32.mrf.mxu3 }
 0x27c   : > { %v3761_v2 = vadd.f32 %v3699_v24, %v3575_v42  ;;  %v3902_v62 = vpop.f32.mrf.mxu0  ;;  %3557 = vmatmul.bf16.gmra.mxu2 %v3408_v41  ;;  %v3141_v26 = vpop.f32.mrf.mxu1 }
 0x27d   : > { %v3199_v45 = vadd.f32 %v3141_v26, %v6566_v11 }
 0x27e   : > { %v3962_v51 = vadd.f32 %v3900_v60, %v3761_v2 }
 0x27f   : > { %v3518_v35 = vpop.f32.mrf.mxu2 }
 0x280   : > { %v4057_v55 = vadd.f32 %v4056_v13, %v3962_v51  ;;  %v4095_v19 = vmul.f32 %v3962_v51, %v3962_v51  ;;  %v3577_v29 = vadd.f32 %v3518_v35, %v3198_v20 }
 0x282   : > { %v4126_v1 = vadd.f32 %v4125_v28, %v4095_v19 }
 0x283   : > { %v3701_v52 = vpop.f32.mrf.mxu3 }
 0x284   : > { %v3762_v50 = vadd.f32 %v3701_v52, %v3576_v3  ;;  %v3905_v40 = vpop.f32.mrf.mxu0  ;;  %v3144_v9 = vpop.f32.mrf.mxu1 }
 0x286   : > { %v3963_v18 = vadd.f32 %v3902_v62, %v3762_v50 }
 0x287   : > { %3944 = vmatmul.bf16.gmra.mxu0 %v7141_v0  ;;  %v3520_v30 = vpop.f32.mrf.mxu2 }
 0x288   : > { %v4904_v23 = vpack.c.bf16 %v3963_v18, %v3962_v51  ;;  %v4058_v47 = vadd.f32 %v4057_v55, %v3963_v18  ;;  %v4096_v63 = vmul.f32 %v3963_v18, %v3963_v18  ;;  %3743 = vmatmul.bf16.gmra.mxu3 %v7141_v0  ;;  %v3578_v32 = vadd.f32 %v3520_v30, %v3199_v45  ;;  %v7484_v51 = vld [vmem:[#allocation47_spill] sm:$0xff] }
 0x289   : > { %v3200_v0 = vadd.f32 %v3144_v9, %v6580_v54 }
 0x28a   : > { %4971 = vst [vmem:[%s6759_s20 + $0x30] sm:$0xff] %v4904_v23   ;;  %v4127_v46 = vadd.f32 %v4126_v1, %v4096_v63 }
 0x28b   : > { %v3704_v34 = vpop.f32.mrf.mxu3 }
 0x28c   : > { %v3763_v12 = vadd.f32 %v3704_v34, %v3577_v29  ;;  %v3907_v15 = vpop.f32.mrf.mxu0  ;;  %v3146_v58 = vpop.f32.mrf.mxu1 }
 0x28d   : > { %v3201_v59 = vadd.f32 %v3146_v58, %v7483_v33 }
 0x28e   : > { %v3964_v27 = vadd.f32 %v3905_v40, %v3763_v12  ;;  %v7485_v40 = vld [vmem:[#allocation54_spill] sm:$0xff] }
 0x28f   : > { %v3523_v14 = vpop.f32.mrf.mxu2 }
 0x290   : > { %v4059_v56 = vadd.f32 %v4058_v47, %v3964_v27  ;;  %v4097_v10 = vmul.f32 %v3964_v27, %v3964_v27  ;;  %v3579_v49 = vadd.f32 %v3523_v14, %v3200_v0 }
 0x292   : > { %v4128_v39 = vadd.f32 %v4127_v46, %v4097_v10 }
 0x293   : > { %v3706_v8 = vpop.f32.mrf.mxu3 }
 0x294   : > { %v3764_v4 = vadd.f32 %v3706_v8, %v3578_v32  ;;  %v3910_v6 = vpop.f32.mrf.mxu0  ;;  %v3149_v53 = vpop.f32.mrf.mxu1 }
 0x295   : > { %v3202_v36 = vadd.f32 %v3149_v53, %v7484_v51 }
 0x296   : > { %v3965_v43 = vadd.f32 %v3907_v15, %v3764_v4  ;;  %v7486_v15 = vld [vmem:[#allocation2_spill] sm:$0xff] }
 0x297   : > { %v3525_v11 = vpop.f32.mrf.mxu2 }
 0x298   : > { %v4909_v48 = vpack.c.bf16 %v3965_v43, %v3964_v27  ;;  %v4060_v22 = vadd.f32 %v4059_v56, %v3965_v43  ;;  %v4098_v7 = vmul.f32 %v3965_v43, %v3965_v43  ;;  %v3580_v54 = vadd.f32 %v3525_v11, %v3201_v59 }
 0x29a   : > { %4972 = vst [vmem:[%s6759_s20 + $0x38] sm:$0xff] %v4909_v48   ;;  %v4129_v60 = vadd.f32 %v4128_v39, %v4098_v7  ;;  %v7487_v48 = vld [vmem:[#allocation3_spill] sm:$0xff] }
 0x29b   : > { %v3709_v61 = vpop.f32.mrf.mxu3 }
 0x29c   : > { %v3765_v38 = vadd.f32 %v3709_v61, %v3579_v49  ;;  %v3912_v37 = vpop.f32.mrf.mxu0  ;;  %v3151_v13 = vpop.f32.mrf.mxu1 }
 0x29d   : > { %v3203_v9 = vadd.f32 %v3151_v13, %v7485_v40  ;;  %v7488_v13 = vld [vmem:[#allocation46_spill] sm:$0xff] }
 0x29e   : > { %v3966_v25 = vadd.f32 %v3910_v6, %v3765_v38 }
 0x29f   : > { %v3528_v21 = vpop.f32.mrf.mxu2 }
 0x2a0   : > { %v4061_v17 = vadd.f32 %v4060_v22, %v3966_v25  ;;  %v4099_v42 = vmul.f32 %v3966_v25, %v3966_v25  ;;  %v3581_v35 = vadd.f32 %v3528_v21, %v3202_v36 }
 0x2a2   : > { %v4130_v28 = vadd.f32 %v4129_v60, %v4099_v42 }
 0x2a3   : > { %v3711_v24 = vpop.f32.mrf.mxu3 }
 0x2a4   : > { %v3766_v41 = vadd.f32 %v3711_v24, %v3580_v54  ;;  %v3915_v62 = vpop.f32.mrf.mxu0  ;;  %v3154_v26 = vpop.f32.mrf.mxu1 }
 0x2a5   : > { %v3204_v58 = vadd.f32 %v3154_v26, %v7486_v15 }
 0x2a6   : > { %v3967_v2 = vadd.f32 %v3912_v37, %v3766_v41 }
 0x2a7   : > { %v3530_v1 = vpop.f32.mrf.mxu2 }
 0x2a8   : > { %v4914_v55 = vpack.c.bf16 %v3967_v2, %v3966_v25  ;;  %v4062_v19 = vadd.f32 %v4061_v17, %v3967_v2  ;;  %v4100_v3 = vmul.f32 %v3967_v2, %v3967_v2  ;;  %v3582_v30 = vadd.f32 %v3530_v1, %v3203_v9 }
 0x2aa   : > { %4973 = vst [vmem:[%s6759_s20 + $0x40] sm:$0xff] %v4914_v55   ;;  %v4131_v52 = vadd.f32 %v4130_v28, %v4100_v3  ;;  %v7489_v55 = vld [vmem:[#allocation56_spill] sm:$0xff] }
 0x2ab   : > { %v3714_v50 = vpop.f32.mrf.mxu3 }
 0x2ac   : > { %v3767_v18 = vadd.f32 %v3714_v50, %v3581_v35  ;;  %v3917_v23 = vpop.f32.mrf.mxu0  ;;  %v3156_v47 = vpop.f32.mrf.mxu1 }
 0x2ad   : > { %v3205_v22 = vadd.f32 %v3156_v47, %v7487_v48  ;;  %v7490_v47 = vld [vmem:[#allocation4_spill] sm:$0xff] }
 0x2ae   : > { %v3968_v20 = vadd.f32 %v3915_v62, %v3767_v18 }
 0x2af   : > { %v3533_v46 = vpop.f32.mrf.mxu2 }
 0x2b0   : > { %v4063_v63 = vadd.f32 %v4062_v19, %v3968_v20  ;;  %v4101_v29 = vmul.f32 %v3968_v20, %v3968_v20  ;;  %v3583_v8 = vadd.f32 %v3533_v46, %v3204_v58 }
 0x2b2   : > { %v4132_v34 = vadd.f32 %v4131_v52, %v4101_v29 }
 0x2b3   : > { %v3716_v12 = vpop.f32.mrf.mxu3 }
 0x2b4   : > { %v3768_v27 = vadd.f32 %v3716_v12, %v3582_v30  ;;  %v3920_v56 = vpop.f32.mrf.mxu0  ;;  %v3159_v10 = vpop.f32.mrf.mxu1 }
 0x2b5   : > { %v3206_v17 = vadd.f32 %v3159_v10, %v7488_v13 }
 0x2b6   : > { %v3969_v45 = vadd.f32 %v3917_v23, %v3768_v27 }
 0x2b7   : > { %v3535_v4 = vpop.f32.mrf.mxu2 }
 0x2b8   : > { %v4919_v32 = vpack.c.bf16 %v3969_v45, %v3968_v20  ;;  %v4064_v14 = vadd.f32 %v4063_v63, %v3969_v45  ;;  %v4102_v39 = vmul.f32 %v3969_v45, %v3969_v45  ;;  %v3584_v61 = vadd.f32 %v3535_v4, %v3205_v22 }
 0x2ba   : > { %4974 = vst [vmem:[%s6759_s20 + $0x48] sm:$0xff] %v4919_v32   ;;  %v4133_v43 = vadd.f32 %v4132_v34, %v4102_v39  ;;  %v7491_v32 = vld [vmem:[#allocation20_spill] sm:$0xff] }
 0x2bb   : > { %v3719_v0 = vpop.f32.mrf.mxu3 }
 0x2bc   : > { %v3769_v6 = vadd.f32 %v3719_v0, %v3583_v8  ;;  %v3922_v7 = vpop.f32.mrf.mxu0  ;;  %v3161_v49 = vpop.f32.mrf.mxu1 }
 0x2bd   : > { %v3207_v19 = vadd.f32 %v3161_v49, %v7489_v55 }
 0x2be   : > { %v3970_v53 = vadd.f32 %v3920_v56, %v3769_v6 }
 0x2bf   : > { %v3538_v38 = vpop.f32.mrf.mxu2 }
 0x2c0   : > { %v4065_v11 = vadd.f32 %v4064_v14, %v3970_v53  ;;  %v4103_v60 = vmul.f32 %v3970_v53, %v3970_v53  ;;  %v3585_v41 = vadd.f32 %v3538_v38, %v3206_v17 }
 0x2c2   : > { %v4134_v25 = vadd.f32 %v4133_v43, %v4103_v60 }
 0x2c3   : > { %v3721_v33 = vpop.f32.mrf.mxu3 }
 0x2c4   : > { %v3770_v59 = vadd.f32 %v3721_v33, %v3584_v61  ;;  %v3925_v42 = vpop.f32.mrf.mxu0  ;;  %v3164_v54 = vpop.f32.mrf.mxu1 }
 0x2c5   : > { %v3208_v63 = vadd.f32 %v3164_v54, %v7490_v47 }
 0x2c6   : > { %v3971_v37 = vadd.f32 %v3922_v7, %v3770_v59 }
 0x2c7   : > { %v3540_v2 = vpop.f32.mrf.mxu2 }
 0x2c8   : > { %v4924_v21 = vpack.c.bf16 %v3971_v37, %v3970_v53  ;;  %v4066_v28 = vadd.f32 %v4065_v11, %v3971_v37  ;;  %v4104_v24 = vmul.f32 %v3971_v37, %v3971_v37  ;;  %v3586_v50 = vadd.f32 %v3540_v2, %v3207_v19 }
 0x2ca   : > { %4975 = vst [vmem:[%s6759_s20 + $0x50] sm:$0xff] %v4924_v21   ;;  %v4135_v51 = vadd.f32 %v4134_v25, %v4104_v24 }
 0x2cb   : > { %v3724_v36 = vpop.f32.mrf.mxu3 }
 0x2cc   : > { %v3771_v62 = vadd.f32 %v3724_v36, %v3585_v41  ;;  %v3927_v3 = vpop.f32.mrf.mxu0  ;;  %v3166_v35 = vpop.f32.mrf.mxu1 }
 0x2cd   : > { %v3209_v14 = vadd.f32 %v3166_v35, %v7491_v32 }
 0x2ce   : > { %v3972_v26 = vadd.f32 %v3925_v42, %v3771_v62 }
 0x2cf   : > { %v3543_v18 = vpop.f32.mrf.mxu2 }
 0x2d0   : > { %v4067_v1 = vadd.f32 %v4066_v28, %v3972_v26  ;;  %v4105_v52 = vmul.f32 %v3972_v26, %v3972_v26  ;;  %v3587_v12 = vadd.f32 %v3543_v18, %v3208_v63 }
 0x2d2   : > { %v4136_v20 = vadd.f32 %v4135_v51, %v4105_v52 }
 0x2d3   : > { %v3726_v40 = vpop.f32.mrf.mxu3 }
 0x2d4   : > { %v3772_v9 = vadd.f32 %v3726_v40, %v3586_v50  ;;  %v3930_v29 = vpop.f32.mrf.mxu0  ;;  %v3169_v27 = vpop.f32.mrf.mxu1 }
 0x2d5   : > { %v3210_v49 = vadd.f32 %v3169_v27, %v6692_v44 }
 0x2d6   : > { %v3973_v23 = vadd.f32 %v3927_v3, %v3772_v9 }
 0x2d7   : > { %v3545_v45 = vpop.f32.mrf.mxu2 }
 0x2d8   : > { %v4929_v30 = vpack.c.bf16 %v3973_v23, %v3972_v26  ;;  %v4068_v46 = vadd.f32 %v4067_v1, %v3973_v23  ;;  %v4106_v34 = vmul.f32 %v3973_v23, %v3973_v23  ;;  %v3588_v43 = vadd.f32 %v3545_v45, %v3209_v14 }
 0x2da   : > { %4976 = vst [vmem:[%s6759_s20 + $0x58] sm:$0xff] %v4929_v30   ;;  %v4137_v15 = vadd.f32 %v4136_v20, %v4106_v34 }
 0x2db   : > { %v3729_v58 = vpop.f32.mrf.mxu3 }
 0x2dc   : > { %v3773_v56 = vadd.f32 %v3729_v58, %v3587_v12  ;;  %v3932_v39 = vpop.f32.mrf.mxu0  ;;  %v3171_v53 = vpop.f32.mrf.mxu1 }
 0x2dd   : > { %v3211_v54 = vadd.f32 %v3171_v53, %v6698_v16 }
 0x2de   : > { %v3974_v10 = vadd.f32 %v3930_v29, %v3773_v56 }
 0x2df   : > { %v3548_v0 = vpop.f32.mrf.mxu2 }
 0x2e0   : > { %v4069_v8 = vadd.f32 %v4068_v46, %v3974_v10  ;;  %v4107_v4 = vmul.f32 %v3974_v10, %v3974_v10  ;;  %v3589_v25 = vadd.f32 %v3548_v0, %v3210_v49  ;;  %v7492_v0 = vld [vmem:[#allocation38_spill] sm:$0xff] }
 0x2e2   : > { %v4138_v6 = vadd.f32 %v4137_v15, %v4107_v4 }
 0x2e3   : > { %v3731_v48 = vpop.f32.mrf.mxu3 }
 0x2e4   : > { %v3774_v22 = vadd.f32 %v3731_v48, %v3588_v43  ;;  %v3935_v11 = vpop.f32.mrf.mxu0  ;;  %v3174_v17 = vpop.f32.mrf.mxu1 }
 0x2e5   : > { %v3212_v26 = vadd.f32 %v3174_v17, %v6712_v31 }
 0x2e6   : > { %v3975_v7 = vadd.f32 %v3932_v39, %v3774_v22 }
 0x2e7   : > { %v3550_v33 = vpop.f32.mrf.mxu2 }
 0x2e8   : > { %v4934_v60 = vpack.c.bf16 %v3975_v7, %v3974_v10  ;;  %v4070_v61 = vadd.f32 %v4069_v8, %v3975_v7  ;;  %v4108_v38 = vmul.f32 %v3975_v7, %v3975_v7  ;;  %v3590_v41 = vadd.f32 %v3550_v33, %v3211_v54 }
 0x2ea   : > { %4977 = vst [vmem:[%s6759_s20 + $0x60] sm:$0xff] %v4934_v60   ;;  %v4139_v59 = vadd.f32 %v4138_v6, %v4108_v38 }
 0x2eb   : > { %v3734_v37 = vpop.f32.mrf.mxu3 }
 0x2ec   : > { %v3775_v13 = vadd.f32 %v3734_v37, %v3589_v25  ;;  %v3937_v21 = vpop.f32.mrf.mxu0  ;;  %v3176_v55 = vpop.f32.mrf.mxu1 }
 0x2ed   : > { %v3213_v9 = vadd.f32 %v3176_v55, %v6717_v57 }
 0x2ee   : > { %v3976_v42 = vadd.f32 %v3935_v11, %v3775_v13 }
 0x2ef   : > { %v3553_v44 = vpop.f32.mrf.mxu2 }
 0x2f0   : > { %v4071_v28 = vadd.f32 %v4070_v61, %v3976_v42  ;;  %v4109_v24 = vmul.f32 %v3976_v42, %v3976_v42  ;;  %v3591_v52 = vadd.f32 %v3553_v44, %v3212_v26 }
 0x2f2   : > { %v4140_v2 = vadd.f32 %v4139_v59, %v4109_v24 }
 0x2f3   : > { %v3736_v51 = vpop.f32.mrf.mxu3 }
 0x2f4   : > { %v3776_v36 = vadd.f32 %v3736_v51, %v3590_v41  ;;  %v3940_v19 = vpop.f32.mrf.mxu0  ;;  %v3179_v29 = vpop.f32.mrf.mxu1 }
 0x2f5   : > { %v3214_v45 = vadd.f32 %v3179_v29, %v6730_v5 }
 0x2f6   : > { %v3977_v62 = vadd.f32 %v3937_v21, %v3776_v36 }
 0x2f7   : > { %v3555_v50 = vpop.f32.mrf.mxu2 }
 0x2f8   : > { %v4939_v3 = vpack.c.bf16 %v3977_v62, %v3976_v42  ;;  %v4072_v35 = vadd.f32 %v4071_v28, %v3977_v62  ;;  %v4110_v1 = vmul.f32 %v3977_v62, %v3977_v62  ;;  %v3592_v63 = vadd.f32 %v3555_v50, %v3213_v9 }
 0x2fa   : > { %4978 = vst [vmem:[%s6759_s20 + $0x68] sm:$0xff] %v4939_v3   ;;  %v4141_v16 = vadd.f32 %v4140_v2, %v4110_v1 }
 0x2fb   : > { %v3739_v18 = vpop.f32.mrf.mxu3 }
 0x2fc   : > { %v3777_v20 = vadd.f32 %v3739_v18, %v3591_v52  ;;  %v3942_v31 = vpop.f32.mrf.mxu0  ;;  %v3181_v57 = vpop.f32.mrf.mxu1 }
 0x2fd   : > { %v3215_v6 = vadd.f32 %v3181_v57, %v7492_v0 }
 0x2fe   : > { %v3978_v40 = vadd.f32 %v3940_v19, %v3777_v20 }
 0x2ff   : > { %v3558_v34 = vpop.f32.mrf.mxu2 }
 0x300   : > { %v4073_v23 = vadd.f32 %v4072_v35, %v3978_v40  ;;  %v4111_v47 = vmul.f32 %v3978_v40, %v3978_v40  ;;  %v3593_v10 = vadd.f32 %v3558_v34, %v3214_v45 }
 0x302   : > { %v4142_v30 = vadd.f32 %v4141_v16, %v4111_v47 }
 0x303   : > { %v3741_v46 = vpop.f32.mrf.mxu3 }
 0x304   : > { %v3778_v12 = vadd.f32 %v3741_v46, %v3592_v63  ;;  %v3945_v14 = vpop.f32.mrf.mxu0 }
 0x306   : > { %v3979_v27 = vadd.f32 %v3942_v31, %v3778_v12 }
 0x307   : > { %v3560_v4 = vpop.f32.mrf.mxu2 }
 0x308   : > { %v4944_v15 = vpack.c.bf16 %v3979_v27, %v3978_v40  ;;  %v4074_v58 = vadd.f32 %v4073_v23, %v3979_v27  ;;  %v4112_v56 = vmul.f32 %v3979_v27, %v3979_v27  ;;  %v3594_v22 = vadd.f32 %v3560_v4, %v3215_v6 }
 0x30a   : > { %4979 = vst [vmem:[%s6759_s20 + $0x70] sm:$0xff] %v4944_v15   ;;  %v4143_v32 = vadd.f32 %v4142_v30, %v4112_v56 }
 0x30b   : > { %v3744_v39 = vpop.f32.mrf.mxu3 }
 0x30c   : > { %v3779_v8 = vadd.f32 %v3744_v39, %v3593_v10  ;;  %v3947_v11 = vpop.f32.mrf.mxu0 }
 0x30e   : > { %v3980_v43 = vadd.f32 %v3945_v14, %v3779_v8 }
 0x310   : > { %v4075_v53 = vadd.f32 %v4074_v58, %v3980_v43  ;;  %v4113_v48 = vmul.f32 %v3980_v43, %v3980_v43 }
 0x312   : > { %v4144_v7 = vadd.f32 %v4143_v32, %v4113_v48 }
 0x313   : > { %v3746_v5 = vpop.f32.mrf.mxu3 }
 0x314   : > { %v3780_v49 = vadd.f32 %v3746_v5, %v3594_v22 }
 0x316   : > { %v3981_v60 = vadd.f32 %v3947_v11, %v3780_v49 }
 0x318   : > { %v4949_v61 = vpack.c.bf16 %v3981_v60, %v3980_v43  ;;  %v4076_v38 = vadd.f32 %v4075_v53, %v3981_v60  ;;  %v4114_v25 = vmul.f32 %v3981_v60, %v3981_v60 }
 0x31a   : > { %4980 = vst [vmem:[%s6759_s20 + $0x78] sm:$0xff] %v4949_v61   ;;  %v4077_v33 = vrot.slane %v4076_v38, 4  ;;  %v4145_v59 = vadd.f32 %v4144_v7, %v4114_v25 }
 0x31c   : > { %v4078_v37 = vadd.f32 %v4077_v33, %v4076_v38  ;;  %v4146_v13 = vrot.slane %v4145_v59, 4 }
 0x31e   : > { %v4079_v17 = vrot.slane %v4078_v37, 2  ;;  %v4147_v42 = vadd.f32 %v4146_v13, %v4145_v59 }
 0x320   : > { %v4080_v54 = vadd.f32 %v4079_v17, %v4078_v37  ;;  %v4148_v21 = vrot.slane %v4147_v42, 2 }
 0x322   : > { %v4081_v28 = vrot.slane %v4080_v54, 1  ;;  %v4149_v24 = vadd.f32 %v4148_v21, %v4147_v42 }
 0x324   : > { %v4150_v41 = vrot.slane %v4149_v24, 1  ;;  %v4082_v44 = vadd.f32 %v4081_v28, %v4080_v54 }
 0x326   : > { %v4151_v2 = vadd.f32 %v4150_v41, %v4149_v24 }
 0x328   : > { %v4153_v51 = vsel %vm7493_vm2, %v4082_v44, %v4151_v2 }
 0x329   : > { %4154 = vst [vmem:[%s262_s25] sm:$0x3] %v4153_v51 }
 0x32a PF: > { %s17_s21 = sadd.s32 1, %s5027_s21  }
 0x32b   : > { %p14_p4 = scmp.ge.s32.totalorder %s17_s21, 4  }
 0x32d   :  { %16 = sbr.rel (!%p14_p4) target bundleno = 1 (0x1), region = 90 }

</bundles_post_ra>
